<compile_context>
chip_gen: v6e
topology: v6e:2x2x1
jax: 0.10.0
libtpu: 0.0.40
codegen_flags: <defaults>
</compile_context>

<pallas_src>
import functools

import numpy as np
import jax
import jax.numpy as jnp
from jax import lax
from jax.experimental import pallas as pl
from jax.experimental.pallas import tpu as pltpu

LANES = 128


def _round_up(x, m):
    return (x + m - 1) // m * m


# --------------------------------------------------------------------------
# Kernel (one batched graph per grid step)
# --------------------------------------------------------------------------
def _vgnn_kernel(gslab_ref, wslab_ref, bslab_ref, out_ref, *,
                 n_steps, n_nodes, n_out, n_total, nt, E,
                 sd, md, hm, hr, woff, boff):
    f32 = jnp.float32
    bf16 = jnp.bfloat16

    # ---- graph structure (loaded once per graph; offsets are multiples of 8) ----
    # One-hot matrices are exact in bf16 -> cast once (loop-invariant), feed the
    # MXU bf16 operands for the dominant gather/scatter matmuls.
    G = gslab_ref[0:2 * E, :nt].astype(bf16)                 # [g_row; g_col]  (2E, nt)
    g_colT = gslab_ref[2 * E:2 * E + nt, :E].astype(bf16)    # (nt, E) scatter (pre-transposed)
    ef = gslab_ref[2 * E + nt:2 * E + nt + E, :4]            # (E, 4) edge features (f32)

    # ---- packed weights / biases (static slab slices, loaded once) ----
    def w(name, nrows, ncols):
        o = woff[name]
        return wslab_ref[o:o + nrows, :ncols]

    def bias(name, ncols):
        o = boff[name]
        return bslab_ref[o:o + 1, :ncols]

    w1ab = w("w1ab", sd, 2 * hm)   # [W1_src | W1_dst] fused (sd, 2*hm = 128)
    w1c = w("w1c", 4, hm)
    w2 = w("w2", hm, hm)
    w3 = w("w3", hm, md)
    wih = w("wih", md, 3 * sd)     # GRU input gates r|z|n fused
    whh = w("whh", sd, 3 * sd)     # GRU hidden gates r|z|n fused
    r1 = w("r1", sd, hr)
    r2 = w("r2", hr, hr)
    r3s = w("r3s", hr, LANES)      # logit-diff columns (2-class softmax closed form)

    b1 = bias("b1", hm)
    rb1 = bias("rb1", hr)
    rb2 = bias("rb2", hr)
    rb3s = bias("rb3s", LANES)

    # Pre-broadcast in-loop biases once (JAX does not CSE broadcast_in_dim).
    b2 = jnp.broadcast_to(bias("b2", hm), (E, hm))
    b3 = jnp.broadcast_to(bias("b3", md), (E, md))
    bih = jnp.broadcast_to(bias("bih", 3 * sd), (nt, 3 * sd))
    bhh = jnp.broadcast_to(bias("bhh", 3 * sd), (nt, 3 * sd))

    # Loop-invariant edge-feature projection (first message-MLP layer applied to
    # the static edge features), hoisted out of the time loop; includes b1.
    ef_proj = jnp.dot(ef, w1c, preferred_element_type=f32) + b1      # (E, hm)

    # Initial hidden state: zeros, column 0 = 1 on factor rows (built in-kernel).
    rix = lax.broadcasted_iota(jnp.int32, (nt, sd), 0)
    cix = lax.broadcasted_iota(jnp.int32, (nt, sd), 1)
    h0 = jnp.where((rix >= n_nodes) & (rix < n_total) & (cix == 0),
                   1.0, 0.0).astype(f32)

    def step(_, h):
        # message_passing(cat([h[row], h[col], edge_feat])):
        # per-node projection first (one 128-lane matmul), then ONE fused gather.
        hp = jnp.dot(h, w1ab, preferred_element_type=f32).astype(bf16)  # (nt, 2*hm)
        gp = jnp.dot(G, hp, preferred_element_type=f32)                 # (2E, 2*hm)
        m = gp[:E, :hm] + gp[E:, hm:] + ef_proj                         # (E, hm)
        m = jnp.maximum(m, 0.0)
        m = jnp.maximum(jnp.dot(m, w2, preferred_element_type=f32) + b2, 0.0)
        m = jnp.dot(m, w3, preferred_element_type=f32) + b3             # (E, md)

        # node_messages = scatter_sum(edge_messages, col): plain matmul with the
        # pre-transposed destination one-hot (transpose hoisted host-side).
        nm = jnp.dot(g_colT, m.astype(bf16), preferred_element_type=f32)  # (nt, md)

        # GRUCell(node_messages, h) with gates r|z|n fused per operand.
        gi = jnp.dot(nm, wih, preferred_element_type=f32) + bih         # (nt, 3*sd)
        gh = jnp.dot(h, whh, preferred_element_type=f32) + bhh          # (nt, 3*sd)
        r = jax.nn.sigmoid(gi[:, :sd] + gh[:, :sd])
        z = jax.nn.sigmoid(gi[:, sd:2 * sd] + gh[:, sd:2 * sd])
        n = jnp.tanh(gi[:, 2 * sd:] + r * gh[:, 2 * sd:])
        return (1.0 - z) * n + z * h

    h = lax.fori_loop(0, n_steps, step, h0, unroll=True)

    # Readout MLP; 2-class softmax is exactly sigmoid of the logit difference
    # (r3s/rb3s hold [l0-l1, l1-l0, 0, ...] columns) -> no cross-lane max/sum,
    # no approximate reciprocal, output stays lane-dense (128 lanes).
    hn = h[:n_out, :]
    x = jnp.maximum(jnp.dot(hn, r1, preferred_element_type=f32) + rb1, 0.0)
    x = jnp.maximum(jnp.dot(x, r2, preferred_element_type=f32) + rb2, 0.0)
    d = jnp.dot(x, r3s, preferred_element_type=f32) + rb3s              # (n_out, 128)
    out_ref[...] = jax.nn.sigmoid(d)   # lanes 0/1 = softmax probs; rest unused


# --------------------------------------------------------------------------
# Wrapper
# --------------------------------------------------------------------------
def vgnn_sparse_forward(gslab, wslab, bslab, *, n_steps, n_nodes, n_total, nt,
                        n_edges_padded, state_dim, message_dim,
                        hidden_msg, hidden_readout, woff, boff):
    B, g_rows, _ = gslab.shape
    w_rows = wslab.shape[0]
    b_rows = bslab.shape[0]
    n_out = _round_up(n_nodes, 8)

    kernel = functools.partial(
        _vgnn_kernel, n_steps=n_steps, n_nodes=n_nodes, n_out=n_out,
        n_total=n_total, nt=nt, E=n_edges_padded, sd=state_dim, md=message_dim,
        hm=hidden_msg, hr=hidden_readout, woff=woff, boff=boff)

    out = pl.pallas_call(
        kernel,
        out_shape=jax.ShapeDtypeStruct((B, n_out, LANES), jnp.float32),
        grid=(B,),
        in_specs=[
            pl.BlockSpec((None, g_rows, LANES), lambda g: (g, 0, 0)),  # per-graph slab
            pl.BlockSpec((w_rows, LANES), lambda g: (0, 0)),           # shared weights
            pl.BlockSpec((b_rows, LANES), lambda g: (0, 0)),           # shared biases
        ],
        out_specs=pl.BlockSpec((None, n_out, LANES), lambda g: (g, 0, 0)),
        compiler_params=pltpu.CompilerParams(
            dimension_semantics=("parallel",)),   # shard batched graphs across TCs
    )(gslab, wslab, bslab)
    return out[:, :n_nodes, :2]


# --------------------------------------------------------------------------
# Host-side (glue) graph construction and packing
# --------------------------------------------------------------------------
def build_graph(J, b, state_dim):
    """Mirrors the python loops in VGNN_sparse.forward; gather/scatter lowered
    to dense one-hot matrices so the kernel is pure matmul + elementwise."""
    J = np.asarray(J, dtype=np.float32)
    b = np.asarray(b, dtype=np.float32)
    n_nodes = J.shape[0]
    rows, cols = np.nonzero(J)
    factors = [(int(u), int(v)) for u, v in zip(rows, cols) if u < v]
    n_factors = len(factors)
    n_total = n_nodes + n_factors

    h0 = np.zeros((n_total, state_dim), np.float32)
    h0[n_nodes:, 0] = 1.0

    edge_index = []
    edge_feat = []
    for i, (u, v) in enumerate(factors):
        f = n_nodes + i
        edge_index.append((u, f)); edge_feat.append([0.0, b[u], J[u, v], J[v, u]])
        edge_index.append((v, f)); edge_feat.append([0.0, b[v], J[u, v], J[v, u]])
        edge_index.append((f, u)); edge_feat.append([1.0, b[u], J[u, v], J[v, u]])
        edge_index.append((f, v)); edge_feat.append([1.0, b[v], J[u, v], J[v, u]])

    n_edges = len(edge_index)
    g_row = np.zeros((n_edges, n_total), np.float32)
    g_col = np.zeros((n_edges, n_total), np.float32)
    for e, (r, c) in enumerate(edge_index):
        g_row[e, r] = 1.0
        g_col[e, c] = 1.0

    graph = dict(
        g_row=jnp.asarray(g_row),
        g_col=jnp.asarray(g_col),
        ef=jnp.asarray(np.asarray(edge_feat, np.float32)),
        h0=jnp.asarray(h0),
    )
    return graph, n_nodes, n_factors


def pack_graph(g_row, g_col, ef, nt):
    """Pack [g_row; g_col] (fused gather), g_col^T (pre-transposed scatter) and
    edge features into one lane-dense, 8-row-aligned slab."""
    g_row = np.asarray(g_row, np.float32)
    g_col = np.asarray(g_col, np.float32)
    ef = np.asarray(ef, np.float32)
    e_real, n_real = g_row.shape
    E = _round_up(e_real, 8)
    # TODO(synk): for nt > 128 or E > 128 switch to the index-based gather path.
    assert nt <= LANES and E <= LANES and ef.shape[1] <= LANES

    rows = 2 * E + nt + E
    slab = np.zeros((_round_up(rows, 8), LANES), np.float32)
    slab[0:e_real, :n_real] = g_row                      # rows [0, E)
    slab[E:E + e_real, :n_real] = g_col                  # rows [E, 2E)
    slab[2 * E:2 * E + n_real, :e_real] = g_col.T        # rows [2E, 2E+nt)
    slab[2 * E + nt:2 * E + nt + e_real, :ef.shape[1]] = ef
    return jnp.asarray(slab), E


def pack_params(params, state_dim, message_dim, hidden_msg, hidden_readout):
    """Pack all Linear / GRU weights into one 128-lane weight slab (each block at
    an 8-aligned row offset) and all biases into one bias slab. The readout head
    (r3, rb3) is stored as logit-difference columns for the closed-form softmax."""
    def cat(*names):
        return np.concatenate([np.asarray(params[n], np.float32) for n in names],
                              axis=1)

    r3 = np.asarray(params["r3"], np.float32)            # (hr, 2)
    rb3 = np.asarray(params["rb3"], np.float32).reshape(-1)  # (2,)
    r3s = np.zeros((r3.shape[0], LANES), np.float32)
    r3s[:, 0] = r3[:, 0] - r3[:, 1]
    r3s[:, 1] = r3[:, 1] - r3[:, 0]
    rb3s = np.zeros((1, LANES), np.float32)
    rb3s[0, 0] = rb3[0] - rb3[1]
    rb3s[0, 1] = rb3[1] - rb3[0]

    blocks = {
        "w1ab": cat("w1a", "w1b"),          # (sd, 2*hm)
        "w1c": np.asarray(params["w1c"], np.float32),
        "w2": np.asarray(params["w2"], np.float32),
        "w3": np.asarray(params["w3"], np.float32),
        "wih": cat("wir", "wiz", "win"),    # (md, 3*sd)
        "whh": cat("whr", "whz", "whn"),    # (sd, 3*sd)
        "r1": np.asarray(params["r1"], np.float32),
        "r2": np.asarray(params["r2"], np.float32),
        "r3s": r3s,
    }
    woff, total = {}, 0
    for name, wv in blocks.items():
        assert wv.shape[1] <= LANES
        woff[name] = total
        total += _round_up(wv.shape[0], 8)
    wslab = np.zeros((total, LANES), np.float32)
    for name, wv in blocks.items():
        o = woff[name]
        wslab[o:o + wv.shape[0], :wv.shape[1]] = wv

    biases = {
        "b1": params["b1"], "b2": params["b2"], "b3": params["b3"],
        "bih": cat("bir", "biz", "bin"),
        "bhh": cat("bhr", "bhz", "bhn"),
        "rb1": params["rb1"], "rb2": params["rb2"], "rb3s": rb3s,
    }
    boff = {}
    bslab = np.zeros((_round_up(len(biases), 8), LANES), np.float32)
    for i, (name, bv) in enumerate(biases.items()):
        bv = np.asarray(bv, np.float32).reshape(1, -1)
        boff[name] = i
        bslab[i, :bv.shape[1]] = bv
    return jnp.asarray(wslab), jnp.asarray(bslab), woff, boff


def init_params(key, state_dim, message_dim, hidden_msg, hidden_readout):
    """Deterministic synthetic init matching VGNN_sparse._initialization:
    Linear weights ~ N(0, 0.1), Linear biases = 0; GRUCell params ~ U(-k, k).
    All weights stored as (in_features, out_features)."""
    ks = jax.random.split(key, 10)
    sd = state_dim

    def lin_w(k, shape):
        return (0.1 * jax.random.normal(k, shape)).astype(jnp.float32)

    w1 = lin_w(ks[0], (2 * sd + 4, hidden_msg))
    params = dict(
        w1a=w1[:sd], w1b=w1[sd:2 * sd], w1c=w1[2 * sd:],
        b1=jnp.zeros((1, hidden_msg), jnp.float32),
        w2=lin_w(ks[1], (hidden_msg, hidden_msg)),
        b2=jnp.zeros((1, hidden_msg), jnp.float32),
        w3=lin_w(ks[2], (hidden_msg, message_dim)),
        b3=jnp.zeros((1, message_dim), jnp.float32),
        r1=lin_w(ks[3], (sd, hidden_readout)),
        rb1=jnp.zeros((1, hidden_readout), jnp.float32),
        r2=lin_w(ks[4], (hidden_readout, hidden_readout)),
        rb2=jnp.zeros((1, hidden_readout), jnp.float32),
        r3=lin_w(ks[5], (hidden_readout, 2)),
        rb3=jnp.zeros((1, 2), jnp.float32),
    )
    k = 1.0 / float(np.sqrt(sd))
    wih = jax.random.uniform(ks[6], (message_dim, 3 * sd), jnp.float32, -k, k)
    whh = jax.random.uniform(ks[7], (sd, 3 * sd), jnp.float32, -k, k)
    bih = jax.random.uniform(ks[8], (1, 3 * sd), jnp.float32, -k, k)
    bhh = jax.random.uniform(ks[9], (1, 3 * sd), jnp.float32, -k, k)
    params.update(
        wir=wih[:, :sd], wiz=wih[:, sd:2 * sd], win=wih[:, 2 * sd:],
        whr=whh[:, :sd], whz=whh[:, sd:2 * sd], whn=whh[:, 2 * sd:],
        bir=bih[:, :sd], biz=bih[:, sd:2 * sd], bin=bih[:, 2 * sd:],
        bhr=bhh[:, :sd], bhz=bhh[:, sd:2 * sd], bhn=bhh[:, 2 * sd:],
    )
    return params


def reference_forward(graph, params, n_steps, n_nodes):
    """Pure-JAX, unfused reference of the same math (sanity check)."""
    p = params
    g_row, g_col = graph["g_row"], graph["g_col"]
    ef, h = graph["ef"], graph["h0"]
    for _ in range(n_steps):
        h_row, h_col = g_row @ h, g_col @ h
        m = jax.nn.relu(h_row @ p["w1a"] + h_col @ p["w1b"] + ef @ p["w1c"] + p["b1"])
        m = jax.nn.relu(m @ p["w2"] + p["b2"])
        m = m @ p["w3"] + p["b3"]
        nm = g_col.T @ m
        r = jax.nn.sigmoid(nm @ p["wir"] + p["bir"] + h @ p["whr"] + p["bhr"])
        z = jax.nn.sigmoid(nm @ p["wiz"] + p["biz"] + h @ p["whz"] + p["bhz"])
        n = jnp.tanh(nm @ p["win"] + p["bin"] + r * (h @ p["whn"] + p["bhn"]))
        h = (1.0 - z) * n + z * h
    x = jax.nn.relu(h[:n_nodes] @ p["r1"] + p["rb1"])
    x = jax.nn.relu(x @ p["r2"] + p["rb2"])
    return jax.nn.softmax(x @ p["r3"] + p["rb3"], axis=1)


if __name__ == "__main__":
    # Small shapes consistent with the module's forward.
    state_dim, message_dim = 32, 32
    hidden_unit_message_dim, hidden_unit_readout_dim = 64, 64
    n_steps = 10
    n_nodes = 8   # ring Ising model -> 8 factors, 16 augmented nodes, 32 edges
    n_graphs = 2  # batched graphs -> "parallel" grid axis (fills both v7x TCs)

    key = jax.random.PRNGKey(0)
    keys = jax.random.split(key, 1 + 2 * n_graphs)
    kp, gkeys = keys[0], keys[1:]

    graphs = []
    for gi in range(n_graphs):
        kJ, kb = gkeys[2 * gi], gkeys[2 * gi + 1]
        vals = np.asarray(0.5 * jax.random.normal(kJ, (n_nodes,)), np.float32)
        J = np.zeros((n_nodes, n_nodes), np.float32)
        for i in range(n_nodes):
            j = (i + 1) % n_nodes
            J[i, j] = vals[i]
            J[j, i] = vals[i]
        b = np.asarray(0.5 * jax.random.normal(kb, (n_nodes,)), np.float32)
        graph, _, n_factors = build_graph(J, b, state_dim)
        graphs.append(graph)

    n_total = n_nodes + n_factors
    nt = _round_up(n_total, 8)
    params = init_params(kp, state_dim, message_dim,
                         hidden_unit_message_dim, hidden_unit_readout_dim)

    slabs = []
    for graph in graphs:
        slab, e_pad = pack_graph(graph["g_row"], graph["g_col"], graph["ef"], nt)
        slabs.append(np.asarray(slab))
    gslab = jnp.asarray(np.stack(slabs, axis=0))     # (B, g_rows, 128)
    wslab, bslab, woff, boff = pack_params(
        params, state_dim, message_dim,
        hidden_unit_message_dim, hidden_unit_readout_dim)

    out = vgnn_sparse_forward(
        gslab, wslab, bslab, n_steps=n_steps, n_nodes=n_nodes, n_total=n_total,
        nt=nt, n_edges_padded=e_pad, state_dim=state_dim,
        message_dim=message_dim, hidden_msg=hidden_unit_message_dim,
        hidden_readout=hidden_unit_readout_dim, woff=woff, boff=boff)
    out = jax.block_until_ready(out)

    ref = jnp.stack([reference_forward(g, params, n_steps, n_nodes)
                     for g in graphs], axis=0)
    ref = jax.block_until_ready(ref)

    assert out.shape == (n_graphs, n_nodes, 2)
    assert bool(jnp.all(jnp.isfinite(out)))
    err = float(jnp.max(jnp.abs(out - ref)))
    assert err < 5e-3, f"max abs err {err}"
    print("KERNEL_OK")
</pallas_src>

<mosaic_0001>
module attributes {stable_mosaic.version = 11 : i64} {
  func.func @_vgnn_kernel(%arg0: i32, %arg1: memref<1x112x128xf32, #tpu.memory_space<vmem>>, %arg2: memref<392x128xf32, #tpu.memory_space<vmem>>, %arg3: memref<8x128xf32, #tpu.memory_space<vmem>>, %arg4: memref<1x8x128xf32, #tpu.memory_space<vmem>>) attributes {dimension_semantics = [#tpu.dimension_semantics<parallel>], iteration_bounds = array<i64: 2>, scalar_prefetch = 0 : i64, scratch_operands = 0 : i64, tpu.core_type = #tpu.core_type<tc>, window_params = [{transform_indices = @transform_0, window_bounds = array<i64: 1, 112, 128>}, {pipeline_mode = #tpu.pipeline_mode<synchronous>, transform_indices = @transform_1, window_bounds = array<i64: 392, 128>}, {pipeline_mode = #tpu.pipeline_mode<synchronous>, transform_indices = @transform_2, window_bounds = array<i64: 8, 128>}, {transform_indices = @transform_3, window_bounds = array<i64: 1, 8, 128>}]} {
    %c0 = arith.constant 0 : index
    %c0_0 = arith.constant 0 : index
    %c0_1 = arith.constant 0 : index
    %0 = vector.load %arg1[%c0, %c0_0, %c0_1] : memref<1x112x128xf32, #tpu.memory_space<vmem>>, vector<1x64x16xf32>
    %1 = vector.shape_cast %0 : vector<1x64x16xf32> to vector<64x16xf32>
    %2 = arith.truncf %1 : vector<64x16xf32> to vector<64x16xbf16>
    %c0_2 = arith.constant 0 : index
    %c64 = arith.constant 64 : index
    %c0_3 = arith.constant 0 : index
    %3 = vector.load %arg1[%c0_2, %c64, %c0_3] : memref<1x112x128xf32, #tpu.memory_space<vmem>>, vector<1x16x32xf32>
    %4 = vector.shape_cast %3 : vector<1x16x32xf32> to vector<16x32xf32>
    %5 = arith.truncf %4 : vector<16x32xf32> to vector<16x32xbf16>
    %c0_4 = arith.constant 0 : index
    %c80 = arith.constant 80 : index
    %c0_5 = arith.constant 0 : index
    %6 = vector.load %arg1[%c0_4, %c80, %c0_5] : memref<1x112x128xf32, #tpu.memory_space<vmem>>, vector<1x32x4xf32>
    %7 = vector.shape_cast %6 : vector<1x32x4xf32> to vector<32x4xf32>
    %c0_6 = arith.constant 0 : index
    %c0_7 = arith.constant 0 : index
    %8 = vector.load %arg2[%c0_6, %c0_7] : memref<392x128xf32, #tpu.memory_space<vmem>>, vector<32x128xf32>
    %c32 = arith.constant 32 : index
    %c0_8 = arith.constant 0 : index
    %9 = vector.load %arg2[%c32, %c0_8] : memref<392x128xf32, #tpu.memory_space<vmem>>, vector<4x64xf32>
    %c40 = arith.constant 40 : index
    %c0_9 = arith.constant 0 : index
    %10 = vector.load %arg2[%c40, %c0_9] : memref<392x128xf32, #tpu.memory_space<vmem>>, vector<64x64xf32>
    %c104 = arith.constant 104 : index
    %c0_10 = arith.constant 0 : index
    %11 = vector.load %arg2[%c104, %c0_10] : memref<392x128xf32, #tpu.memory_space<vmem>>, vector<64x32xf32>
    %c168 = arith.constant 168 : index
    %c0_11 = arith.constant 0 : index
    %12 = vector.load %arg2[%c168, %c0_11] : memref<392x128xf32, #tpu.memory_space<vmem>>, vector<32x96xf32>
    %c200 = arith.constant 200 : index
    %c0_12 = arith.constant 0 : index
    %13 = vector.load %arg2[%c200, %c0_12] : memref<392x128xf32, #tpu.memory_space<vmem>>, vector<32x96xf32>
    %c232 = arith.constant 232 : index
    %c0_13 = arith.constant 0 : index
    %14 = vector.load %arg2[%c232, %c0_13] : memref<392x128xf32, #tpu.memory_space<vmem>>, vector<32x64xf32>
    %c264 = arith.constant 264 : index
    %c0_14 = arith.constant 0 : index
    %15 = vector.load %arg2[%c264, %c0_14] : memref<392x128xf32, #tpu.memory_space<vmem>>, vector<64x64xf32>
    %c328 = arith.constant 328 : index
    %c0_15 = arith.constant 0 : index
    %16 = vector.load %arg2[%c328, %c0_15] : memref<392x128xf32, #tpu.memory_space<vmem>>, vector<64x128xf32>
    %c0_16 = arith.constant 0 : index
    %c0_17 = arith.constant 0 : index
    %17 = vector.load %arg3[%c0_16, %c0_17] : memref<8x128xf32, #tpu.memory_space<vmem>>, vector<1x64xf32>
    %c5 = arith.constant 5 : index
    %c0_18 = arith.constant 0 : index
    %18 = vector.load %arg3[%c5, %c0_18] : memref<8x128xf32, #tpu.memory_space<vmem>>, vector<1x64xf32>
    %c6 = arith.constant 6 : index
    %c0_19 = arith.constant 0 : index
    %19 = vector.load %arg3[%c6, %c0_19] : memref<8x128xf32, #tpu.memory_space<vmem>>, vector<1x64xf32>
    %c7 = arith.constant 7 : index
    %c0_20 = arith.constant 0 : index
    %20 = vector.load %arg3[%c7, %c0_20] : memref<8x128xf32, #tpu.memory_space<vmem>>, vector<1x128xf32>
    %c1 = arith.constant 1 : index
    %c0_21 = arith.constant 0 : index
    %21 = vector.load %arg3[%c1, %c0_21] : memref<8x128xf32, #tpu.memory_space<vmem>>, vector<1x64xf32>
    %22 = vector.shape_cast %21 : vector<1x64xf32> to vector<1x64xf32>
    %23 = vector.broadcast %22 : vector<1x64xf32> to vector<32x64xf32>
    %c2 = arith.constant 2 : index
    %c0_22 = arith.constant 0 : index
    %24 = vector.load %arg3[%c2, %c0_22] : memref<8x128xf32, #tpu.memory_space<vmem>>, vector<1x32xf32>
    %25 = vector.shape_cast %24 : vector<1x32xf32> to vector<1x32xf32>
    %26 = vector.broadcast %25 : vector<1x32xf32> to vector<32x32xf32>
    %c3 = arith.constant 3 : index
    %c0_23 = arith.constant 0 : index
    %27 = vector.load %arg3[%c3, %c0_23] : memref<8x128xf32, #tpu.memory_space<vmem>>, vector<1x96xf32>
    %28 = vector.shape_cast %27 : vector<1x96xf32> to vector<1x96xf32>
    %29 = vector.broadcast %28 : vector<1x96xf32> to vector<16x96xf32>
    %c4 = arith.constant 4 : index
    %c0_24 = arith.constant 0 : index
    %30 = vector.load %arg3[%c4, %c0_24] : memref<8x128xf32, #tpu.memory_space<vmem>>, vector<1x96xf32>
    %31 = vector.shape_cast %30 : vector<1x96xf32> to vector<1x96xf32>
    %32 = vector.broadcast %31 : vector<1x96xf32> to vector<16x96xf32>
    %cst = arith.constant dense<0.000000e+00> : vector<32x64xf32>
    %33 = tpu.matmul %7, %9, %cst {dimension_numbers = #tpu.dot_dimension_numbers<[1], [0], [0], [1], [0, 0, 1, 1], [], []>} : vector<32x4xf32>, vector<4x64xf32>, vector<32x64xf32> -> vector<32x64xf32>
    %34 = vector.broadcast %17 : vector<1x64xf32> to vector<32x64xf32>
    %35 = arith.addf %33, %34 : vector<32x64xf32>
    %36 = tpu.iota {dimensions = array<i32: 0>} : vector<16x32xi32>
    %37 = tpu.iota {dimensions = array<i32: 1>} : vector<16x32xi32>
    %c8_i32 = arith.constant 8 : i32
    %38 = vector.broadcast %c8_i32 : i32 to vector<16x32xi32>
    %39 = arith.cmpi sge, %36, %38 : vector<16x32xi32>
    %c16_i32 = arith.constant 16 : i32
    %40 = vector.broadcast %c16_i32 : i32 to vector<16x32xi32>
    %41 = arith.cmpi slt, %36, %40 : vector<16x32xi32>
    %42 = arith.andi %39, %41 : vector<16x32xi1>
    %c0_i32 = arith.constant 0 : i32
    %43 = vector.broadcast %c0_i32 : i32 to vector<16x32xi32>
    %44 = arith.cmpi eq, %37, %43 : vector<16x32xi32>
    %45 = arith.andi %42, %44 : vector<16x32xi1>
    %cst_25 = arith.constant 1.000000e+00 : f32
    %cst_26 = arith.constant 0.000000e+00 : f32
    %46 = vector.broadcast %cst_25 : f32 to vector<16x32xf32>
    %47 = vector.broadcast %cst_26 : f32 to vector<16x32xf32>
    %48 = arith.select %45, %46, %47 : vector<16x32xi1>, vector<16x32xf32>
    %c0_i32_27 = arith.constant 0 : i32
    %cst_28 = arith.constant dense<0.000000e+00> : vector<16x128xf32>
    %49 = tpu.matmul %48, %8, %cst_28 {dimension_numbers = #tpu.dot_dimension_numbers<[1], [0], [0], [1], [0, 0, 1, 1], [], []>} : vector<16x32xf32>, vector<32x128xf32>, vector<16x128xf32> -> vector<16x128xf32>
    %50 = arith.truncf %49 : vector<16x128xf32> to vector<16x128xbf16>
    %cst_29 = arith.constant dense<0.000000e+00> : vector<64x128xf32>
    %51 = tpu.matmul %2, %50, %cst_29 {dimension_numbers = #tpu.dot_dimension_numbers<[1], [0], [0], [1], [0, 0, 1, 1], [], []>} : vector<64x16xbf16>, vector<16x128xbf16>, vector<64x128xf32> -> vector<64x128xf32>
    %52 = vector.extract_strided_slice %51 {offsets = [0, 0], sizes = [32, 64], strides = [1, 1]} : vector<64x128xf32> to vector<32x64xf32>
    %53 = vector.extract_strided_slice %51 {offsets = [32, 64], sizes = [32, 64], strides = [1, 1]} : vector<64x128xf32> to vector<32x64xf32>
    %54 = arith.addf %52, %53 : vector<32x64xf32>
    %55 = arith.addf %54, %35 : vector<32x64xf32>
    %cst_30 = arith.constant 0.000000e+00 : f32
    %56 = vector.broadcast %cst_30 : f32 to vector<32x64xf32>
    %57 = arith.maximumf %55, %56 : vector<32x64xf32>
    %cst_31 = arith.constant dense<0.000000e+00> : vector<32x64xf32>
    %58 = tpu.matmul %57, %10, %cst_31 {dimension_numbers = #tpu.dot_dimension_numbers<[1], [0], [0], [1], [0, 0, 1, 1], [], []>} : vector<32x64xf32>, vector<64x64xf32>, vector<32x64xf32> -> vector<32x64xf32>
    %59 = arith.addf %58, %23 : vector<32x64xf32>
    %cst_32 = arith.constant 0.000000e+00 : f32
    %60 = vector.broadcast %cst_32 : f32 to vector<32x64xf32>
    %61 = arith.maximumf %59, %60 : vector<32x64xf32>
    %cst_33 = arith.constant dense<0.000000e+00> : vector<32x32xf32>
    %62 = tpu.matmul %61, %11, %cst_33 {dimension_numbers = #tpu.dot_dimension_numbers<[1], [0], [0], [1], [0, 0, 1, 1], [], []>} : vector<32x64xf32>, vector<64x32xf32>, vector<32x32xf32> -> vector<32x32xf32>
    %63 = arith.addf %62, %26 : vector<32x32xf32>
    %64 = arith.truncf %63 : vector<32x32xf32> to vector<32x32xbf16>
    %cst_34 = arith.constant dense<0.000000e+00> : vector<16x32xf32>
    %65 = tpu.matmul %5, %64, %cst_34 {dimension_numbers = #tpu.dot_dimension_numbers<[1], [0], [0], [1], [0, 0, 1, 1], [], []>} : vector<16x32xbf16>, vector<32x32xbf16>, vector<16x32xf32> -> vector<16x32xf32>
    %cst_35 = arith.constant dense<0.000000e+00> : vector<16x96xf32>
    %66 = tpu.matmul %65, %12, %cst_35 {dimension_numbers = #tpu.dot_dimension_numbers<[1], [0], [0], [1], [0, 0, 1, 1], [], []>} : vector<16x32xf32>, vector<32x96xf32>, vector<16x96xf32> -> vector<16x96xf32>
    %67 = arith.addf %66, %29 : vector<16x96xf32>
    %cst_36 = arith.constant dense<0.000000e+00> : vector<16x96xf32>
    %68 = tpu.matmul %48, %13, %cst_36 {dimension_numbers = #tpu.dot_dimension_numbers<[1], [0], [0], [1], [0, 0, 1, 1], [], []>} : vector<16x32xf32>, vector<32x96xf32>, vector<16x96xf32> -> vector<16x96xf32>
    %69 = arith.addf %68, %32 : vector<16x96xf32>
    %70 = vector.extract_strided_slice %67 {offsets = [0, 0], sizes = [16, 32], strides = [1, 1]} : vector<16x96xf32> to vector<16x32xf32>
    %71 = vector.extract_strided_slice %69 {offsets = [0, 0], sizes = [16, 32], strides = [1, 1]} : vector<16x96xf32> to vector<16x32xf32>
    %72 = arith.addf %70, %71 : vector<16x32xf32>
    %73 = arith.negf %72 : vector<16x32xf32>
    %74 = math.exp %73 : vector<16x32xf32>
    %cst_37 = arith.constant 1.000000e+00 : f32
    %75 = vector.broadcast %cst_37 : f32 to vector<16x32xf32>
    %76 = arith.addf %75, %74 : vector<16x32xf32>
    %77 = arith.divf %75, %76 : vector<16x32xf32>
    %78 = vector.extract_strided_slice %67 {offsets = [0, 32], sizes = [16, 32], strides = [1, 1]} : vector<16x96xf32> to vector<16x32xf32>
    %79 = vector.extract_strided_slice %69 {offsets = [0, 32], sizes = [16, 32], strides = [1, 1]} : vector<16x96xf32> to vector<16x32xf32>
    %80 = arith.addf %78, %79 : vector<16x32xf32>
    %81 = arith.negf %80 : vector<16x32xf32>
    %82 = math.exp %81 : vector<16x32xf32>
    %cst_38 = arith.constant 1.000000e+00 : f32
    %83 = vector.broadcast %cst_38 : f32 to vector<16x32xf32>
    %84 = arith.addf %83, %82 : vector<16x32xf32>
    %85 = arith.divf %83, %84 : vector<16x32xf32>
    %86 = vector.extract_strided_slice %67 {offsets = [0, 64], sizes = [16, 32], strides = [1, 1]} : vector<16x96xf32> to vector<16x32xf32>
    %87 = vector.extract_strided_slice %69 {offsets = [0, 64], sizes = [16, 32], strides = [1, 1]} : vector<16x96xf32> to vector<16x32xf32>
    %88 = arith.mulf %77, %87 : vector<16x32xf32>
    %89 = arith.addf %86, %88 : vector<16x32xf32>
    %90 = math.tanh %89 : vector<16x32xf32>
    %cst_39 = arith.constant 1.000000e+00 : f32
    %91 = vector.broadcast %cst_39 : f32 to vector<16x32xf32>
    %92 = arith.subf %91, %85 : vector<16x32xf32>
    %93 = arith.mulf %92, %90 : vector<16x32xf32>
    %94 = arith.mulf %85, %48 : vector<16x32xf32>
    %95 = arith.addf %93, %94 : vector<16x32xf32>
    %c1_i32 = arith.constant 1 : i32
    %cst_40 = arith.constant dense<0.000000e+00> : vector<16x128xf32>
    %96 = tpu.matmul %95, %8, %cst_40 {dimension_numbers = #tpu.dot_dimension_numbers<[1], [0], [0], [1], [0, 0, 1, 1], [], []>} : vector<16x32xf32>, vector<32x128xf32>, vector<16x128xf32> -> vector<16x128xf32>
    %97 = arith.truncf %96 : vector<16x128xf32> to vector<16x128xbf16>
    %cst_41 = arith.constant dense<0.000000e+00> : vector<64x128xf32>
    %98 = tpu.matmul %2, %97, %cst_41 {dimension_numbers = #tpu.dot_dimension_numbers<[1], [0], [0], [1], [0, 0, 1, 1], [], []>} : vector<64x16xbf16>, vector<16x128xbf16>, vector<64x128xf32> -> vector<64x128xf32>
    %99 = vector.extract_strided_slice %98 {offsets = [0, 0], sizes = [32, 64], strides = [1, 1]} : vector<64x128xf32> to vector<32x64xf32>
    %100 = vector.extract_strided_slice %98 {offsets = [32, 64], sizes = [32, 64], strides = [1, 1]} : vector<64x128xf32> to vector<32x64xf32>
    %101 = arith.addf %99, %100 : vector<32x64xf32>
    %102 = arith.addf %101, %35 : vector<32x64xf32>
    %cst_42 = arith.constant 0.000000e+00 : f32
    %103 = vector.broadcast %cst_42 : f32 to vector<32x64xf32>
    %104 = arith.maximumf %102, %103 : vector<32x64xf32>
    %cst_43 = arith.constant dense<0.000000e+00> : vector<32x64xf32>
    %105 = tpu.matmul %104, %10, %cst_43 {dimension_numbers = #tpu.dot_dimension_numbers<[1], [0], [0], [1], [0, 0, 1, 1], [], []>} : vector<32x64xf32>, vector<64x64xf32>, vector<32x64xf32> -> vector<32x64xf32>
    %106 = arith.addf %105, %23 : vector<32x64xf32>
    %cst_44 = arith.constant 0.000000e+00 : f32
    %107 = vector.broadcast %cst_44 : f32 to vector<32x64xf32>
    %108 = arith.maximumf %106, %107 : vector<32x64xf32>
    %cst_45 = arith.constant dense<0.000000e+00> : vector<32x32xf32>
    %109 = tpu.matmul %108, %11, %cst_45 {dimension_numbers = #tpu.dot_dimension_numbers<[1], [0], [0], [1], [0, 0, 1, 1], [], []>} : vector<32x64xf32>, vector<64x32xf32>, vector<32x32xf32> -> vector<32x32xf32>
    %110 = arith.addf %109, %26 : vector<32x32xf32>
    %111 = arith.truncf %110 : vector<32x32xf32> to vector<32x32xbf16>
    %cst_46 = arith.constant dense<0.000000e+00> : vector<16x32xf32>
    %112 = tpu.matmul %5, %111, %cst_46 {dimension_numbers = #tpu.dot_dimension_numbers<[1], [0], [0], [1], [0, 0, 1, 1], [], []>} : vector<16x32xbf16>, vector<32x32xbf16>, vector<16x32xf32> -> vector<16x32xf32>
    %cst_47 = arith.constant dense<0.000000e+00> : vector<16x96xf32>
    %113 = tpu.matmul %112, %12, %cst_47 {dimension_numbers = #tpu.dot_dimension_numbers<[1], [0], [0], [1], [0, 0, 1, 1], [], []>} : vector<16x32xf32>, vector<32x96xf32>, vector<16x96xf32> -> vector<16x96xf32>
    %114 = arith.addf %113, %29 : vector<16x96xf32>
    %cst_48 = arith.constant dense<0.000000e+00> : vector<16x96xf32>
    %115 = tpu.matmul %95, %13, %cst_48 {dimension_numbers = #tpu.dot_dimension_numbers<[1], [0], [0], [1], [0, 0, 1, 1], [], []>} : vector<16x32xf32>, vector<32x96xf32>, vector<16x96xf32> -> vector<16x96xf32>
    %116 = arith.addf %115, %32 : vector<16x96xf32>
    %117 = vector.extract_strided_slice %114 {offsets = [0, 0], sizes = [16, 32], strides = [1, 1]} : vector<16x96xf32> to vector<16x32xf32>
    %118 = vector.extract_strided_slice %116 {offsets = [0, 0], sizes = [16, 32], strides = [1, 1]} : vector<16x96xf32> to vector<16x32xf32>
    %119 = arith.addf %117, %118 : vector<16x32xf32>
    %120 = arith.negf %119 : vector<16x32xf32>
    %121 = math.exp %120 : vector<16x32xf32>
    %cst_49 = arith.constant 1.000000e+00 : f32
    %122 = vector.broadcast %cst_49 : f32 to vector<16x32xf32>
    %123 = arith.addf %122, %121 : vector<16x32xf32>
    %124 = arith.divf %122, %123 : vector<16x32xf32>
    %125 = vector.extract_strided_slice %114 {offsets = [0, 32], sizes = [16, 32], strides = [1, 1]} : vector<16x96xf32> to vector<16x32xf32>
    %126 = vector.extract_strided_slice %116 {offsets = [0, 32], sizes = [16, 32], strides = [1, 1]} : vector<16x96xf32> to vector<16x32xf32>
    %127 = arith.addf %125, %126 : vector<16x32xf32>
    %128 = arith.negf %127 : vector<16x32xf32>
    %129 = math.exp %128 : vector<16x32xf32>
    %cst_50 = arith.constant 1.000000e+00 : f32
    %130 = vector.broadcast %cst_50 : f32 to vector<16x32xf32>
    %131 = arith.addf %130, %129 : vector<16x32xf32>
    %132 = arith.divf %130, %131 : vector<16x32xf32>
    %133 = vector.extract_strided_slice %114 {offsets = [0, 64], sizes = [16, 32], strides = [1, 1]} : vector<16x96xf32> to vector<16x32xf32>
    %134 = vector.extract_strided_slice %116 {offsets = [0, 64], sizes = [16, 32], strides = [1, 1]} : vector<16x96xf32> to vector<16x32xf32>
    %135 = arith.mulf %124, %134 : vector<16x32xf32>
    %136 = arith.addf %133, %135 : vector<16x32xf32>
    %137 = math.tanh %136 : vector<16x32xf32>
    %cst_51 = arith.constant 1.000000e+00 : f32
    %138 = vector.broadcast %cst_51 : f32 to vector<16x32xf32>
    %139 = arith.subf %138, %132 : vector<16x32xf32>
    %140 = arith.mulf %139, %137 : vector<16x32xf32>
    %141 = arith.mulf %132, %95 : vector<16x32xf32>
    %142 = arith.addf %140, %141 : vector<16x32xf32>
    %c2_i32 = arith.constant 2 : i32
    %cst_52 = arith.constant dense<0.000000e+00> : vector<16x128xf32>
    %143 = tpu.matmul %142, %8, %cst_52 {dimension_numbers = #tpu.dot_dimension_numbers<[1], [0], [0], [1], [0, 0, 1, 1], [], []>} : vector<16x32xf32>, vector<32x128xf32>, vector<16x128xf32> -> vector<16x128xf32>
    %144 = arith.truncf %143 : vector<16x128xf32> to vector<16x128xbf16>
    %cst_53 = arith.constant dense<0.000000e+00> : vector<64x128xf32>
    %145 = tpu.matmul %2, %144, %cst_53 {dimension_numbers = #tpu.dot_dimension_numbers<[1], [0], [0], [1], [0, 0, 1, 1], [], []>} : vector<64x16xbf16>, vector<16x128xbf16>, vector<64x128xf32> -> vector<64x128xf32>
    %146 = vector.extract_strided_slice %145 {offsets = [0, 0], sizes = [32, 64], strides = [1, 1]} : vector<64x128xf32> to vector<32x64xf32>
    %147 = vector.extract_strided_slice %145 {offsets = [32, 64], sizes = [32, 64], strides = [1, 1]} : vector<64x128xf32> to vector<32x64xf32>
    %148 = arith.addf %146, %147 : vector<32x64xf32>
    %149 = arith.addf %148, %35 : vector<32x64xf32>
    %cst_54 = arith.constant 0.000000e+00 : f32
    %150 = vector.broadcast %cst_54 : f32 to vector<32x64xf32>
    %151 = arith.maximumf %149, %150 : vector<32x64xf32>
    %cst_55 = arith.constant dense<0.000000e+00> : vector<32x64xf32>
    %152 = tpu.matmul %151, %10, %cst_55 {dimension_numbers = #tpu.dot_dimension_numbers<[1], [0], [0], [1], [0, 0, 1, 1], [], []>} : vector<32x64xf32>, vector<64x64xf32>, vector<32x64xf32> -> vector<32x64xf32>
    %153 = arith.addf %152, %23 : vector<32x64xf32>
    %cst_56 = arith.constant 0.000000e+00 : f32
    %154 = vector.broadcast %cst_56 : f32 to vector<32x64xf32>
    %155 = arith.maximumf %153, %154 : vector<32x64xf32>
    %cst_57 = arith.constant dense<0.000000e+00> : vector<32x32xf32>
    %156 = tpu.matmul %155, %11, %cst_57 {dimension_numbers = #tpu.dot_dimension_numbers<[1], [0], [0], [1], [0, 0, 1, 1], [], []>} : vector<32x64xf32>, vector<64x32xf32>, vector<32x32xf32> -> vector<32x32xf32>
    %157 = arith.addf %156, %26 : vector<32x32xf32>
    %158 = arith.truncf %157 : vector<32x32xf32> to vector<32x32xbf16>
    %cst_58 = arith.constant dense<0.000000e+00> : vector<16x32xf32>
    %159 = tpu.matmul %5, %158, %cst_58 {dimension_numbers = #tpu.dot_dimension_numbers<[1], [0], [0], [1], [0, 0, 1, 1], [], []>} : vector<16x32xbf16>, vector<32x32xbf16>, vector<16x32xf32> -> vector<16x32xf32>
    %cst_59 = arith.constant dense<0.000000e+00> : vector<16x96xf32>
    %160 = tpu.matmul %159, %12, %cst_59 {dimension_numbers = #tpu.dot_dimension_numbers<[1], [0], [0], [1], [0, 0, 1, 1], [], []>} : vector<16x32xf32>, vector<32x96xf32>, vector<16x96xf32> -> vector<16x96xf32>
    %161 = arith.addf %160, %29 : vector<16x96xf32>
    %cst_60 = arith.constant dense<0.000000e+00> : vector<16x96xf32>
    %162 = tpu.matmul %142, %13, %cst_60 {dimension_numbers = #tpu.dot_dimension_numbers<[1], [0], [0], [1], [0, 0, 1, 1], [], []>} : vector<16x32xf32>, vector<32x96xf32>, vector<16x96xf32> -> vector<16x96xf32>
    %163 = arith.addf %162, %32 : vector<16x96xf32>
    %164 = vector.extract_strided_slice %161 {offsets = [0, 0], sizes = [16, 32], strides = [1, 1]} : vector<16x96xf32> to vector<16x32xf32>
    %165 = vector.extract_strided_slice %163 {offsets = [0, 0], sizes = [16, 32], strides = [1, 1]} : vector<16x96xf32> to vector<16x32xf32>
    %166 = arith.addf %164, %165 : vector<16x32xf32>
    %167 = arith.negf %166 : vector<16x32xf32>
    %168 = math.exp %167 : vector<16x32xf32>
    %cst_61 = arith.constant 1.000000e+00 : f32
    %169 = vector.broadcast %cst_61 : f32 to vector<16x32xf32>
    %170 = arith.addf %169, %168 : vector<16x32xf32>
    %171 = arith.divf %169, %170 : vector<16x32xf32>
    %172 = vector.extract_strided_slice %161 {offsets = [0, 32], sizes = [16, 32], strides = [1, 1]} : vector<16x96xf32> to vector<16x32xf32>
    %173 = vector.extract_strided_slice %163 {offsets = [0, 32], sizes = [16, 32], strides = [1, 1]} : vector<16x96xf32> to vector<16x32xf32>
    %174 = arith.addf %172, %173 : vector<16x32xf32>
    %175 = arith.negf %174 : vector<16x32xf32>
    %176 = math.exp %175 : vector<16x32xf32>
    %cst_62 = arith.constant 1.000000e+00 : f32
    %177 = vector.broadcast %cst_62 : f32 to vector<16x32xf32>
    %178 = arith.addf %177, %176 : vector<16x32xf32>
    %179 = arith.divf %177, %178 : vector<16x32xf32>
    %180 = vector.extract_strided_slice %161 {offsets = [0, 64], sizes = [16, 32], strides = [1, 1]} : vector<16x96xf32> to vector<16x32xf32>
    %181 = vector.extract_strided_slice %163 {offsets = [0, 64], sizes = [16, 32], strides = [1, 1]} : vector<16x96xf32> to vector<16x32xf32>
    %182 = arith.mulf %171, %181 : vector<16x32xf32>
    %183 = arith.addf %180, %182 : vector<16x32xf32>
    %184 = math.tanh %183 : vector<16x32xf32>
    %cst_63 = arith.constant 1.000000e+00 : f32
    %185 = vector.broadcast %cst_63 : f32 to vector<16x32xf32>
    %186 = arith.subf %185, %179 : vector<16x32xf32>
    %187 = arith.mulf %186, %184 : vector<16x32xf32>
    %188 = arith.mulf %179, %142 : vector<16x32xf32>
    %189 = arith.addf %187, %188 : vector<16x32xf32>
    %c3_i32 = arith.constant 3 : i32
    %cst_64 = arith.constant dense<0.000000e+00> : vector<16x128xf32>
    %190 = tpu.matmul %189, %8, %cst_64 {dimension_numbers = #tpu.dot_dimension_numbers<[1], [0], [0], [1], [0, 0, 1, 1], [], []>} : vector<16x32xf32>, vector<32x128xf32>, vector<16x128xf32> -> vector<16x128xf32>
    %191 = arith.truncf %190 : vector<16x128xf32> to vector<16x128xbf16>
    %cst_65 = arith.constant dense<0.000000e+00> : vector<64x128xf32>
    %192 = tpu.matmul %2, %191, %cst_65 {dimension_numbers = #tpu.dot_dimension_numbers<[1], [0], [0], [1], [0, 0, 1, 1], [], []>} : vector<64x16xbf16>, vector<16x128xbf16>, vector<64x128xf32> -> vector<64x128xf32>
    %193 = vector.extract_strided_slice %192 {offsets = [0, 0], sizes = [32, 64], strides = [1, 1]} : vector<64x128xf32> to vector<32x64xf32>
    %194 = vector.extract_strided_slice %192 {offsets = [32, 64], sizes = [32, 64], strides = [1, 1]} : vector<64x128xf32> to vector<32x64xf32>
    %195 = arith.addf %193, %194 : vector<32x64xf32>
    %196 = arith.addf %195, %35 : vector<32x64xf32>
    %cst_66 = arith.constant 0.000000e+00 : f32
    %197 = vector.broadcast %cst_66 : f32 to vector<32x64xf32>
    %198 = arith.maximumf %196, %197 : vector<32x64xf32>
    %cst_67 = arith.constant dense<0.000000e+00> : vector<32x64xf32>
    %199 = tpu.matmul %198, %10, %cst_67 {dimension_numbers = #tpu.dot_dimension_numbers<[1], [0], [0], [1], [0, 0, 1, 1], [], []>} : vector<32x64xf32>, vector<64x64xf32>, vector<32x64xf32> -> vector<32x64xf32>
    %200 = arith.addf %199, %23 : vector<32x64xf32>
    %cst_68 = arith.constant 0.000000e+00 : f32
    %201 = vector.broadcast %cst_68 : f32 to vector<32x64xf32>
    %202 = arith.maximumf %200, %201 : vector<32x64xf32>
    %cst_69 = arith.constant dense<0.000000e+00> : vector<32x32xf32>
    %203 = tpu.matmul %202, %11, %cst_69 {dimension_numbers = #tpu.dot_dimension_numbers<[1], [0], [0], [1], [0, 0, 1, 1], [], []>} : vector<32x64xf32>, vector<64x32xf32>, vector<32x32xf32> -> vector<32x32xf32>
    %204 = arith.addf %203, %26 : vector<32x32xf32>
    %205 = arith.truncf %204 : vector<32x32xf32> to vector<32x32xbf16>
    %cst_70 = arith.constant dense<0.000000e+00> : vector<16x32xf32>
    %206 = tpu.matmul %5, %205, %cst_70 {dimension_numbers = #tpu.dot_dimension_numbers<[1], [0], [0], [1], [0, 0, 1, 1], [], []>} : vector<16x32xbf16>, vector<32x32xbf16>, vector<16x32xf32> -> vector<16x32xf32>
    %cst_71 = arith.constant dense<0.000000e+00> : vector<16x96xf32>
    %207 = tpu.matmul %206, %12, %cst_71 {dimension_numbers = #tpu.dot_dimension_numbers<[1], [0], [0], [1], [0, 0, 1, 1], [], []>} : vector<16x32xf32>, vector<32x96xf32>, vector<16x96xf32> -> vector<16x96xf32>
    %208 = arith.addf %207, %29 : vector<16x96xf32>
    %cst_72 = arith.constant dense<0.000000e+00> : vector<16x96xf32>
    %209 = tpu.matmul %189, %13, %cst_72 {dimension_numbers = #tpu.dot_dimension_numbers<[1], [0], [0], [1], [0, 0, 1, 1], [], []>} : vector<16x32xf32>, vector<32x96xf32>, vector<16x96xf32> -> vector<16x96xf32>
    %210 = arith.addf %209, %32 : vector<16x96xf32>
    %211 = vector.extract_strided_slice %208 {offsets = [0, 0], sizes = [16, 32], strides = [1, 1]} : vector<16x96xf32> to vector<16x32xf32>
    %212 = vector.extract_strided_slice %210 {offsets = [0, 0], sizes = [16, 32], strides = [1, 1]} : vector<16x96xf32> to vector<16x32xf32>
    %213 = arith.addf %211, %212 : vector<16x32xf32>
    %214 = arith.negf %213 : vector<16x32xf32>
    %215 = math.exp %214 : vector<16x32xf32>
    %cst_73 = arith.constant 1.000000e+00 : f32
    %216 = vector.broadcast %cst_73 : f32 to vector<16x32xf32>
    %217 = arith.addf %216, %215 : vector<16x32xf32>
    %218 = arith.divf %216, %217 : vector<16x32xf32>
    %219 = vector.extract_strided_slice %208 {offsets = [0, 32], sizes = [16, 32], strides = [1, 1]} : vector<16x96xf32> to vector<16x32xf32>
    %220 = vector.extract_strided_slice %210 {offsets = [0, 32], sizes = [16, 32], strides = [1, 1]} : vector<16x96xf32> to vector<16x32xf32>
    %221 = arith.addf %219, %220 : vector<16x32xf32>
    %222 = arith.negf %221 : vector<16x32xf32>
    %223 = math.exp %222 : vector<16x32xf32>
    %cst_74 = arith.constant 1.000000e+00 : f32
    %224 = vector.broadcast %cst_74 : f32 to vector<16x32xf32>
    %225 = arith.addf %224, %223 : vector<16x32xf32>
    %226 = arith.divf %224, %225 : vector<16x32xf32>
    %227 = vector.extract_strided_slice %208 {offsets = [0, 64], sizes = [16, 32], strides = [1, 1]} : vector<16x96xf32> to vector<16x32xf32>
    %228 = vector.extract_strided_slice %210 {offsets = [0, 64], sizes = [16, 32], strides = [1, 1]} : vector<16x96xf32> to vector<16x32xf32>
    %229 = arith.mulf %218, %228 : vector<16x32xf32>
    %230 = arith.addf %227, %229 : vector<16x32xf32>
    %231 = math.tanh %230 : vector<16x32xf32>
    %cst_75 = arith.constant 1.000000e+00 : f32
    %232 = vector.broadcast %cst_75 : f32 to vector<16x32xf32>
    %233 = arith.subf %232, %226 : vector<16x32xf32>
    %234 = arith.mulf %233, %231 : vector<16x32xf32>
    %235 = arith.mulf %226, %189 : vector<16x32xf32>
    %236 = arith.addf %234, %235 : vector<16x32xf32>
    %c4_i32 = arith.constant 4 : i32
    %cst_76 = arith.constant dense<0.000000e+00> : vector<16x128xf32>
    %237 = tpu.matmul %236, %8, %cst_76 {dimension_numbers = #tpu.dot_dimension_numbers<[1], [0], [0], [1], [0, 0, 1, 1], [], []>} : vector<16x32xf32>, vector<32x128xf32>, vector<16x128xf32> -> vector<16x128xf32>
    %238 = arith.truncf %237 : vector<16x128xf32> to vector<16x128xbf16>
    %cst_77 = arith.constant dense<0.000000e+00> : vector<64x128xf32>
    %239 = tpu.matmul %2, %238, %cst_77 {dimension_numbers = #tpu.dot_dimension_numbers<[1], [0], [0], [1], [0, 0, 1, 1], [], []>} : vector<64x16xbf16>, vector<16x128xbf16>, vector<64x128xf32> -> vector<64x128xf32>
    %240 = vector.extract_strided_slice %239 {offsets = [0, 0], sizes = [32, 64], strides = [1, 1]} : vector<64x128xf32> to vector<32x64xf32>
    %241 = vector.extract_strided_slice %239 {offsets = [32, 64], sizes = [32, 64], strides = [1, 1]} : vector<64x128xf32> to vector<32x64xf32>
    %242 = arith.addf %240, %241 : vector<32x64xf32>
    %243 = arith.addf %242, %35 : vector<32x64xf32>
    %cst_78 = arith.constant 0.000000e+00 : f32
    %244 = vector.broadcast %cst_78 : f32 to vector<32x64xf32>
    %245 = arith.maximumf %243, %244 : vector<32x64xf32>
    %cst_79 = arith.constant dense<0.000000e+00> : vector<32x64xf32>
    %246 = tpu.matmul %245, %10, %cst_79 {dimension_numbers = #tpu.dot_dimension_numbers<[1], [0], [0], [1], [0, 0, 1, 1], [], []>} : vector<32x64xf32>, vector<64x64xf32>, vector<32x64xf32> -> vector<32x64xf32>
    %247 = arith.addf %246, %23 : vector<32x64xf32>
    %cst_80 = arith.constant 0.000000e+00 : f32
    %248 = vector.broadcast %cst_80 : f32 to vector<32x64xf32>
    %249 = arith.maximumf %247, %248 : vector<32x64xf32>
    %cst_81 = arith.constant dense<0.000000e+00> : vector<32x32xf32>
    %250 = tpu.matmul %249, %11, %cst_81 {dimension_numbers = #tpu.dot_dimension_numbers<[1], [0], [0], [1], [0, 0, 1, 1], [], []>} : vector<32x64xf32>, vector<64x32xf32>, vector<32x32xf32> -> vector<32x32xf32>
    %251 = arith.addf %250, %26 : vector<32x32xf32>
    %252 = arith.truncf %251 : vector<32x32xf32> to vector<32x32xbf16>
    %cst_82 = arith.constant dense<0.000000e+00> : vector<16x32xf32>
    %253 = tpu.matmul %5, %252, %cst_82 {dimension_numbers = #tpu.dot_dimension_numbers<[1], [0], [0], [1], [0, 0, 1, 1], [], []>} : vector<16x32xbf16>, vector<32x32xbf16>, vector<16x32xf32> -> vector<16x32xf32>
    %cst_83 = arith.constant dense<0.000000e+00> : vector<16x96xf32>
    %254 = tpu.matmul %253, %12, %cst_83 {dimension_numbers = #tpu.dot_dimension_numbers<[1], [0], [0], [1], [0, 0, 1, 1], [], []>} : vector<16x32xf32>, vector<32x96xf32>, vector<16x96xf32> -> vector<16x96xf32>
    %255 = arith.addf %254, %29 : vector<16x96xf32>
    %cst_84 = arith.constant dense<0.000000e+00> : vector<16x96xf32>
    %256 = tpu.matmul %236, %13, %cst_84 {dimension_numbers = #tpu.dot_dimension_numbers<[1], [0], [0], [1], [0, 0, 1, 1], [], []>} : vector<16x32xf32>, vector<32x96xf32>, vector<16x96xf32> -> vector<16x96xf32>
    %257 = arith.addf %256, %32 : vector<16x96xf32>
    %258 = vector.extract_strided_slice %255 {offsets = [0, 0], sizes = [16, 32], strides = [1, 1]} : vector<16x96xf32> to vector<16x32xf32>
    %259 = vector.extract_strided_slice %257 {offsets = [0, 0], sizes = [16, 32], strides = [1, 1]} : vector<16x96xf32> to vector<16x32xf32>
    %260 = arith.addf %258, %259 : vector<16x32xf32>
    %261 = arith.negf %260 : vector<16x32xf32>
    %262 = math.exp %261 : vector<16x32xf32>
    %cst_85 = arith.constant 1.000000e+00 : f32
    %263 = vector.broadcast %cst_85 : f32 to vector<16x32xf32>
    %264 = arith.addf %263, %262 : vector<16x32xf32>
    %265 = arith.divf %263, %264 : vector<16x32xf32>
    %266 = vector.extract_strided_slice %255 {offsets = [0, 32], sizes = [16, 32], strides = [1, 1]} : vector<16x96xf32> to vector<16x32xf32>
    %267 = vector.extract_strided_slice %257 {offsets = [0, 32], sizes = [16, 32], strides = [1, 1]} : vector<16x96xf32> to vector<16x32xf32>
    %268 = arith.addf %266, %267 : vector<16x32xf32>
    %269 = arith.negf %268 : vector<16x32xf32>
    %270 = math.exp %269 : vector<16x32xf32>
    %cst_86 = arith.constant 1.000000e+00 : f32
    %271 = vector.broadcast %cst_86 : f32 to vector<16x32xf32>
    %272 = arith.addf %271, %270 : vector<16x32xf32>
    %273 = arith.divf %271, %272 : vector<16x32xf32>
    %274 = vector.extract_strided_slice %255 {offsets = [0, 64], sizes = [16, 32], strides = [1, 1]} : vector<16x96xf32> to vector<16x32xf32>
    %275 = vector.extract_strided_slice %257 {offsets = [0, 64], sizes = [16, 32], strides = [1, 1]} : vector<16x96xf32> to vector<16x32xf32>
    %276 = arith.mulf %265, %275 : vector<16x32xf32>
    %277 = arith.addf %274, %276 : vector<16x32xf32>
    %278 = math.tanh %277 : vector<16x32xf32>
    %cst_87 = arith.constant 1.000000e+00 : f32
    %279 = vector.broadcast %cst_87 : f32 to vector<16x32xf32>
    %280 = arith.subf %279, %273 : vector<16x32xf32>
    %281 = arith.mulf %280, %278 : vector<16x32xf32>
    %282 = arith.mulf %273, %236 : vector<16x32xf32>
    %283 = arith.addf %281, %282 : vector<16x32xf32>
    %c5_i32 = arith.constant 5 : i32
    %cst_88 = arith.constant dense<0.000000e+00> : vector<16x128xf32>
    %284 = tpu.matmul %283, %8, %cst_88 {dimension_numbers = #tpu.dot_dimension_numbers<[1], [0], [0], [1], [0, 0, 1, 1], [], []>} : vector<16x32xf32>, vector<32x128xf32>, vector<16x128xf32> -> vector<16x128xf32>
    %285 = arith.truncf %284 : vector<16x128xf32> to vector<16x128xbf16>
    %cst_89 = arith.constant dense<0.000000e+00> : vector<64x128xf32>
    %286 = tpu.matmul %2, %285, %cst_89 {dimension_numbers = #tpu.dot_dimension_numbers<[1], [0], [0], [1], [0, 0, 1, 1], [], []>} : vector<64x16xbf16>, vector<16x128xbf16>, vector<64x128xf32> -> vector<64x128xf32>
    %287 = vector.extract_strided_slice %286 {offsets = [0, 0], sizes = [32, 64], strides = [1, 1]} : vector<64x128xf32> to vector<32x64xf32>
    %288 = vector.extract_strided_slice %286 {offsets = [32, 64], sizes = [32, 64], strides = [1, 1]} : vector<64x128xf32> to vector<32x64xf32>
    %289 = arith.addf %287, %288 : vector<32x64xf32>
    %290 = arith.addf %289, %35 : vector<32x64xf32>
    %cst_90 = arith.constant 0.000000e+00 : f32
    %291 = vector.broadcast %cst_90 : f32 to vector<32x64xf32>
    %292 = arith.maximumf %290, %291 : vector<32x64xf32>
    %cst_91 = arith.constant dense<0.000000e+00> : vector<32x64xf32>
    %293 = tpu.matmul %292, %10, %cst_91 {dimension_numbers = #tpu.dot_dimension_numbers<[1], [0], [0], [1], [0, 0, 1, 1], [], []>} : vector<32x64xf32>, vector<64x64xf32>, vector<32x64xf32> -> vector<32x64xf32>
    %294 = arith.addf %293, %23 : vector<32x64xf32>
    %cst_92 = arith.constant 0.000000e+00 : f32
    %295 = vector.broadcast %cst_92 : f32 to vector<32x64xf32>
    %296 = arith.maximumf %294, %295 : vector<32x64xf32>
    %cst_93 = arith.constant dense<0.000000e+00> : vector<32x32xf32>
    %297 = tpu.matmul %296, %11, %cst_93 {dimension_numbers = #tpu.dot_dimension_numbers<[1], [0], [0], [1], [0, 0, 1, 1], [], []>} : vector<32x64xf32>, vector<64x32xf32>, vector<32x32xf32> -> vector<32x32xf32>
    %298 = arith.addf %297, %26 : vector<32x32xf32>
    %299 = arith.truncf %298 : vector<32x32xf32> to vector<32x32xbf16>
    %cst_94 = arith.constant dense<0.000000e+00> : vector<16x32xf32>
    %300 = tpu.matmul %5, %299, %cst_94 {dimension_numbers = #tpu.dot_dimension_numbers<[1], [0], [0], [1], [0, 0, 1, 1], [], []>} : vector<16x32xbf16>, vector<32x32xbf16>, vector<16x32xf32> -> vector<16x32xf32>
    %cst_95 = arith.constant dense<0.000000e+00> : vector<16x96xf32>
    %301 = tpu.matmul %300, %12, %cst_95 {dimension_numbers = #tpu.dot_dimension_numbers<[1], [0], [0], [1], [0, 0, 1, 1], [], []>} : vector<16x32xf32>, vector<32x96xf32>, vector<16x96xf32> -> vector<16x96xf32>
    %302 = arith.addf %301, %29 : vector<16x96xf32>
    %cst_96 = arith.constant dense<0.000000e+00> : vector<16x96xf32>
    %303 = tpu.matmul %283, %13, %cst_96 {dimension_numbers = #tpu.dot_dimension_numbers<[1], [0], [0], [1], [0, 0, 1, 1], [], []>} : vector<16x32xf32>, vector<32x96xf32>, vector<16x96xf32> -> vector<16x96xf32>
    %304 = arith.addf %303, %32 : vector<16x96xf32>
    %305 = vector.extract_strided_slice %302 {offsets = [0, 0], sizes = [16, 32], strides = [1, 1]} : vector<16x96xf32> to vector<16x32xf32>
    %306 = vector.extract_strided_slice %304 {offsets = [0, 0], sizes = [16, 32], strides = [1, 1]} : vector<16x96xf32> to vector<16x32xf32>
    %307 = arith.addf %305, %306 : vector<16x32xf32>
    %308 = arith.negf %307 : vector<16x32xf32>
    %309 = math.exp %308 : vector<16x32xf32>
    %cst_97 = arith.constant 1.000000e+00 : f32
    %310 = vector.broadcast %cst_97 : f32 to vector<16x32xf32>
    %311 = arith.addf %310, %309 : vector<16x32xf32>
    %312 = arith.divf %310, %311 : vector<16x32xf32>
    %313 = vector.extract_strided_slice %302 {offsets = [0, 32], sizes = [16, 32], strides = [1, 1]} : vector<16x96xf32> to vector<16x32xf32>
    %314 = vector.extract_strided_slice %304 {offsets = [0, 32], sizes = [16, 32], strides = [1, 1]} : vector<16x96xf32> to vector<16x32xf32>
    %315 = arith.addf %313, %314 : vector<16x32xf32>
    %316 = arith.negf %315 : vector<16x32xf32>
    %317 = math.exp %316 : vector<16x32xf32>
    %cst_98 = arith.constant 1.000000e+00 : f32
    %318 = vector.broadcast %cst_98 : f32 to vector<16x32xf32>
    %319 = arith.addf %318, %317 : vector<16x32xf32>
    %320 = arith.divf %318, %319 : vector<16x32xf32>
    %321 = vector.extract_strided_slice %302 {offsets = [0, 64], sizes = [16, 32], strides = [1, 1]} : vector<16x96xf32> to vector<16x32xf32>
    %322 = vector.extract_strided_slice %304 {offsets = [0, 64], sizes = [16, 32], strides = [1, 1]} : vector<16x96xf32> to vector<16x32xf32>
    %323 = arith.mulf %312, %322 : vector<16x32xf32>
    %324 = arith.addf %321, %323 : vector<16x32xf32>
    %325 = math.tanh %324 : vector<16x32xf32>
    %cst_99 = arith.constant 1.000000e+00 : f32
    %326 = vector.broadcast %cst_99 : f32 to vector<16x32xf32>
    %327 = arith.subf %326, %320 : vector<16x32xf32>
    %328 = arith.mulf %327, %325 : vector<16x32xf32>
    %329 = arith.mulf %320, %283 : vector<16x32xf32>
    %330 = arith.addf %328, %329 : vector<16x32xf32>
    %c6_i32 = arith.constant 6 : i32
    %cst_100 = arith.constant dense<0.000000e+00> : vector<16x128xf32>
    %331 = tpu.matmul %330, %8, %cst_100 {dimension_numbers = #tpu.dot_dimension_numbers<[1], [0], [0], [1], [0, 0, 1, 1], [], []>} : vector<16x32xf32>, vector<32x128xf32>, vector<16x128xf32> -> vector<16x128xf32>
    %332 = arith.truncf %331 : vector<16x128xf32> to vector<16x128xbf16>
    %cst_101 = arith.constant dense<0.000000e+00> : vector<64x128xf32>
    %333 = tpu.matmul %2, %332, %cst_101 {dimension_numbers = #tpu.dot_dimension_numbers<[1], [0], [0], [1], [0, 0, 1, 1], [], []>} : vector<64x16xbf16>, vector<16x128xbf16>, vector<64x128xf32> -> vector<64x128xf32>
    %334 = vector.extract_strided_slice %333 {offsets = [0, 0], sizes = [32, 64], strides = [1, 1]} : vector<64x128xf32> to vector<32x64xf32>
    %335 = vector.extract_strided_slice %333 {offsets = [32, 64], sizes = [32, 64], strides = [1, 1]} : vector<64x128xf32> to vector<32x64xf32>
    %336 = arith.addf %334, %335 : vector<32x64xf32>
    %337 = arith.addf %336, %35 : vector<32x64xf32>
    %cst_102 = arith.constant 0.000000e+00 : f32
    %338 = vector.broadcast %cst_102 : f32 to vector<32x64xf32>
    %339 = arith.maximumf %337, %338 : vector<32x64xf32>
    %cst_103 = arith.constant dense<0.000000e+00> : vector<32x64xf32>
    %340 = tpu.matmul %339, %10, %cst_103 {dimension_numbers = #tpu.dot_dimension_numbers<[1], [0], [0], [1], [0, 0, 1, 1], [], []>} : vector<32x64xf32>, vector<64x64xf32>, vector<32x64xf32> -> vector<32x64xf32>
    %341 = arith.addf %340, %23 : vector<32x64xf32>
    %cst_104 = arith.constant 0.000000e+00 : f32
    %342 = vector.broadcast %cst_104 : f32 to vector<32x64xf32>
    %343 = arith.maximumf %341, %342 : vector<32x64xf32>
    %cst_105 = arith.constant dense<0.000000e+00> : vector<32x32xf32>
    %344 = tpu.matmul %343, %11, %cst_105 {dimension_numbers = #tpu.dot_dimension_numbers<[1], [0], [0], [1], [0, 0, 1, 1], [], []>} : vector<32x64xf32>, vector<64x32xf32>, vector<32x32xf32> -> vector<32x32xf32>
    %345 = arith.addf %344, %26 : vector<32x32xf32>
    %346 = arith.truncf %345 : vector<32x32xf32> to vector<32x32xbf16>
    %cst_106 = arith.constant dense<0.000000e+00> : vector<16x32xf32>
    %347 = tpu.matmul %5, %346, %cst_106 {dimension_numbers = #tpu.dot_dimension_numbers<[1], [0], [0], [1], [0, 0, 1, 1], [], []>} : vector<16x32xbf16>, vector<32x32xbf16>, vector<16x32xf32> -> vector<16x32xf32>
    %cst_107 = arith.constant dense<0.000000e+00> : vector<16x96xf32>
    %348 = tpu.matmul %347, %12, %cst_107 {dimension_numbers = #tpu.dot_dimension_numbers<[1], [0], [0], [1], [0, 0, 1, 1], [], []>} : vector<16x32xf32>, vector<32x96xf32>, vector<16x96xf32> -> vector<16x96xf32>
    %349 = arith.addf %348, %29 : vector<16x96xf32>
    %cst_108 = arith.constant dense<0.000000e+00> : vector<16x96xf32>
    %350 = tpu.matmul %330, %13, %cst_108 {dimension_numbers = #tpu.dot_dimension_numbers<[1], [0], [0], [1], [0, 0, 1, 1], [], []>} : vector<16x32xf32>, vector<32x96xf32>, vector<16x96xf32> -> vector<16x96xf32>
    %351 = arith.addf %350, %32 : vector<16x96xf32>
    %352 = vector.extract_strided_slice %349 {offsets = [0, 0], sizes = [16, 32], strides = [1, 1]} : vector<16x96xf32> to vector<16x32xf32>
    %353 = vector.extract_strided_slice %351 {offsets = [0, 0], sizes = [16, 32], strides = [1, 1]} : vector<16x96xf32> to vector<16x32xf32>
    %354 = arith.addf %352, %353 : vector<16x32xf32>
    %355 = arith.negf %354 : vector<16x32xf32>
    %356 = math.exp %355 : vector<16x32xf32>
    %cst_109 = arith.constant 1.000000e+00 : f32
    %357 = vector.broadcast %cst_109 : f32 to vector<16x32xf32>
    %358 = arith.addf %357, %356 : vector<16x32xf32>
    %359 = arith.divf %357, %358 : vector<16x32xf32>
    %360 = vector.extract_strided_slice %349 {offsets = [0, 32], sizes = [16, 32], strides = [1, 1]} : vector<16x96xf32> to vector<16x32xf32>
    %361 = vector.extract_strided_slice %351 {offsets = [0, 32], sizes = [16, 32], strides = [1, 1]} : vector<16x96xf32> to vector<16x32xf32>
    %362 = arith.addf %360, %361 : vector<16x32xf32>
    %363 = arith.negf %362 : vector<16x32xf32>
    %364 = math.exp %363 : vector<16x32xf32>
    %cst_110 = arith.constant 1.000000e+00 : f32
    %365 = vector.broadcast %cst_110 : f32 to vector<16x32xf32>
    %366 = arith.addf %365, %364 : vector<16x32xf32>
    %367 = arith.divf %365, %366 : vector<16x32xf32>
    %368 = vector.extract_strided_slice %349 {offsets = [0, 64], sizes = [16, 32], strides = [1, 1]} : vector<16x96xf32> to vector<16x32xf32>
    %369 = vector.extract_strided_slice %351 {offsets = [0, 64], sizes = [16, 32], strides = [1, 1]} : vector<16x96xf32> to vector<16x32xf32>
    %370 = arith.mulf %359, %369 : vector<16x32xf32>
    %371 = arith.addf %368, %370 : vector<16x32xf32>
    %372 = math.tanh %371 : vector<16x32xf32>
    %cst_111 = arith.constant 1.000000e+00 : f32
    %373 = vector.broadcast %cst_111 : f32 to vector<16x32xf32>
    %374 = arith.subf %373, %367 : vector<16x32xf32>
    %375 = arith.mulf %374, %372 : vector<16x32xf32>
    %376 = arith.mulf %367, %330 : vector<16x32xf32>
    %377 = arith.addf %375, %376 : vector<16x32xf32>
    %c7_i32 = arith.constant 7 : i32
    %cst_112 = arith.constant dense<0.000000e+00> : vector<16x128xf32>
    %378 = tpu.matmul %377, %8, %cst_112 {dimension_numbers = #tpu.dot_dimension_numbers<[1], [0], [0], [1], [0, 0, 1, 1], [], []>} : vector<16x32xf32>, vector<32x128xf32>, vector<16x128xf32> -> vector<16x128xf32>
    %379 = arith.truncf %378 : vector<16x128xf32> to vector<16x128xbf16>
    %cst_113 = arith.constant dense<0.000000e+00> : vector<64x128xf32>
    %380 = tpu.matmul %2, %379, %cst_113 {dimension_numbers = #tpu.dot_dimension_numbers<[1], [0], [0], [1], [0, 0, 1, 1], [], []>} : vector<64x16xbf16>, vector<16x128xbf16>, vector<64x128xf32> -> vector<64x128xf32>
    %381 = vector.extract_strided_slice %380 {offsets = [0, 0], sizes = [32, 64], strides = [1, 1]} : vector<64x128xf32> to vector<32x64xf32>
    %382 = vector.extract_strided_slice %380 {offsets = [32, 64], sizes = [32, 64], strides = [1, 1]} : vector<64x128xf32> to vector<32x64xf32>
    %383 = arith.addf %381, %382 : vector<32x64xf32>
    %384 = arith.addf %383, %35 : vector<32x64xf32>
    %cst_114 = arith.constant 0.000000e+00 : f32
    %385 = vector.broadcast %cst_114 : f32 to vector<32x64xf32>
    %386 = arith.maximumf %384, %385 : vector<32x64xf32>
    %cst_115 = arith.constant dense<0.000000e+00> : vector<32x64xf32>
    %387 = tpu.matmul %386, %10, %cst_115 {dimension_numbers = #tpu.dot_dimension_numbers<[1], [0], [0], [1], [0, 0, 1, 1], [], []>} : vector<32x64xf32>, vector<64x64xf32>, vector<32x64xf32> -> vector<32x64xf32>
    %388 = arith.addf %387, %23 : vector<32x64xf32>
    %cst_116 = arith.constant 0.000000e+00 : f32
    %389 = vector.broadcast %cst_116 : f32 to vector<32x64xf32>
    %390 = arith.maximumf %388, %389 : vector<32x64xf32>
    %cst_117 = arith.constant dense<0.000000e+00> : vector<32x32xf32>
    %391 = tpu.matmul %390, %11, %cst_117 {dimension_numbers = #tpu.dot_dimension_numbers<[1], [0], [0], [1], [0, 0, 1, 1], [], []>} : vector<32x64xf32>, vector<64x32xf32>, vector<32x32xf32> -> vector<32x32xf32>
    %392 = arith.addf %391, %26 : vector<32x32xf32>
    %393 = arith.truncf %392 : vector<32x32xf32> to vector<32x32xbf16>
    %cst_118 = arith.constant dense<0.000000e+00> : vector<16x32xf32>
    %394 = tpu.matmul %5, %393, %cst_118 {dimension_numbers = #tpu.dot_dimension_numbers<[1], [0], [0], [1], [0, 0, 1, 1], [], []>} : vector<16x32xbf16>, vector<32x32xbf16>, vector<16x32xf32> -> vector<16x32xf32>
    %cst_119 = arith.constant dense<0.000000e+00> : vector<16x96xf32>
    %395 = tpu.matmul %394, %12, %cst_119 {dimension_numbers = #tpu.dot_dimension_numbers<[1], [0], [0], [1], [0, 0, 1, 1], [], []>} : vector<16x32xf32>, vector<32x96xf32>, vector<16x96xf32> -> vector<16x96xf32>
    %396 = arith.addf %395, %29 : vector<16x96xf32>
    %cst_120 = arith.constant dense<0.000000e+00> : vector<16x96xf32>
    %397 = tpu.matmul %377, %13, %cst_120 {dimension_numbers = #tpu.dot_dimension_numbers<[1], [0], [0], [1], [0, 0, 1, 1], [], []>} : vector<16x32xf32>, vector<32x96xf32>, vector<16x96xf32> -> vector<16x96xf32>
    %398 = arith.addf %397, %32 : vector<16x96xf32>
    %399 = vector.extract_strided_slice %396 {offsets = [0, 0], sizes = [16, 32], strides = [1, 1]} : vector<16x96xf32> to vector<16x32xf32>
    %400 = vector.extract_strided_slice %398 {offsets = [0, 0], sizes = [16, 32], strides = [1, 1]} : vector<16x96xf32> to vector<16x32xf32>
    %401 = arith.addf %399, %400 : vector<16x32xf32>
    %402 = arith.negf %401 : vector<16x32xf32>
    %403 = math.exp %402 : vector<16x32xf32>
    %cst_121 = arith.constant 1.000000e+00 : f32
    %404 = vector.broadcast %cst_121 : f32 to vector<16x32xf32>
    %405 = arith.addf %404, %403 : vector<16x32xf32>
    %406 = arith.divf %404, %405 : vector<16x32xf32>
    %407 = vector.extract_strided_slice %396 {offsets = [0, 32], sizes = [16, 32], strides = [1, 1]} : vector<16x96xf32> to vector<16x32xf32>
    %408 = vector.extract_strided_slice %398 {offsets = [0, 32], sizes = [16, 32], strides = [1, 1]} : vector<16x96xf32> to vector<16x32xf32>
    %409 = arith.addf %407, %408 : vector<16x32xf32>
    %410 = arith.negf %409 : vector<16x32xf32>
    %411 = math.exp %410 : vector<16x32xf32>
    %cst_122 = arith.constant 1.000000e+00 : f32
    %412 = vector.broadcast %cst_122 : f32 to vector<16x32xf32>
    %413 = arith.addf %412, %411 : vector<16x32xf32>
    %414 = arith.divf %412, %413 : vector<16x32xf32>
    %415 = vector.extract_strided_slice %396 {offsets = [0, 64], sizes = [16, 32], strides = [1, 1]} : vector<16x96xf32> to vector<16x32xf32>
    %416 = vector.extract_strided_slice %398 {offsets = [0, 64], sizes = [16, 32], strides = [1, 1]} : vector<16x96xf32> to vector<16x32xf32>
    %417 = arith.mulf %406, %416 : vector<16x32xf32>
    %418 = arith.addf %415, %417 : vector<16x32xf32>
    %419 = math.tanh %418 : vector<16x32xf32>
    %cst_123 = arith.constant 1.000000e+00 : f32
    %420 = vector.broadcast %cst_123 : f32 to vector<16x32xf32>
    %421 = arith.subf %420, %414 : vector<16x32xf32>
    %422 = arith.mulf %421, %419 : vector<16x32xf32>
    %423 = arith.mulf %414, %377 : vector<16x32xf32>
    %424 = arith.addf %422, %423 : vector<16x32xf32>
    %c8_i32_124 = arith.constant 8 : i32
    %cst_125 = arith.constant dense<0.000000e+00> : vector<16x128xf32>
    %425 = tpu.matmul %424, %8, %cst_125 {dimension_numbers = #tpu.dot_dimension_numbers<[1], [0], [0], [1], [0, 0, 1, 1], [], []>} : vector<16x32xf32>, vector<32x128xf32>, vector<16x128xf32> -> vector<16x128xf32>
    %426 = arith.truncf %425 : vector<16x128xf32> to vector<16x128xbf16>
    %cst_126 = arith.constant dense<0.000000e+00> : vector<64x128xf32>
    %427 = tpu.matmul %2, %426, %cst_126 {dimension_numbers = #tpu.dot_dimension_numbers<[1], [0], [0], [1], [0, 0, 1, 1], [], []>} : vector<64x16xbf16>, vector<16x128xbf16>, vector<64x128xf32> -> vector<64x128xf32>
    %428 = vector.extract_strided_slice %427 {offsets = [0, 0], sizes = [32, 64], strides = [1, 1]} : vector<64x128xf32> to vector<32x64xf32>
    %429 = vector.extract_strided_slice %427 {offsets = [32, 64], sizes = [32, 64], strides = [1, 1]} : vector<64x128xf32> to vector<32x64xf32>
    %430 = arith.addf %428, %429 : vector<32x64xf32>
    %431 = arith.addf %430, %35 : vector<32x64xf32>
    %cst_127 = arith.constant 0.000000e+00 : f32
    %432 = vector.broadcast %cst_127 : f32 to vector<32x64xf32>
    %433 = arith.maximumf %431, %432 : vector<32x64xf32>
    %cst_128 = arith.constant dense<0.000000e+00> : vector<32x64xf32>
    %434 = tpu.matmul %433, %10, %cst_128 {dimension_numbers = #tpu.dot_dimension_numbers<[1], [0], [0], [1], [0, 0, 1, 1], [], []>} : vector<32x64xf32>, vector<64x64xf32>, vector<32x64xf32> -> vector<32x64xf32>
    %435 = arith.addf %434, %23 : vector<32x64xf32>
    %cst_129 = arith.constant 0.000000e+00 : f32
    %436 = vector.broadcast %cst_129 : f32 to vector<32x64xf32>
    %437 = arith.maximumf %435, %436 : vector<32x64xf32>
    %cst_130 = arith.constant dense<0.000000e+00> : vector<32x32xf32>
    %438 = tpu.matmul %437, %11, %cst_130 {dimension_numbers = #tpu.dot_dimension_numbers<[1], [0], [0], [1], [0, 0, 1, 1], [], []>} : vector<32x64xf32>, vector<64x32xf32>, vector<32x32xf32> -> vector<32x32xf32>
    %439 = arith.addf %438, %26 : vector<32x32xf32>
    %440 = arith.truncf %439 : vector<32x32xf32> to vector<32x32xbf16>
    %cst_131 = arith.constant dense<0.000000e+00> : vector<16x32xf32>
    %441 = tpu.matmul %5, %440, %cst_131 {dimension_numbers = #tpu.dot_dimension_numbers<[1], [0], [0], [1], [0, 0, 1, 1], [], []>} : vector<16x32xbf16>, vector<32x32xbf16>, vector<16x32xf32> -> vector<16x32xf32>
    %cst_132 = arith.constant dense<0.000000e+00> : vector<16x96xf32>
    %442 = tpu.matmul %441, %12, %cst_132 {dimension_numbers = #tpu.dot_dimension_numbers<[1], [0], [0], [1], [0, 0, 1, 1], [], []>} : vector<16x32xf32>, vector<32x96xf32>, vector<16x96xf32> -> vector<16x96xf32>
    %443 = arith.addf %442, %29 : vector<16x96xf32>
    %cst_133 = arith.constant dense<0.000000e+00> : vector<16x96xf32>
    %444 = tpu.matmul %424, %13, %cst_133 {dimension_numbers = #tpu.dot_dimension_numbers<[1], [0], [0], [1], [0, 0, 1, 1], [], []>} : vector<16x32xf32>, vector<32x96xf32>, vector<16x96xf32> -> vector<16x96xf32>
    %445 = arith.addf %444, %32 : vector<16x96xf32>
    %446 = vector.extract_strided_slice %443 {offsets = [0, 0], sizes = [16, 32], strides = [1, 1]} : vector<16x96xf32> to vector<16x32xf32>
    %447 = vector.extract_strided_slice %445 {offsets = [0, 0], sizes = [16, 32], strides = [1, 1]} : vector<16x96xf32> to vector<16x32xf32>
    %448 = arith.addf %446, %447 : vector<16x32xf32>
    %449 = arith.negf %448 : vector<16x32xf32>
    %450 = math.exp %449 : vector<16x32xf32>
    %cst_134 = arith.constant 1.000000e+00 : f32
    %451 = vector.broadcast %cst_134 : f32 to vector<16x32xf32>
    %452 = arith.addf %451, %450 : vector<16x32xf32>
    %453 = arith.divf %451, %452 : vector<16x32xf32>
    %454 = vector.extract_strided_slice %443 {offsets = [0, 32], sizes = [16, 32], strides = [1, 1]} : vector<16x96xf32> to vector<16x32xf32>
    %455 = vector.extract_strided_slice %445 {offsets = [0, 32], sizes = [16, 32], strides = [1, 1]} : vector<16x96xf32> to vector<16x32xf32>
    %456 = arith.addf %454, %455 : vector<16x32xf32>
    %457 = arith.negf %456 : vector<16x32xf32>
    %458 = math.exp %457 : vector<16x32xf32>
    %cst_135 = arith.constant 1.000000e+00 : f32
    %459 = vector.broadcast %cst_135 : f32 to vector<16x32xf32>
    %460 = arith.addf %459, %458 : vector<16x32xf32>
    %461 = arith.divf %459, %460 : vector<16x32xf32>
    %462 = vector.extract_strided_slice %443 {offsets = [0, 64], sizes = [16, 32], strides = [1, 1]} : vector<16x96xf32> to vector<16x32xf32>
    %463 = vector.extract_strided_slice %445 {offsets = [0, 64], sizes = [16, 32], strides = [1, 1]} : vector<16x96xf32> to vector<16x32xf32>
    %464 = arith.mulf %453, %463 : vector<16x32xf32>
    %465 = arith.addf %462, %464 : vector<16x32xf32>
    %466 = math.tanh %465 : vector<16x32xf32>
    %cst_136 = arith.constant 1.000000e+00 : f32
    %467 = vector.broadcast %cst_136 : f32 to vector<16x32xf32>
    %468 = arith.subf %467, %461 : vector<16x32xf32>
    %469 = arith.mulf %468, %466 : vector<16x32xf32>
    %470 = arith.mulf %461, %424 : vector<16x32xf32>
    %471 = arith.addf %469, %470 : vector<16x32xf32>
    %c9_i32 = arith.constant 9 : i32
    %cst_137 = arith.constant dense<0.000000e+00> : vector<16x128xf32>
    %472 = tpu.matmul %471, %8, %cst_137 {dimension_numbers = #tpu.dot_dimension_numbers<[1], [0], [0], [1], [0, 0, 1, 1], [], []>} : vector<16x32xf32>, vector<32x128xf32>, vector<16x128xf32> -> vector<16x128xf32>
    %473 = arith.truncf %472 : vector<16x128xf32> to vector<16x128xbf16>
    %cst_138 = arith.constant dense<0.000000e+00> : vector<64x128xf32>
    %474 = tpu.matmul %2, %473, %cst_138 {dimension_numbers = #tpu.dot_dimension_numbers<[1], [0], [0], [1], [0, 0, 1, 1], [], []>} : vector<64x16xbf16>, vector<16x128xbf16>, vector<64x128xf32> -> vector<64x128xf32>
    %475 = vector.extract_strided_slice %474 {offsets = [0, 0], sizes = [32, 64], strides = [1, 1]} : vector<64x128xf32> to vector<32x64xf32>
    %476 = vector.extract_strided_slice %474 {offsets = [32, 64], sizes = [32, 64], strides = [1, 1]} : vector<64x128xf32> to vector<32x64xf32>
    %477 = arith.addf %475, %476 : vector<32x64xf32>
    %478 = arith.addf %477, %35 : vector<32x64xf32>
    %cst_139 = arith.constant 0.000000e+00 : f32
    %479 = vector.broadcast %cst_139 : f32 to vector<32x64xf32>
    %480 = arith.maximumf %478, %479 : vector<32x64xf32>
    %cst_140 = arith.constant dense<0.000000e+00> : vector<32x64xf32>
    %481 = tpu.matmul %480, %10, %cst_140 {dimension_numbers = #tpu.dot_dimension_numbers<[1], [0], [0], [1], [0, 0, 1, 1], [], []>} : vector<32x64xf32>, vector<64x64xf32>, vector<32x64xf32> -> vector<32x64xf32>
    %482 = arith.addf %481, %23 : vector<32x64xf32>
    %cst_141 = arith.constant 0.000000e+00 : f32
    %483 = vector.broadcast %cst_141 : f32 to vector<32x64xf32>
    %484 = arith.maximumf %482, %483 : vector<32x64xf32>
    %cst_142 = arith.constant dense<0.000000e+00> : vector<32x32xf32>
    %485 = tpu.matmul %484, %11, %cst_142 {dimension_numbers = #tpu.dot_dimension_numbers<[1], [0], [0], [1], [0, 0, 1, 1], [], []>} : vector<32x64xf32>, vector<64x32xf32>, vector<32x32xf32> -> vector<32x32xf32>
    %486 = arith.addf %485, %26 : vector<32x32xf32>
    %487 = arith.truncf %486 : vector<32x32xf32> to vector<32x32xbf16>
    %cst_143 = arith.constant dense<0.000000e+00> : vector<16x32xf32>
    %488 = tpu.matmul %5, %487, %cst_143 {dimension_numbers = #tpu.dot_dimension_numbers<[1], [0], [0], [1], [0, 0, 1, 1], [], []>} : vector<16x32xbf16>, vector<32x32xbf16>, vector<16x32xf32> -> vector<16x32xf32>
    %cst_144 = arith.constant dense<0.000000e+00> : vector<16x96xf32>
    %489 = tpu.matmul %488, %12, %cst_144 {dimension_numbers = #tpu.dot_dimension_numbers<[1], [0], [0], [1], [0, 0, 1, 1], [], []>} : vector<16x32xf32>, vector<32x96xf32>, vector<16x96xf32> -> vector<16x96xf32>
    %490 = arith.addf %489, %29 : vector<16x96xf32>
    %cst_145 = arith.constant dense<0.000000e+00> : vector<16x96xf32>
    %491 = tpu.matmul %471, %13, %cst_145 {dimension_numbers = #tpu.dot_dimension_numbers<[1], [0], [0], [1], [0, 0, 1, 1], [], []>} : vector<16x32xf32>, vector<32x96xf32>, vector<16x96xf32> -> vector<16x96xf32>
    %492 = arith.addf %491, %32 : vector<16x96xf32>
    %493 = vector.extract_strided_slice %490 {offsets = [0, 0], sizes = [16, 32], strides = [1, 1]} : vector<16x96xf32> to vector<16x32xf32>
    %494 = vector.extract_strided_slice %492 {offsets = [0, 0], sizes = [16, 32], strides = [1, 1]} : vector<16x96xf32> to vector<16x32xf32>
    %495 = arith.addf %493, %494 : vector<16x32xf32>
    %496 = arith.negf %495 : vector<16x32xf32>
    %497 = math.exp %496 : vector<16x32xf32>
    %cst_146 = arith.constant 1.000000e+00 : f32
    %498 = vector.broadcast %cst_146 : f32 to vector<16x32xf32>
    %499 = arith.addf %498, %497 : vector<16x32xf32>
    %500 = arith.divf %498, %499 : vector<16x32xf32>
    %501 = vector.extract_strided_slice %490 {offsets = [0, 32], sizes = [16, 32], strides = [1, 1]} : vector<16x96xf32> to vector<16x32xf32>
    %502 = vector.extract_strided_slice %492 {offsets = [0, 32], sizes = [16, 32], strides = [1, 1]} : vector<16x96xf32> to vector<16x32xf32>
    %503 = arith.addf %501, %502 : vector<16x32xf32>
    %504 = arith.negf %503 : vector<16x32xf32>
    %505 = math.exp %504 : vector<16x32xf32>
    %cst_147 = arith.constant 1.000000e+00 : f32
    %506 = vector.broadcast %cst_147 : f32 to vector<16x32xf32>
    %507 = arith.addf %506, %505 : vector<16x32xf32>
    %508 = arith.divf %506, %507 : vector<16x32xf32>
    %509 = vector.extract_strided_slice %490 {offsets = [0, 64], sizes = [16, 32], strides = [1, 1]} : vector<16x96xf32> to vector<16x32xf32>
    %510 = vector.extract_strided_slice %492 {offsets = [0, 64], sizes = [16, 32], strides = [1, 1]} : vector<16x96xf32> to vector<16x32xf32>
    %511 = arith.mulf %500, %510 : vector<16x32xf32>
    %512 = arith.addf %509, %511 : vector<16x32xf32>
    %513 = math.tanh %512 : vector<16x32xf32>
    %cst_148 = arith.constant 1.000000e+00 : f32
    %514 = vector.broadcast %cst_148 : f32 to vector<16x32xf32>
    %515 = arith.subf %514, %508 : vector<16x32xf32>
    %516 = arith.mulf %515, %513 : vector<16x32xf32>
    %517 = arith.mulf %508, %471 : vector<16x32xf32>
    %518 = arith.addf %516, %517 : vector<16x32xf32>
    %519 = vector.extract_strided_slice %518 {offsets = [0, 0], sizes = [8, 32], strides = [1, 1]} : vector<16x32xf32> to vector<8x32xf32>
    %cst_149 = arith.constant dense<0.000000e+00> : vector<8x64xf32>
    %520 = tpu.matmul %519, %14, %cst_149 {dimension_numbers = #tpu.dot_dimension_numbers<[1], [0], [0], [1], [0, 0, 1, 1], [], []>} : vector<8x32xf32>, vector<32x64xf32>, vector<8x64xf32> -> vector<8x64xf32>
    %521 = vector.broadcast %18 : vector<1x64xf32> to vector<8x64xf32>
    %522 = arith.addf %520, %521 : vector<8x64xf32>
    %cst_150 = arith.constant 0.000000e+00 : f32
    %523 = vector.broadcast %cst_150 : f32 to vector<8x64xf32>
    %524 = arith.maximumf %522, %523 : vector<8x64xf32>
    %cst_151 = arith.constant dense<0.000000e+00> : vector<8x64xf32>
    %525 = tpu.matmul %524, %15, %cst_151 {dimension_numbers = #tpu.dot_dimension_numbers<[1], [0], [0], [1], [0, 0, 1, 1], [], []>} : vector<8x64xf32>, vector<64x64xf32>, vector<8x64xf32> -> vector<8x64xf32>
    %526 = vector.broadcast %19 : vector<1x64xf32> to vector<8x64xf32>
    %527 = arith.addf %525, %526 : vector<8x64xf32>
    %cst_152 = arith.constant 0.000000e+00 : f32
    %528 = vector.broadcast %cst_152 : f32 to vector<8x64xf32>
    %529 = arith.maximumf %527, %528 : vector<8x64xf32>
    %cst_153 = arith.constant dense<0.000000e+00> : vector<8x128xf32>
    %530 = tpu.matmul %529, %16, %cst_153 {dimension_numbers = #tpu.dot_dimension_numbers<[1], [0], [0], [1], [0, 0, 1, 1], [], []>} : vector<8x64xf32>, vector<64x128xf32>, vector<8x128xf32> -> vector<8x128xf32>
    %531 = vector.broadcast %20 : vector<1x128xf32> to vector<8x128xf32>
    %532 = arith.addf %530, %531 : vector<8x128xf32>
    %533 = arith.negf %532 : vector<8x128xf32>
    %534 = math.exp %533 : vector<8x128xf32>
    %cst_154 = arith.constant 1.000000e+00 : f32
    %535 = vector.broadcast %cst_154 : f32 to vector<8x128xf32>
    %536 = arith.addf %535, %534 : vector<8x128xf32>
    %537 = arith.divf %535, %536 : vector<8x128xf32>
    %c0_155 = arith.constant 0 : index
    %c0_156 = arith.constant 0 : index
    %c0_157 = arith.constant 0 : index
    %538 = vector.load %arg4[%c0_155, %c0_156, %c0_157] : memref<1x8x128xf32, #tpu.memory_space<vmem>>, vector<1x8x128xf32>
    %539 = vector.shape_cast %538 : vector<1x8x128xf32> to vector<8x128xf32>
    %540 = vector.shape_cast %537 : vector<8x128xf32> to vector<1x8x128xf32>
    tpu.vector_store %arg4[%c0_155, %c0_156, %c0_157], %540 {strides = array<i32>} : memref<1x8x128xf32, #tpu.memory_space<vmem>>, vector<1x8x128xf32>,
    return
  }
  func.func @transform_0(%arg0: i32) -> (i32, i32, i32) {
    %c0_i32 = arith.constant 0 : i32
    %c0_i32_0 = arith.constant 0 : i32
    %c0_i32_1 = arith.constant 0 : i32
    return %arg0, %c0_i32, %c0_i32_0 : i32, i32, i32
  }
  func.func @transform_1(%arg0: i32) -> (i32, i32) {
    %c0_i32 = arith.constant 0 : i32
    %c0_i32_0 = arith.constant 0 : i32
    %c0_i32_1 = arith.constant 0 : i32
    return %c0_i32, %c0_i32_0 : i32, i32
  }
  func.func @transform_2(%arg0: i32) -> (i32, i32) {
    %c0_i32 = arith.constant 0 : i32
    %c0_i32_0 = arith.constant 0 : i32
    %c0_i32_1 = arith.constant 0 : i32
    return %c0_i32, %c0_i32_0 : i32, i32
  }
  func.func @transform_3(%arg0: i32) -> (i32, i32, i32) {
    %c0_i32 = arith.constant 0 : i32
    %c0_i32_0 = arith.constant 0 : i32
    %c0_i32_1 = arith.constant 0 : i32
    return %arg0, %c0_i32, %c0_i32_0 : i32, i32, i32
  }
}

</mosaic_0001>

<bundles_post_ra>
// kernel: tpu_custom_call.1
= control target key start
LH: loop header
LB: loop body
LE: loop exit
PB: predicated region body
PF: predicated region fallthrough
CT: control target
= control target key end

     0   :  { %8 = vsyncpa [#allocation3], 0  ;;  %s10938_s0 = inlined_call_operand.hbm [shape: f32[2,112,128], index: 0, kind: input, shape index: {}]   ;;  %s10939_s1 = inlined_call_operand.hbm [shape: f32[392,128], index: 1, kind: input, shape index: {}]   ;;  %s10940_s2 = inlined_call_operand.hbm [shape: f32[8,128], index: 2, kind: input, shape index: {}]   ;;  %s10941_s3 = inlined_call_operand.hbm [shape: f32[2,8,128], index: 3, kind: output, shape index: {}]  }
   0x1   :  { %10 = vsyncpa [#allocation3 + $0x1], 0 }
   0x2   :  { %11 = vsyncpa [#allocation6], 0 }
   0x3   :  { %12 = vsyncpa [#allocation4], 0 }
   0x4   :  { %14 = vsyncpa [#allocation4 + $0x1], 0  ;;  %s9298_s12 = smov 0   ;;  %s9300_s13 = smov 0  }
   0x5   :  { %s9302_s14 = smov 0   ;;  %s9304_s15 = smov 0  }
   0x6 LB: > { %s9319_s16 = sadd.s32 4294967295, %s9265_s15   ;;  %s7048_s17 = sadd.s32 4294967294, %s9265_s15   ;;  %s9265_s15 = sphi %s9304_s15, %s10973_s15   ;;  %s9261_s14 = sphi %s9302_s14, %s10972_s14   ;;  %s9257_s13 = sphi %s9300_s13, %s10971_s13   ;;  %s9253_s12 = sphi %s9298_s12, %s10970_s12  }
   0x7   : > { %p40_p0 = scmp.ne.s32.totalorder %s9257_s13, %s9253_s12  ;;  %p10942_p1 = scmp.eq.s32.totalorder %s9319_s16, 0 }
   0x8   : > { %p106_p2 = scmp.eq.s32.totalorder %s9319_s16, 1  ;;  %p112_p3 = scmp.eq.s32.totalorder %s7048_s17, 1 }
   0x9   : > { %p9328_p4 = por %p10942_p1, %p40_p0  ;;  %p7049_p5 = scmp.ge.s32.totalorder %s9265_s15, 1 }
   0xa   : > { %p9333_p6 = por %p112_p3, %p40_p0  ;;  %p119_p7 = scmp.lt.s32.totalorder %s9265_s15, 3 }
   0xb   : > { %s10952_s18 = scalar_select %p9328_p4, 1, 0 }
   0xc   : > { %s10953_s19 = scalar_select %p9333_p6, 1, 0 }
   0xd   : > { %p9338_p8 = pnand %p7049_p5, %p119_p7  ;;  %s9267_s21 = smov [#allocation5]  }
   0xe   : > { %s131_s22 = sshll.u32 %s9267_s21, 4  ;;  %s9268_s24 = smov [#allocation7]   ;;  %s132_s22 = int_to_ptr.vmem [resolvable:$true] %s131_s22 }
   0xf   : > { %s10954_s20 = scalar_select %p9338_p8, 1, 0 }
  0x10   : > { %p8836_p9 = pneg %p9338_p8  ;;  %s145_s25 = sshll.u32 %s9268_s24, 4  ;;  %s146_s25 = int_to_ptr.vmem [resolvable:$true] %s145_s25 }
  0x11   : > { %s9128_s26 = scalar_lea.vmem %s132_s22, 6272  ;;  %p9136_p5 = scmp.lt.s32.totalorder %s132_s22, %s132_s22 }
  0x12   : > { %p9347_p11 = pnand %p8836_p9, %p10942_p1  ;;  %p9129_p13 = scmp.ne.s32.totalorder %s132_s22, %s9128_s26 }
  0x13   : > { %p9137_p7 = scmp.lt.s32.totalorder %s9128_s26, %s9128_s26 }
  0x14   : > { %p9119_p12 = pneg %p9347_p11 }
  0x15   : > { %p9138_p10 = por %p9137_p7, %p9136_p5 }
  0x16   : > { %p9131_p0 = pnand %p9129_p13, %p9119_p12 }
  0x18   : > { %p9132_p3 = pneg %p9131_p0 }
  0x1a   : > { %p9139_p9 = pnand %p9138_p10, %p9132_p3 }
  0x1c   : > { %9142 = shalt.err (!%p9139_p9)
}
  0x1d   : > { %s9269_s27 = smov 128   ;;  %s9270_s28 = smov 8  }
  0x1e   : > { %8839 = dma.hbm_to_vmem [thread:$0]  (!%p9347_p11), %s10939_s1, 6272, %s132_s22, [#allocation6], %s9269_s27, %s9269_s27, %s9270_s28  }
  0x1f   : > { %s9154_s4 = scalar_lea.vmem %s146_s25, 128  ;;  %p9162_p10 = scmp.lt.s32.totalorder %s146_s25, %s146_s25 }
  0x20   : > { %p9155_p13 = scmp.ne.s32.totalorder %s146_s25, %s9154_s4  ;;  %p9163_p3 = scmp.lt.s32.totalorder %s9154_s4, %s9154_s4 }
  0x22   : > { %p9157_p0 = pnand %p9155_p13, %p9119_p12  ;;  %p9164_p7 = por %p9163_p3, %p9162_p10 }
  0x24   : > { %p9158_p5 = pneg %p9157_p0 }
  0x26   : > { %p9165_p9 = pnand %p9164_p7, %p9158_p5 }
  0x28   : > { %9168 = shalt.err (!%p9165_p9)
}
  0x29   : > { %8842 = dma.hbm_to_vmem [thread:$0]  (!%p9347_p11), %s10940_s2, 128, %s146_s25, [#allocation6]  }
  0x2a   : > { %s9373_s7 = sadd.s32 1, %s9265_s15   ;;  %s27_s8 = sadd.s32 1, %s9261_s14 }
  0x2b   : > { %s24_s9 = ssub.s32 %s9265_s15, %s9373_s7  ;;  %p34_p12 = scmp.ne.s32.totalorder %s9261_s14, %s9257_s13 }
  0x2c   : > { %p25_p13 = scmp.eq.s32.totalorder %s24_s9, 0  ;;  %p35_p0 = scmp.eq.s32.totalorder %s9265_s15, 0 }
  0x2d   : > { %p9383_p5 = por %p106_p2, %p34_p12  ;;  %p8853_p10 = scmp.lt.s32.totalorder %s9265_s15, 2 }
  0x2e   : > { %s9389_s11 = scalar_select %p25_p13, %s9261_s14, %s27_s8  }
  0x2f   : > { %s10956_s10 = scalar_select %p9383_p5, 1, 0 }
  0x30   : > { %p36_p3 = por %p35_p0, %p34_p12  ;;  %s156_s17 = sand.u32 1, %s9261_s14  }
  0x31   : > { %s8821_s21 = smul.u32 112, %s156_s17  ;;  %s9404_s4 = scalar_lea.sflag [#allocation3], %s156_s17 }
  0x32   : > { %s8822_s22 = smul.u32 1792, %s9265_s15  ;;  %p9393_p11 = pnand %p8853_p10, %p36_p3 }
  0x33   : > { %s160_s29 = scalar_lea.vmem [#allocation2], %s8821_s21  ;;  %s9174_s9 = scalar_lea.hbm %s10938_s0, 3584 }
  0x34   : > { %s9400_s26 = scalar_lea.hbm %s10938_s0, %s8822_s22  ;;  %s167_s30 = sshll.u32 %s160_s29, 4  ;;  %s9402_s30 = int_to_ptr.vmem [resolvable:$true] %s167_s30 }
  0x35   : > { %s9169_s5 = scalar_lea.hbm %s9400_s26, 1792  ;;  %p9171_p7 = pneg %p9393_p11 }
  0x36   : > { %p9170_p2 = scmp.ne.s32.totalorder %s9400_s26, %s9169_s5  ;;  %p9175_p13 = scmp.lt.s32.totalorder %s9400_s26, %s10938_s0 }
  0x37   : > { %p9176_p0 = scmp.lt.s32.totalorder %s9174_s9, %s9169_s5 }
  0x38   : > { %p9172_p9 = pnand %p9171_p7, %p9170_p2 }
  0x39   : > { %p9177_p10 = por %p9176_p0, %p9175_p13 }
  0x3a   : > { %p9173_p12 = pneg %p9172_p9 }
  0x3c   : > { %p9178_p3 = pnand %p9177_p10, %p9173_p12 }
  0x3e   : > { %9181 = shalt.err (!%p9178_p3)
}
  0x3f   : > { %s9182_s17 = scalar_lea.vmem %s9402_s30, 1792  ;;  %s9271_s21 = smov [#allocation2]  }
  0x40   : > { %p9183_p1 = scmp.ne.s32.totalorder %s9402_s30, %s9182_s17  ;;  %s9187_s25 = sshll.u32 %s9271_s21, 4  ;;  %s9188_s25 = int_to_ptr.vmem [resolvable:$false] %s9187_s25 }
  0x41   : > { %s9189_s29 = scalar_lea.vmem %s9188_s25, 3584  ;;  %p9190_p9 = scmp.lt.s32.totalorder %s9402_s30, %s9188_s25 }
  0x42   : > { %p9185_p6 = pnand %p9183_p1, %p9171_p7  ;;  %p9191_p5 = scmp.lt.s32.totalorder %s9189_s29, %s9182_s17 }
  0x44   : > { %p9186_p2 = pneg %p9185_p6  ;;  %p9192_p4 = por %p9191_p5, %p9190_p9 }
  0x46   : > { %p9193_p8 = pnand %p9192_p4, %p9186_p2 }
  0x48   : > { %9196 = shalt.err (!%p9193_p8)
}
  0x49   : > { %8846 = dma.hbm_to_vmem [thread:$0]  (!%p9393_p11), %s9400_s26, 1792, %s9402_s30, %s9404_s4, %s9269_s27, %s9269_s27, %s9270_s28  }
  0x4a   : > { %p10958_p1 = scmp.ne.s32.totalorder %s10954_s20, 0 }
  0x4c   : > { %179 = sbr.rel (%p10958_p1) target bundleno = 18084 (0x46a4), region = 32 }
  0x51   : > { %s9431_s5 = sand.u32 1, %s9257_s13   ;;  %p10959_p4 = scmp.ne.s32.totalorder %s10952_s18, 0 }
  0x52   : > { %s8823_s6 = smul.u32 112, %s9431_s5  ;;  %s182_s8 = scalar_lea.sflag [#allocation3], %s9431_s5 }
  0x54   : > { %s9435_s9 = scalar_lea.vmem [#allocation2], %s8823_s6 }
  0x55   : > { %9240 = dma.done.wait (%p10959_p4), %s182_s8, 1792  }
  0x56   : > { %9242 = vsyncadd (%p10959_p4), %s182_s8, 4294965504  ;;  %p10960_p6 = scmp.eq.s32.totalorder %s9319_s16, 0 }
  0x58   : > { %9244 = dma.done.wait (%p10960_p6), [#allocation6], 6400   ;;  %p10961_p8 = pmov %p10960_p6 }
  0x59   : > { %v10946_v0 = vmov 0.0   ;;  %v418_v1 = vlaneseq  ;;  %vm326_vm0 = vcmask 1043456   ;;  %v9446_v3 = vld [vmem:[#allocation5 + $0x18] sm:$0xff]  ;;  %v9448_v4 = vld [vmem:[#allocation5 + $0x10] sm:$0xff]  ;;  %v240_v5 = vld [vmem:[#allocation5 + $0x20] sm:$0xf] }
  0x5a   : > { %9246 = vsyncadd (%p10961_p8), [#allocation6], 4294960896  ;;  %7830 = vmatprep.mubr.f32.mxu1 %v10946_v0  ;;  %7822 = vmatprep.subr.mxu1 %v9446_v3  ;;  %v232_v6 = vld [vmem:[%s9435_s9 + $0x50] sm:$0xff]  ;;  %vm313_vm1 = vcmask 31744   ;;  %v9453_v7 = vld [vmem:[#allocation5 + $0x8] sm:$0xff]  ;;  %vm431_vm3 = vcmask 261120  }
  0x5b   : > { %v419_v2 = vand.u32 127, %v418_v1  ;;  %7823 = vmatpush3.msra.mxu1 %v9446_v3  ;;  %7814 = vmatprep.subr.msk.mxu0 %vm326_vm0, %v240_v5  ;;  %v9457_v8 = vld [vmem:[#allocation5] sm:$0xff]  ;;  %v233_v10 = vld [vmem:[%s9435_s9 + $0x58] sm:$0xff]  ;;  %v235_v12 = vld [vmem:[%s9435_s9 + $0x68] sm:$0xff]  ;;  %vm514_vm4 = vcmask 130048   ;;  %s9273_s18 = smov 64  }
  0x5c   : > { %7824 = vmatprep.subr.mxu1 %v9448_v4  ;;  %7815 = vmatpush3.msk.msra.mxu0 %vm326_vm0, %v240_v5  ;;  %v234_v11 = vld [vmem:[%s9435_s9 + $0x60] sm:$0xff]  ;;  %v218_v14 = vld [vmem:[%s9435_s9 + $0x8] sm:$0xff]  ;;  %v219_v18 = vld [vmem:[%s9435_s9 + $0x10] sm:$0xff]  ;;  %vm620_vm5 = vcmask 523264   ;;  %vm9274_vm6 = vmmov 0   ;;  %s9275_s20 = smov 32  }
  0x5d   : > { %vm426_vm2 = vcmp.eq.s32.totalorder %v419_v2, 0  ;;  %7825 = vmatpush3.msra.mxu1 %v9448_v4  ;;  %7816 = vmatprep.mubr.msk.f32.mxu0 %vm313_vm1, %v232_v6  ;;  %v217_v13 = vld [vmem:[%s9435_s9] sm:$0xff]  ;;  %v220_v19 = vld [vmem:[%s9435_s9 + $0x18] sm:$0xff]  ;;  %v222_v22 = vld [vmem:[%s9435_s9 + $0x28] sm:$0xff]  ;;  %s9276_s27 = smov 96   ;;  %s7057_s28 = sshll.u32 %s9431_s5, 3 }
  0x5e   : > { %7826 = vmatprep.subr.mxu1 %v9453_v7  ;;  %v9463_v9 = vsel %vm426_vm2, 1.0, %v10946_v0  ;;  %7817 = vmatmul.mubr.msk.f32.vlgmr.msra.gmra.mxu0 %vm313_vm1, %v233_v10  ;;  %v9477_v15 = vpack.c.bf16 %v218_v14, %v217_v13  ;;  %v221_v21 = vld [vmem:[%s9435_s9 + $0x20] sm:$0xff]  ;;  %v9485_v23 = vpack.c.bf16 %v220_v19, %v219_v18  ;;  %v223_v25 = vld [vmem:[%s9435_s9 + $0x30] sm:$0xff]  ;;  %v224_v26 = vld [vmem:[%s9435_s9 + $0x38] sm:$0xff]  ;;  %s7283_s23 = sshll.u32 %s9319_s16, 7  ;;  %s215_s26 = scalar_lea.vmem [#allocation8], %s7057_s28 }
  0x5f   : > { %7827 = vmatpush3.msra.mxu1 %v9453_v7  ;;  %7819 = vmatprep.mubr.msk.f32.mxu0 %vm313_vm1, %v234_v11  ;;  %v9487_v24 = vpack.c.bf16 %v222_v22, %v221_v21  ;;  %v9495_v27 = vpack.c.bf16 %v224_v26, %v223_v25  ;;  %v9499_v28 = vld [vmem:[#allocation5 + $0x60] sm:$0xff]  ;;  %v9501_v29 = vld [vmem:[#allocation5 + $0x58] sm:$0xff]  ;;  %v9507_v33 = vld [vmem:[#allocation5 + $0x50] sm:$0xff]  ;;  %s6959_s30 = sshll.u32 %s215_s26, 4  ;;  %s10901_s24 = scalar_lea.hbm %s10941_s3, %s7283_s23  ;;  %s6960_s30 = int_to_ptr.vmem [resolvable:$true] %s6959_s30 }
  0x60   : > { %7828 = vmatprep.subr.mxu1 %v9457_v8  ;;  %v9511_v34 = vld [vmem:[#allocation5 + $0x48] sm:$0xff]  ;;  %v9515_v36 = vld [vmem:[#allocation5 + $0x40] sm:$0xff]  ;;  %v9519_v38 = vld [vmem:[#allocation5 + $0x38] sm:$0xff]  ;;  %s6946_s17 = scalar_lea.sflag [#allocation4], %s9431_s5  ;;  %s9197_s21 = scalar_lea.vmem %s6960_s30, 128 }
  0x61   : > { %7829 = vmatpush3.msra.mxu1 %v9457_v8  ;;  %v9523_v40 = vld [vmem:[#allocation5 + $0x30] sm:$0xff]  ;;  %v9527_v42 = vld [vmem:[#allocation5 + $0x28] sm:$0xff]  ;;  %v9534_v47 = vld [vmem:[#allocation5 + $0xa0] sm:$0xff]  ;;  %p9198_p5 = scmp.ne.s32.totalorder %s6960_s30, %s9197_s21  ;;  %p10967_p11 = scmp.ne.s32.totalorder %s10956_s10, 0 }
  0x62   : > { %7831 = vmatmul.mubr.msk.f32.vlgmr.msra.gmra.mxu1 %vm431_vm3, %v9463_v9  ;;  %7820 = vmatmul.mubr.msk.f32.gmra.mxu0 %vm313_vm1, %v235_v12  ;;  %v9536_v48 = vld [vmem:[#allocation5 + $0x98] sm:$0xff]  ;;  %v9541_v50 = vld [vmem:[#allocation5 + $0x90] sm:$0xff]  ;;  %v9546_v51 = vld [vmem:[#allocation5 + $0x88] sm:$0xff]  ;;  %s9277_s25 = smov [#allocation8]  }
  0x63   : > { %7835 = vmatprep.mubr.msk.bf16.mxu0 %vm514_vm4, %v9477_v15  ;;  %7843 = vmatprep.subr.mxu1 %v9499_v28  ;;  %v7062_v52 = vld [vmem:[#allocation7] ss:$0 sm:$0xff]  ;;  %v9576_v18 = vld [vmem:[#allocation5 + $0x70] sm:$0xff]  ;;  %p9199_p7 = pnand %p9198_p5, %p10967_p11  ;;  %s9201_s29 = sshll.u32 %s9277_s25, 4  ;;  %s9202_s29 = int_to_ptr.vmem [resolvable:$false] %s9201_s29 }
  0x64   : > { %7844 = vmatpush3.msra.mxu1 %v9499_v28  ;;  %v9580_v19 = vld [vmem:[#allocation5 + $0x68] sm:$0xff]  ;;  %s9203_s16 = scalar_lea.vmem %s9202_s29, 256  ;;  %p9204_p13 = scmp.lt.s32.totalorder %s6960_s30, %s9202_s29 }
  0x65   : > { %7845 = vmatprep.subr.mxu1 %v9501_v29  ;;  %p9200_p12 = pneg %p9199_p7  ;;  %p9205_p0 = scmp.lt.s32.totalorder %s9203_s16, %s9197_s21 }
  0x66   : > { %7846 = vmatpush3.msra.mxu1 %v9501_v29 }
  0x67   : > { %7847 = vmatprep.subr.mxu1 %v9507_v33  ;;  %p9206_p10 = por %p9205_p0, %p9204_p13 }
  0x68   : > { %7848 = vmatpush3.msra.mxu1 %v9507_v33 }
  0x69   : > { %7849 = vmatprep.subr.mxu1 %v9511_v34  ;;  %p9207_p3 = pnand %p9206_p10, %p9200_p12 }
  0x6a   : > { %7850 = vmatpush3.msra.mxu1 %v9511_v34 }
  0x6b   : > { %7851 = vmatprep.subr.mxu1 %v9515_v36 }
  0x6c   : > { %7852 = vmatpush3.msra.mxu1 %v9515_v36 }
  0x6d   : > { %7853 = vmatprep.subr.mxu1 %v9519_v38 }
  0x6e   : > { %7854 = vmatpush3.msra.mxu1 %v9519_v38 }
  0x6f   : > { %7855 = vmatprep.subr.mxu1 %v9523_v40 }
  0x70   : > { %7856 = vmatpush3.msra.mxu1 %v9523_v40 }
  0x71   : > { %7857 = vmatprep.subr.mxu1 %v9527_v42 }
  0x72   : > { %7858 = vmatpush3.msra.mxu1 %v9527_v42 }
  0x73   : > { %7887 = vmatprep.subr.bf16.mxu1 %v10946_v0 }
 0x11e   : > { %v7818_v30 = vpop.f32.mrf.mxu0 }
 0x11f   : > { %v9557_v62 = vadd.f32 %v7818_v30, %v7062_v52 }
 0x120   : > { %v396_v31 = vpop.f32.mrf.mxu0 }
 0x121   : > { %v9552_v55 = vadd.f32 %v7062_v52, %v396_v31 }
 0x122   : > { %v7832_v16 = vpop.f32.mrf.mxu1  ;;  %v7821_v32 = vpop.f32.mrf.mxu0 }
 0x123   : > { %v9560_v6 = vadd.f32 %v7821_v32, %v7062_v52 }
 0x124   : > { %v504_v17 = vpop.f32.mrf.mxu1  ;;  %v406_v35 = vpop.f32.mrf.mxu0 }
 0x125   : > { %v513_v20 = vpack.c.bf16 %v7832_v16, %v504_v17  ;;  %v9555_v60 = vadd.f32 %v7062_v52, %v406_v35  ;;  %v9568_v16 = vld [vmem:[#allocation5 + $0x80] sm:$0xff]  ;;  %v9572_v17 = vld [vmem:[#allocation5 + $0x78] sm:$0xff] }
 0x127   : > { %7833 = vmatprep.subr.bf16.mxu0 %v513_v20 }
 0x128   : > { %7834 = vmatpush3.bf16.msra.mxu0 %v513_v20  ;;  %v9584_v20 = vld [vmem:[#allocation7 + $0x1] ss:$0 sm:$0xff] }
 0x129   : > { %7865 = vmatprep.subr.mxu0 %v9534_v47 }
 0x12b   : > { %7836 = vmatmul.mubr.msk.bf16.vlgmr.msra.gmra.mxu0 %vm514_vm4, %v9485_v23 }
 0x12c   : > { %7839 = vmatprep.mubr.msk.bf16.mxu0 %vm514_vm4, %v9487_v24  ;;  %7866 = vmatpush3.msra.mxu0 %v9534_v47 }
 0x12d   : > { %7867 = vmatprep.subr.mxu0 %v9536_v48 }
 0x12e   : > { %7868 = vmatpush3.msra.mxu0 %v9536_v48 }
 0x12f   : > { %7869 = vmatprep.subr.mxu0 %v9541_v50 }
 0x130   : > { %7870 = vmatpush3.msra.mxu0 %v9541_v50 }
 0x131   : > { %7871 = vmatprep.subr.mxu0 %v9546_v51 }
 0x132   : > { %7872 = vmatpush3.msra.mxu0 %v9546_v51 }
 0x133   : > { %7840 = vmatmul.mubr.msk.bf16.gmra.mxu0 %vm514_vm4, %v9495_v27  ;;  %7873 = vmatprep.subr.mxu0 %v9568_v16 }
 0x134   : > { %7874 = vmatpush3.msra.mxu0 %v9568_v16 }
 0x135   : > { %7875 = vmatprep.subr.mxu0 %v9572_v17 }
 0x136   : > { %7876 = vmatpush3.msra.mxu0 %v9572_v17 }
 0x137   : > { %7877 = vmatprep.subr.mxu0 %v9576_v18 }
 0x138   : > { %7878 = vmatpush3.msra.mxu0 %v9576_v18 }
 0x139   : > { %7879 = vmatprep.subr.mxu0 %v9580_v19 }
 0x13a   : > { %7880 = vmatpush3.msra.mxu0 %v9580_v19 }
 0x1eb   : > { %v7837_v37 = vpop.f32.mrf.mxu0 }
 0x1ed   : > { %v561_v39 = vpop.f32.mrf.mxu0 }
 0x1ef   : > { %v7838_v41 = vpop.f32.mrf.mxu0 }
 0x1f1   : > { %v564_v43 = vpop.f32.mrf.mxu0 }
 0x1f3   : > { %v7841_v44 = vpop.f32.mrf.mxu0 }
 0x1f4   : > { %600 = vrot.lane.b32.xlu1 %v7841_v44, %s9273_s18  ;;  %v9596_v44 = vld [vmem:[#allocation5 + $0xc0] sm:$0xff] }
 0x1f5   : > { %v577_v45 = vpop.f32.mrf.mxu0  ;;  %7895 = vmatprep.subr.mxu0 %v9596_v44 }
 0x1f6   : > { %596 = vrot.lane.b32.xlu0 %v577_v45, %s9273_s18  ;;  %v9598_v45 = vld [vmem:[#allocation5 + $0xb8] sm:$0xff] }
 0x1f7   : > { %v7842_v46 = vpop.f32.mrf.mxu0 }
 0x1f8   : > { %602 = vrot.lane.b32.xlu1 %v7842_v46, %s9273_s18 }
 0x1f9   : > { %v580_v49 = vpop.f32.mrf.mxu0 }
 0x1fa   : > { %598 = vrot.lane.b32.xlu0 %v580_v49, %s9273_s18 }
 0x266   : > { %v601_v53 = vpop.permute.xlu1 %600 }
 0x267   : > { %v610_v57 = vadd.f32 %v7837_v37, %v601_v53  ;;  %v9604_v53 = vld [vmem:[#allocation7 + $0x2] ss:$0 sm:$0xff] }
 0x268   : > { %v597_v54 = vpop.permute.xlu0 %596 }
 0x269   : > { %v608_v56 = vadd.f32 %v597_v54, %v561_v39  ;;  %v614_v5 = vadd.f32 %v610_v57, %v9555_v60 }
 0x26a   : > { %v603_v58 = vpop.permute.xlu1 %602 }
 0x26b   : > { %v612_v59 = vadd.f32 %v608_v56, %v9552_v55  ;;  %v611_v1 = vadd.f32 %v7838_v41, %v603_v58  ;;  %v618_v13 = vmax.f32 %v614_v5, 0.0  ;;  %v9613_v5 = vld [vmem:[#allocation5 + $0xe0] sm:$0xff] }
 0x26c   : > { %v599_v61 = vpop.permute.xlu0 %598 }
 0x26d   : > { %v616_v63 = vmax.f32 %v612_v59, 0.0  ;;  %v609_v2 = vadd.f32 %v599_v61, %v564_v43  ;;  %v615_v11 = vadd.f32 %v611_v1, %v9560_v6  ;;  %v230_v1 = vld [vmem:[%s9435_s9 + $0x48] sm:$0xff] }
 0x26f   : > { %v613_v10 = vadd.f32 %v609_v2, %v9557_v62  ;;  %7859 = vmatprep.mubr.msk.f32.mxu1 %vm620_vm5, %v616_v63  ;;  %v619_v14 = vmax.f32 %v615_v11, 0.0  ;;  %v229_v63 = vld [vmem:[%s9435_s9 + $0x40] sm:$0xff]  ;;  %v9618_v11 = vld [vmem:[#allocation5 + $0xd8] sm:$0xff] }
 0x271   : > { %v617_v12 = vmax.f32 %v613_v10, 0.0  ;;  %v9615_v10 = vpack.c.bf16 %v230_v1, %v229_v63 }
 0x273   : > { %7860 = vmatmul.mubr.msk.f32.vlgmr.msra.gmra.mxu1 %vm620_vm5, %v617_v12  ;;  %v9623_v12 = vld [vmem:[#allocation5 + $0xd0] sm:$0xff] }
 0x274   : > { %7862 = vmatprep.mubr.msk.f32.mxu1 %vm620_vm5, %v618_v13  ;;  %v9628_v13 = vld [vmem:[#allocation5 + $0xc8] sm:$0xff] }
 0x277   : > { %7863 = vmatmul.mubr.msk.f32.gmra.mxu1 %vm620_vm5, %v619_v14  ;;  %v9638_v14 = vld [vmem:[#allocation5 + $0xb0] sm:$0xff] }
 0x278   : > { %7891 = vmatprep.mubr.msk.bf16.mxu1 %vm9274_vm6, %v10946_v0 }
 0x333   : > { %v7861_v21 = vpop.f32.mrf.mxu1 }
 0x334   : > { %v705_v22 = vadd.f32 %v7861_v21, %v9584_v20  ;;  %v9642_v21 = vld [vmem:[#allocation5 + $0xa8] sm:$0xff] }
 0x335   : > { %v699_v25 = vpop.f32.mrf.mxu1 }
 0x336   : > { %v700_v26 = vadd.f32 %v9584_v20, %v699_v25  ;;  %v719_v32 = vmax.f32 %v705_v22, 0.0 }
 0x337   : > { %v7864_v30 = vpop.f32.mrf.mxu1 }
 0x338   : > { %v718_v31 = vmax.f32 %v700_v26, 0.0  ;;  %v715_v35 = vadd.f32 %v7864_v30, %v9584_v20 }
 0x339   : > { %v709_v37 = vpop.f32.mrf.mxu1 }
 0x33a   : > { %v710_v39 = vadd.f32 %v9584_v20, %v709_v37  ;;  %7881 = vmatprep.mubr.msk.f32.mxu0 %vm620_vm5, %v718_v31  ;;  %v721_v43 = vmax.f32 %v715_v35, 0.0  ;;  %v9649_v31 = vld [vmem:[#allocation7 + $0x4] ss:$0 sm:$0xff] }
 0x33b   : > { %7882 = vmatmul.mubr.msk.f32.vlgmr.msra.gmra.mxu0 %vm620_vm5, %v719_v32 }
 0x33c   : > { %v720_v41 = vmax.f32 %v710_v39, 0.0  ;;  %7896 = vmatpush3.msra.mxu0 %v9596_v44 }
 0x33d   : > { %7897 = vmatprep.subr.mxu0 %v9598_v45 }
 0x33e   : > { %7884 = vmatprep.mubr.msk.f32.mxu0 %vm620_vm5, %v720_v41  ;;  %7898 = vmatpush3.msra.mxu0 %v9598_v45  ;;  %v9663_v41 = vld [vmem:[#allocation7 + $0x3] ss:$0 sm:$0xff] }
 0x33f   : > { %7885 = vmatmul.mubr.msk.f32.gmra.mxu0 %vm620_vm5, %v721_v43  ;;  %7899 = vmatprep.subr.mxu0 %v9638_v14 }
 0x340   : > { %7900 = vmatpush3.msra.mxu0 %v9638_v14 }
 0x341   : > { %7901 = vmatprep.subr.mxu0 %v9642_v21 }
 0x342   : > { %7902 = vmatpush3.msra.mxu0 %v9642_v21 }
 0x343   : > { %7917 = vmatprep.subr.mxu0 %v9446_v3 }
 0x3fb   : > { %v7883_v46 = vpop.f32.mrf.mxu0 }
 0x3fc   : > { %v806_v61 = vadd.f32 %v7883_v46, %v9604_v53 }
 0x3fd   : > { %v800_v49 = vpop.f32.mrf.mxu0 }
 0x3fe   : > { %v801_v58 = vadd.f32 %v9604_v53, %v800_v49 }
 0x3ff   : > { %v7886_v52 = vpop.f32.mrf.mxu0 }
 0x400   : > { %v816_v56 = vadd.f32 %v7886_v52, %v9604_v53  ;;  %v819_v2 = vpack.c.bf16 %v806_v61, %v801_v58 }
 0x401   : > { %v810_v54 = vpop.f32.mrf.mxu0 }
 0x402   : > { %v811_v57 = vadd.f32 %v9604_v53, %v810_v54 }
 0x404   : > { %v820_v59 = vpack.c.bf16 %v816_v56, %v811_v57 }
 0x406   : > { %7888 = vmatpush3.bf16.msra.mxu1 %v820_v59 }
 0x407   : > { %7889 = vmatprep.subr.bf16.mxu1 %v10946_v0 }
 0x40a   : > { %7890 = vmatpush3.bf16.msra.mxu1 %v819_v2 }
 0x40b   : > { %7906 = vmatprep.subr.mxu1 %v9613_v5 }
 0x40d   : > { %7892 = vmatmul.mubr.msk.bf16.vlgmr.msra.gmra.mxu1 %vm431_vm3, %v9615_v10 }
 0x40e   : > { %7907 = vmatpush3.msra.mxu1 %v9613_v5  ;;  %7914 = vmatprep.mubr.f32.mxu1 %v10946_v0 }
 0x40f   : > { %7908 = vmatprep.subr.mxu1 %v9618_v11 }
 0x410   : > { %7909 = vmatpush3.msra.mxu1 %v9618_v11 }
 0x411   : > { %7910 = vmatprep.subr.mxu1 %v9623_v12 }
 0x412   : > { %7911 = vmatpush3.msra.mxu1 %v9623_v12 }
 0x413   : > { %7912 = vmatprep.subr.mxu1 %v9628_v13 }
 0x414   : > { %7913 = vmatpush3.msra.mxu1 %v9628_v13 }
 0x415   : > { %7915 = vmatmul.mubr.msk.f32.vlgmr.msra.gmra.mxu1 %vm431_vm3, %v9463_v9 }
 0x416   : > { %7930 = vmatprep.mubr.msk.bf16.mxu1 %vm514_vm4, %v9477_v15 }
 0x4cd   : > { %v858_v22 = vpop.f32.mrf.mxu1 }
 0x4ce   : > { %7903 = vmatprep.mubr.msk.f32.mxu0 %vm431_vm3, %v858_v22 }
 0x4cf   : > { %v7893_v25 = vpop.f32.mrf.mxu1 }
 0x4d1   : > { %v861_v26 = vpop.f32.mrf.mxu1 }
 0x4d2   : > { %7904 = vmatmul.mubr.msk.f32.vlgmr.msra.gmra.mxu0 %vm431_vm3, %v861_v26 }
 0x4d3   : > { %v7894_v30 = vpop.f32.mrf.mxu1  ;;  %7918 = vmatpush3.msra.mxu0 %v9446_v3 }
 0x4d4   : > { %7919 = vmatprep.subr.mxu0 %v9448_v4 }
 0x4d5   : > { %v7916_v32 = vpop.f32.mrf.mxu1  ;;  %7920 = vmatpush3.msra.mxu0 %v9448_v4 }
 0x4d6   : > { %v1018_v35 = vadd.f32 %v7916_v32, %v9649_v31  ;;  %7921 = vmatprep.subr.mxu0 %v9453_v7 }
 0x4d7   : > { %v1012_v37 = vpop.f32.mrf.mxu1  ;;  %7922 = vmatpush3.msra.mxu0 %v9453_v7 }
 0x4d8   : > { %v1013_v39 = vadd.f32 %v9649_v31, %v1012_v37  ;;  %1039 = vrot.lane.b32.xlu1 %v1018_v35, %s9273_s18  ;;  %7923 = vmatprep.subr.mxu0 %v9457_v8 }
 0x4d9   : > { %7924 = vmatpush3.msra.mxu0 %v9457_v8 }
 0x4da   : > { %1037 = vrot.lane.b32.xlu0 %v1013_v39, %s9273_s18  ;;  %7938 = vmatprep.subr.mxu0 %v9499_v28 }
 0x54a   : > { %v1040_v2 = vpop.permute.xlu1 %1039 }
 0x54c   : > { %v1038_v30 = vpop.permute.xlu0 %1037 }
 0x592   : > { %v7905_v43 = vpop.f32.mrf.mxu0 }
 0x593   : > { %v943_v46 = vadd.f32 %v7905_v43, %v9663_v41 }
 0x594   : > { %v937_v49 = vpop.f32.mrf.mxu0 }
 0x595   : > { %v1022_v52 = vadd.f32 %v1018_v35, %v943_v46  ;;  %v938_v54 = vadd.f32 %v9663_v41, %v937_v49 }
 0x597   : > { %v7086_v56 = vmul.f32 -1.442695, %v1022_v52  ;;  %v1021_v57 = vadd.f32 %v1013_v39, %v938_v54 }
 0x599   : > { %8903 = vpow2.f32 %v7086_v56  ;;  %v7085_v58 = vmul.f32 -1.442695, %v1021_v57 }
 0x59b   : > { %8905 = vpow2.f32 %v7085_v58 }
 0x5a6   : > { %v8904_v59 = vpop.eup %8903 }
 0x5a7   : > { %v1030_v61 = vadd.f32 1.0, %v8904_v59 }
 0x5a8   : > { %v8906_v63 = vpop.eup %8905 }
 0x5a9   : > { %8907 = vrcp.f32 %v1030_v61  ;;  %v1029_v1 = vadd.f32 1.0, %v8906_v63 }
 0x5ab   : > { %8909 = vrcp.f32 %v1029_v1 }
 0x5b6   : > { %v8908_v22 = vpop.eup %8907 }
 0x5b7   : > { %v1044_v25 = vmul.f32 %v8908_v22, %v1040_v2 }
 0x5b8   : > { %v8910_v26 = vpop.eup %8909 }
 0x5b9   : > { %v1043_v32 = vmul.f32 %v8910_v26, %v1038_v30  ;;  %1049 = vrot.lane.b32.xlu1 %v1044_v25, %s9273_s18  ;;  %v1057_v58 = vsub.f32 1.0, %v8910_v26 }
 0x5bb   : > { %1047 = vrot.lane.b32.xlu0 %v1043_v32, %s9273_s18 }
 0x5bd   : > { %8899 = vrot.lane.b32.xlu1 %v9463_v9, %s9275_s20 }
 0x62b   : > { %v1050_v35 = vpop.permute.xlu1 %1049 }
 0x62c   : > { %v1054_v43 = vadd.f32 %v1050_v35, %v943_v46 }
 0x62d   : > { %v1048_v37 = vpop.permute.xlu0 %1047 }
 0x62e   : > { %v1053_v39 = vadd.f32 %v1048_v37, %v938_v54  ;;  %v1058_v54 = vsub.f32 1.0, %v8908_v22 }
 0x62f   : > { %v8900_v56 = vpop.permute.xlu1 %8899 }
 0x630   : > { %8911 = vtanh.f32 %v1053_v39  ;;  %v8901_v57 = vunpack.i.l.bf16 %v8900_v56  ;;  %v8902_v61 = vunpack.i.h.bf16 %v8900_v56 }
 0x631   : > { %8913 = vtanh.f32 %v1054_v43 }
 0x632   : > { %v1075_v63 = vmul.f32 %v8910_v26, %v8901_v57  ;;  %v1076_v2 = vmul.f32 %v8908_v22, %v8902_v61 }
 0x63d   : > { %v8912_v49 = vpop.eup %8911 }
 0x63e   : > { %1061 = vrot.lane.b32.xlu0 %v8912_v49, %s9276_s27  ;;  %v8914_v52 = vpop.eup %8913 }
 0x642   : > { %1063 = vrot.lane.b32.xlu0 %v8914_v52, %s9276_s27 }
 0x6b0   : > { %v1062_v59 = vpop.permute.xlu0 %1061 }
 0x6b1   : > { %v1067_v9 = vmul.f32 %v1062_v59, %v1057_v58 }
 0x6b3   : > { %v9672_v1 = vadd.f32 %v1075_v63, %v1067_v9 }
 0x6b4   : > { %v1064_v46 = vpop.permute.xlu0 %1063 }
 0x6b5   : > { %v1068_v25 = vmul.f32 %v1064_v46, %v1058_v54  ;;  %1081 = vrot.lane.b32.xlu1 %v9672_v1, %s9276_s27 }
 0x6b7   : > { %v9676_v30 = vadd.f32 %v1076_v2, %v1068_v25 }
 0x6b9   : > { %1083 = vrot.lane.b32.xlu0 %v9676_v30, %s9276_s27 }
 0x727   : > { %v9680_v32 = vpop.permute.xlu1 %1081 }
 0x728   : > { %7925 = vmatprep.mubr.msk.f32.mxu0 %vm431_vm3, %v9680_v32 }
 0x72b   : > { %v9684_v26 = vpop.permute.xlu0 %1083 }
 0x72c   : > { %7926 = vmatmul.mubr.msk.f32.vlgmr.msra.gmra.mxu0 %vm431_vm3, %v9684_v26 }
 0x72d   : > { %7939 = vmatpush3.msra.mxu0 %v9499_v28 }
 0x72e   : > { %7940 = vmatprep.subr.mxu0 %v9501_v29 }
 0x72f   : > { %7941 = vmatpush3.msra.mxu0 %v9501_v29 }
 0x730   : > { %7942 = vmatprep.subr.mxu0 %v9507_v33 }
 0x731   : > { %7943 = vmatpush3.msra.mxu0 %v9507_v33 }
 0x732   : > { %7944 = vmatprep.subr.mxu0 %v9511_v34 }
 0x733   : > { %7945 = vmatpush3.msra.mxu0 %v9511_v34 }
 0x734   : > { %7946 = vmatprep.subr.mxu0 %v9515_v36 }
 0x735   : > { %7947 = vmatpush3.msra.mxu0 %v9515_v36 }
 0x736   : > { %7948 = vmatprep.subr.mxu0 %v9519_v38 }
 0x737   : > { %7949 = vmatpush3.msra.mxu0 %v9519_v38 }
 0x738   : > { %7950 = vmatprep.subr.mxu0 %v9523_v40 }
 0x739   : > { %7951 = vmatpush3.msra.mxu0 %v9523_v40 }
 0x73a   : > { %7952 = vmatprep.subr.mxu0 %v9527_v42 }
 0x73b   : > { %7953 = vmatpush3.msra.mxu0 %v9527_v42 }
 0x73c   : > { %7982 = vmatprep.subr.bf16.mxu0 %v10946_v0 }
 0x7ec   : > { %v7927_v22 = vpop.f32.mrf.mxu0 }
 0x7ee   : > { %v1155_v35 = vpop.f32.mrf.mxu0 }
 0x7ef   : > { %v1164_v37 = vpack.c.bf16 %v7927_v22, %v1155_v35 }
 0x7f1   : > { %7928 = vmatprep.subr.bf16.mxu1 %v1164_v37 }
 0x7f2   : > { %7929 = vmatpush3.bf16.msra.mxu1 %v1164_v37 }
 0x7f3   : > { %7960 = vmatprep.subr.mxu1 %v9534_v47 }
 0x7f5   : > { %7931 = vmatmul.mubr.msk.bf16.vlgmr.msra.gmra.mxu1 %vm514_vm4, %v9485_v23 }
 0x7f6   : > { %7934 = vmatprep.mubr.msk.bf16.mxu1 %vm514_vm4, %v9487_v24  ;;  %7961 = vmatpush3.msra.mxu1 %v9534_v47 }
 0x7f7   : > { %7962 = vmatprep.subr.mxu1 %v9536_v48 }
 0x7f8   : > { %7963 = vmatpush3.msra.mxu1 %v9536_v48 }
 0x7f9   : > { %7964 = vmatprep.subr.mxu1 %v9541_v50 }
 0x7fa   : > { %7965 = vmatpush3.msra.mxu1 %v9541_v50 }
 0x7fb   : > { %7966 = vmatprep.subr.mxu1 %v9546_v51 }
 0x7fc   : > { %7967 = vmatpush3.msra.mxu1 %v9546_v51 }
 0x7fd   : > { %7935 = vmatmul.mubr.msk.bf16.gmra.mxu1 %vm514_vm4, %v9495_v27  ;;  %7968 = vmatprep.subr.mxu1 %v9568_v16 }
 0x7fe   : > { %7969 = vmatpush3.msra.mxu1 %v9568_v16 }
 0x7ff   : > { %7970 = vmatprep.subr.mxu1 %v9572_v17 }
 0x800   : > { %7971 = vmatpush3.msra.mxu1 %v9572_v17 }
 0x801   : > { %7972 = vmatprep.subr.mxu1 %v9576_v18 }
 0x802   : > { %7973 = vmatpush3.msra.mxu1 %v9576_v18 }
 0x803   : > { %7974 = vmatprep.subr.mxu1 %v9580_v19 }
 0x804   : > { %7975 = vmatpush3.msra.mxu1 %v9580_v19 }
 0x805   : > { %7990 = vmatprep.subr.mxu1 %v9596_v44 }
 0x8b5   : > { %v7932_v39 = vpop.f32.mrf.mxu1 }
 0x8b7   : > { %v1199_v43 = vpop.f32.mrf.mxu1 }
 0x8b9   : > { %v7933_v49 = vpop.f32.mrf.mxu1 }
 0x8bb   : > { %v1202_v52 = vpop.f32.mrf.mxu1 }
 0x8bd   : > { %v7936_v56 = vpop.f32.mrf.mxu1 }
 0x8bf   : > { %v1215_v57 = vpop.f32.mrf.mxu1 }
 0x8c0   : > { %1234 = vrot.lane.b32.xlu1 %v1215_v57, %s9273_s18 }
 0x8c1   : > { %v7937_v58 = vpop.f32.mrf.mxu1 }
 0x8c3   : > { %v1218_v59 = vpop.f32.mrf.mxu1 }
 0x8c4   : > { %1238 = vrot.lane.b32.xlu1 %v7936_v56, %s9273_s18  ;;  %1236 = vrot.lane.b32.xlu0 %v1218_v59, %s9273_s18 }
 0x8c8   : > { %1240 = vrot.lane.b32.xlu0 %v7937_v58, %s9273_s18 }
 0x932   : > { %v1235_v61 = vpop.permute.xlu1 %1234 }
 0x933   : > { %v1246_v63 = vadd.f32 %v1235_v61, %v1199_v43 }
 0x935   : > { %v1250_v9 = vadd.f32 %v1246_v63, %v9552_v55 }
 0x936   : > { %v1239_v54 = vpop.permute.xlu1 %1238  ;;  %v1237_v46 = vpop.permute.xlu0 %1236 }
 0x937   : > { %v1254_v2 = vmax.f32 %v1250_v9, 0.0  ;;  %v1248_v25 = vadd.f32 %v7932_v39, %v1239_v54  ;;  %v1247_v22 = vadd.f32 %v1237_v46, %v1202_v52  ;;  %v10962_v39 = vmov 0.0  }
 0x939   : > { %v1252_v35 = vadd.f32 %v1248_v25, %v9555_v60  ;;  %v1251_v37 = vadd.f32 %v1247_v22, %v9557_v62  ;;  %7954 = vmatprep.mubr.msk.f32.mxu0 %vm620_vm5, %v1254_v2 }
 0x93a   : > { %v1241_v56 = vpop.permute.xlu0 %1240 }
 0x93b   : > { %v1256_v57 = vmax.f32 %v1252_v35, 0.0  ;;  %v1255_v59 = vmax.f32 %v1251_v37, 0.0  ;;  %v1249_v0 = vadd.f32 %v7933_v49, %v1241_v56 }
 0x93d   : > { %v1253_v58 = vadd.f32 %v1249_v0, %v9560_v6  ;;  %7955 = vmatmul.mubr.msk.f32.vlgmr.msra.gmra.mxu0 %vm620_vm5, %v1255_v59 }
 0x93e   : > { %7957 = vmatprep.mubr.msk.f32.mxu0 %vm620_vm5, %v1256_v57 }
 0x93f   : > { %v1257_v43 = vmax.f32 %v1253_v58, 0.0 }
 0x941   : > { %7958 = vmatmul.mubr.msk.f32.gmra.mxu0 %vm620_vm5, %v1257_v43 }
 0x942   : > { %7986 = vmatprep.mubr.msk.bf16.mxu0 %vm9274_vm6, %v10962_v39 }
 0x9fd   : > { %v7956_v52 = vpop.f32.mrf.mxu0 }
 0x9fe   : > { %v1342_v61 = vadd.f32 %v7956_v52, %v9584_v20 }
 0x9ff   : > { %v1336_v63 = vpop.f32.mrf.mxu0 }
 0xa00   : > { %v1337_v9 = vadd.f32 %v9584_v20, %v1336_v63  ;;  %v1356_v46 = vmax.f32 %v1342_v61, 0.0 }
 0xa01   : > { %v7959_v54 = vpop.f32.mrf.mxu0 }
 0xa02   : > { %v1355_v49 = vmax.f32 %v1337_v9, 0.0  ;;  %v1352_v0 = vadd.f32 %v7959_v54, %v9584_v20 }
 0xa03   : > { %v1346_v2 = vpop.f32.mrf.mxu0 }
 0xa04   : > { %v1347_v25 = vadd.f32 %v9584_v20, %v1346_v2  ;;  %7976 = vmatprep.mubr.msk.f32.mxu1 %vm620_vm5, %v1355_v49  ;;  %v1358_v35 = vmax.f32 %v1352_v0, 0.0 }
 0xa05   : > { %7977 = vmatmul.mubr.msk.f32.vlgmr.msra.gmra.mxu1 %vm620_vm5, %v1356_v46 }
 0xa06   : > { %v1357_v22 = vmax.f32 %v1347_v25, 0.0  ;;  %7991 = vmatpush3.msra.mxu1 %v9596_v44 }
 0xa07   : > { %7992 = vmatprep.subr.mxu1 %v9598_v45 }
 0xa08   : > { %7979 = vmatprep.mubr.msk.f32.mxu1 %vm620_vm5, %v1357_v22  ;;  %7993 = vmatpush3.msra.mxu1 %v9598_v45 }
 0xa09   : > { %7980 = vmatmul.mubr.msk.f32.gmra.mxu1 %vm620_vm5, %v1358_v35  ;;  %7994 = vmatprep.subr.mxu1 %v9638_v14 }
 0xa0a   : > { %7995 = vmatpush3.msra.mxu1 %v9638_v14 }
 0xa0b   : > { %7996 = vmatprep.subr.mxu1 %v9642_v21 }
 0xa0c   : > { %7997 = vmatpush3.msra.mxu1 %v9642_v21 }
 0xa0d   : > { %8012 = vmatprep.subr.mxu1 %v9446_v3 }
 0xac5   : > { %v7978_v37 = vpop.f32.mrf.mxu1 }
 0xac6   : > { %v1443_v63 = vadd.f32 %v7978_v37, %v9604_v53 }
 0xac7   : > { %v1437_v56 = vpop.f32.mrf.mxu1 }
 0xac8   : > { %v1438_v52 = vadd.f32 %v9604_v53, %v1437_v56 }
 0xac9   : > { %v7981_v57 = vpop.f32.mrf.mxu1 }
 0xaca   : > { %v1453_v58 = vadd.f32 %v7981_v57, %v9604_v53  ;;  %v1456_v9 = vpack.c.bf16 %v1443_v63, %v1438_v52 }
 0xacb   : > { %v1447_v59 = vpop.f32.mrf.mxu1 }
 0xacc   : > { %v1448_v43 = vadd.f32 %v9604_v53, %v1447_v59 }
 0xace   : > { %v1457_v61 = vpack.c.bf16 %v1453_v58, %v1448_v43 }
 0xad0   : > { %7983 = vmatpush3.bf16.msra.mxu0 %v1457_v61 }
 0xad1   : > { %7984 = vmatprep.subr.bf16.mxu0 %v10962_v39 }
 0xad4   : > { %7985 = vmatpush3.bf16.msra.mxu0 %v1456_v9 }
 0xad5   : > { %8001 = vmatprep.subr.mxu0 %v9613_v5 }
 0xad7   : > { %7987 = vmatmul.mubr.msk.bf16.vlgmr.msra.gmra.mxu0 %vm431_vm3, %v9615_v10 }
 0xad8   : > { %8002 = vmatpush3.msra.mxu0 %v9613_v5  ;;  %8009 = vmatprep.mubr.msk.f32.mxu0 %vm431_vm3, %v9680_v32 }
 0xad9   : > { %8003 = vmatprep.subr.mxu0 %v9618_v11 }
 0xada   : > { %8004 = vmatpush3.msra.mxu0 %v9618_v11 }
 0xadb   : > { %8005 = vmatprep.subr.mxu0 %v9623_v12 }
 0xadc   : > { %8006 = vmatpush3.msra.mxu0 %v9623_v12 }
 0xadd   : > { %8007 = vmatprep.subr.mxu0 %v9628_v13 }
 0xade   : > { %8008 = vmatpush3.msra.mxu0 %v9628_v13 }
 0xadf   : > { %8010 = vmatmul.mubr.msk.f32.vlgmr.msra.gmra.mxu0 %vm431_vm3, %v9684_v26 }
 0xae0   : > { %8025 = vmatprep.mubr.msk.bf16.mxu0 %vm514_vm4, %v9477_v15 }
 0xb97   : > { %v1492_v54 = vpop.f32.mrf.mxu0 }
 0xb98   : > { %7998 = vmatprep.mubr.msk.f32.mxu1 %vm431_vm3, %v1492_v54 }
 0xb99   : > { %v7988_v32 = vpop.f32.mrf.mxu0 }
 0xb9b   : > { %v1495_v49 = vpop.f32.mrf.mxu0 }
 0xb9c   : > { %7999 = vmatmul.mubr.msk.f32.vlgmr.msra.gmra.mxu1 %vm431_vm3, %v1495_v49 }
 0xb9d   : > { %v7989_v46 = vpop.f32.mrf.mxu0  ;;  %8013 = vmatpush3.msra.mxu1 %v9446_v3 }
 0xb9e   : > { %8014 = vmatprep.subr.mxu1 %v9448_v4 }
 0xb9f   : > { %v8011_v0 = vpop.f32.mrf.mxu0  ;;  %8015 = vmatpush3.msra.mxu1 %v9448_v4 }
 0xba0   : > { %v1652_v26 = vadd.f32 %v8011_v0, %v9649_v31  ;;  %8016 = vmatprep.subr.mxu1 %v9453_v7 }
 0xba1   : > { %v1646_v2 = vpop.f32.mrf.mxu0  ;;  %8017 = vmatpush3.msra.mxu1 %v9453_v7 }
 0xba2   : > { %v1647_v25 = vadd.f32 %v9649_v31, %v1646_v2  ;;  %1673 = vrot.lane.b32.xlu0 %v1652_v26, %s9273_s18  ;;  %8018 = vmatprep.subr.mxu1 %v9457_v8 }
 0xba3   : > { %8019 = vmatpush3.msra.mxu1 %v9457_v8 }
 0xba4   : > { %1671 = vrot.lane.b32.xlu1 %v1647_v25, %s9273_s18  ;;  %8033 = vmatprep.subr.mxu1 %v9499_v28 }
 0xc14   : > { %v1674_v61 = vpop.permute.xlu0 %1673 }
 0xc16   : > { %v1672_v54 = vpop.permute.xlu1 %1671 }
 0xc5c   : > { %v8000_v3 = vpop.f32.mrf.mxu1 }
 0xc5d   : > { %v1577_v4 = vadd.f32 %v8000_v3, %v9663_v41 }
 0xc5e   : > { %v1571_v22 = vpop.f32.mrf.mxu1 }
 0xc5f   : > { %v1656_v35 = vadd.f32 %v1652_v26, %v1577_v4  ;;  %v1572_v37 = vadd.f32 %v9663_v41, %v1571_v22 }
 0xc61   : > { %v7107_v7 = vmul.f32 -1.442695, %v1656_v35  ;;  %v1655_v56 = vadd.f32 %v1647_v25, %v1572_v37 }
 0xc63   : > { %8915 = vpow2.f32 %v7107_v7  ;;  %v7106_v57 = vmul.f32 -1.442695, %v1655_v56 }
 0xc65   : > { %8917 = vpow2.f32 %v7106_v57 }
 0xc70   : > { %v8916_v59 = vpop.eup %8915 }
 0xc71   : > { %v1664_v58 = vadd.f32 1.0, %v8916_v59 }
 0xc72   : > { %v8918_v43 = vpop.eup %8917 }
 0xc73   : > { %8919 = vrcp.f32 %v1664_v58  ;;  %v1663_v8 = vadd.f32 1.0, %v8918_v43 }
 0xc75   : > { %8921 = vrcp.f32 %v1663_v8 }
 0xc80   : > { %v8920_v52 = vpop.eup %8919 }
 0xc81   : > { %v1678_v63 = vmul.f32 %v8920_v52, %v1674_v61  ;;  %v1692_v3 = vsub.f32 1.0, %v8920_v52  ;;  %v1704_v35 = vmul.f32 %v8920_v52, %v9676_v30 }
 0xc82   : > { %v8922_v9 = vpop.eup %8921 }
 0xc83   : > { %1683 = vrot.lane.b32.xlu0 %v1678_v63, %s9273_s18  ;;  %v1677_v32 = vmul.f32 %v8922_v9, %v1672_v54  ;;  %v1691_v56 = vsub.f32 1.0, %v8922_v9 }
 0xc85   : > { %1681 = vrot.lane.b32.xlu1 %v1677_v32, %s9273_s18 }
 0xcf5   : > { %v1684_v49 = vpop.permute.xlu0 %1683 }
 0xcf6   : > { %v1688_v46 = vadd.f32 %v1684_v49, %v1577_v4  ;;  %v1703_v4 = vmul.f32 %v8922_v9, %v9672_v1 }
 0xcf7   : > { %v1682_v0 = vpop.permute.xlu1 %1681 }
 0xcf8   : > { %8923 = vtanh.f32 %v1688_v46  ;;  %v1687_v26 = vadd.f32 %v1682_v0, %v1572_v37 }
 0xcfa   : > { %8925 = vtanh.f32 %v1687_v26 }
 0xd05   : > { %v8924_v2 = vpop.eup %8923 }
 0xd06   : > { %1697 = vrot.lane.b32.xlu0 %v8924_v2, %s9276_s27 }
 0xd07   : > { %v8926_v25 = vpop.eup %8925 }
 0xd08   : > { %1695 = vrot.lane.b32.xlu1 %v8926_v25, %s9276_s27 }
 0xd78   : > { %v1698_v22 = vpop.permute.xlu0 %1697 }
 0xd79   : > { %v1702_v7 = vmul.f32 %v1698_v22, %v1692_v3 }
 0xd7a   : > { %v1696_v57 = vpop.permute.xlu1 %1695 }
 0xd7b   : > { %v9799_v59 = vadd.f32 %v1704_v35, %v1702_v7  ;;  %v1701_v58 = vmul.f32 %v1696_v57, %v1691_v56 }
 0xd7d   : > { %v9802_v37 = vadd.f32 %v1703_v4, %v1701_v58  ;;  %1711 = vrot.lane.b32.xlu0 %v9799_v59, %s9276_s27 }
 0xd7f   : > { %1709 = vrot.lane.b32.xlu1 %v9802_v37, %s9276_s27 }
 0xdef   : > { %v9810_v8 = vpop.permute.xlu0 %1711 }
 0xdf1   : > { %v9808_v43 = vpop.permute.xlu1 %1709 }
 0xdf2   : > { %8020 = vmatprep.mubr.msk.f32.mxu1 %vm431_vm3, %v9808_v43 }
 0xdf3   : > { %8021 = vmatmul.mubr.msk.f32.vlgmr.msra.gmra.mxu1 %vm431_vm3, %v9810_v8 }
 0xdf4   : > { %8034 = vmatpush3.msra.mxu1 %v9499_v28 }
 0xdf5   : > { %8035 = vmatprep.subr.mxu1 %v9501_v29 }
 0xdf6   : > { %8036 = vmatpush3.msra.mxu1 %v9501_v29 }
 0xdf7   : > { %8037 = vmatprep.subr.mxu1 %v9507_v33 }
 0xdf8   : > { %8038 = vmatpush3.msra.mxu1 %v9507_v33 }
 0xdf9   : > { %8039 = vmatprep.subr.mxu1 %v9511_v34 }
 0xdfa   : > { %8040 = vmatpush3.msra.mxu1 %v9511_v34 }
 0xdfb   : > { %8041 = vmatprep.subr.mxu1 %v9515_v36 }
 0xdfc   : > { %8042 = vmatpush3.msra.mxu1 %v9515_v36 }
 0xdfd   : > { %8043 = vmatprep.subr.mxu1 %v9519_v38 }
 0xdfe   : > { %8044 = vmatpush3.msra.mxu1 %v9519_v38 }
 0xdff   : > { %8045 = vmatprep.subr.mxu1 %v9523_v40 }
 0xe00   : > { %8046 = vmatpush3.msra.mxu1 %v9523_v40 }
 0xe01   : > { %8047 = vmatprep.subr.mxu1 %v9527_v42 }
 0xe02   : > { %8048 = vmatpush3.msra.mxu1 %v9527_v42 }
 0xe03   : > { %8077 = vmatprep.subr.bf16.mxu1 %v10962_v39 }
 0xeb3   : > { %v8022_v28 = vpop.f32.mrf.mxu1 }
 0xeb5   : > { %v1783_v29 = vpop.f32.mrf.mxu1 }
 0xeb6   : > { %v1792_v33 = vpack.c.bf16 %v8022_v28, %v1783_v29 }
 0xeb8   : > { %8023 = vmatprep.subr.bf16.mxu0 %v1792_v33 }
 0xeb9   : > { %8024 = vmatpush3.bf16.msra.mxu0 %v1792_v33 }
 0xeba   : > { %8055 = vmatprep.subr.mxu0 %v9534_v47 }
 0xebc   : > { %8026 = vmatmul.mubr.msk.bf16.vlgmr.msra.gmra.mxu0 %vm514_vm4, %v9485_v23 }
 0xebd   : > { %8029 = vmatprep.mubr.msk.bf16.mxu0 %vm514_vm4, %v9487_v24  ;;  %8056 = vmatpush3.msra.mxu0 %v9534_v47 }
 0xebe   : > { %8057 = vmatprep.subr.mxu0 %v9536_v48 }
 0xebf   : > { %8058 = vmatpush3.msra.mxu0 %v9536_v48 }
 0xec0   : > { %8059 = vmatprep.subr.mxu0 %v9541_v50 }
 0xec1   : > { %8060 = vmatpush3.msra.mxu0 %v9541_v50 }
 0xec2   : > { %8061 = vmatprep.subr.mxu0 %v9546_v51 }
 0xec3   : > { %8062 = vmatpush3.msra.mxu0 %v9546_v51 }
 0xec4   : > { %8030 = vmatmul.mubr.msk.bf16.gmra.mxu0 %vm514_vm4, %v9495_v27  ;;  %8063 = vmatprep.subr.mxu0 %v9568_v16 }
 0xec5   : > { %8064 = vmatpush3.msra.mxu0 %v9568_v16 }
 0xec6   : > { %8065 = vmatprep.subr.mxu0 %v9572_v17 }
 0xec7   : > { %8066 = vmatpush3.msra.mxu0 %v9572_v17 }
 0xec8   : > { %8067 = vmatprep.subr.mxu0 %v9576_v18 }
 0xec9   : > { %8068 = vmatpush3.msra.mxu0 %v9576_v18 }
 0xeca   : > { %8069 = vmatprep.subr.mxu0 %v9580_v19 }
 0xecb   : > { %8070 = vmatpush3.msra.mxu0 %v9580_v19 }
 0xecc   : > { %8085 = vmatprep.subr.mxu0 %v9596_v44 }
 0xf7c   : > { %v8027_v34 = vpop.f32.mrf.mxu0 }
 0xf7e   : > { %v1827_v36 = vpop.f32.mrf.mxu0 }
 0xf80   : > { %v8028_v38 = vpop.f32.mrf.mxu0 }
 0xf82   : > { %v1830_v40 = vpop.f32.mrf.mxu0 }
 0xf84   : > { %v8031_v42 = vpop.f32.mrf.mxu0 }
 0xf86   : > { %v1843_v47 = vpop.f32.mrf.mxu0 }
 0xf87   : > { %1862 = vrot.lane.b32.xlu1 %v1843_v47, %s9273_s18 }
 0xf88   : > { %v8032_v48 = vpop.f32.mrf.mxu0 }
 0xf8a   : > { %v1846_v50 = vpop.f32.mrf.mxu0 }
 0xf8b   : > { %1866 = vrot.lane.b32.xlu1 %v8031_v42, %s9273_s18  ;;  %1864 = vrot.lane.b32.xlu0 %v1846_v50, %s9273_s18  ;;  %v9916_v42 = vld [vmem:[#allocation5 + $0x8] sm:$0xff]  ;;  %v9922_v50 = vld [vmem:[#allocation5] sm:$0xff] }
 0xf8f   : > { %1868 = vrot.lane.b32.xlu0 %v8032_v48, %s9273_s18 }
 0xff9   : > { %v1863_v51 = vpop.permute.xlu1 %1862 }
 0xffa   : > { %v1874_v16 = vadd.f32 %v1863_v51, %v1827_v36  ;;  %v9927_v51 = vld [vmem:[#allocation5 + $0x60] sm:$0xff] }
 0xffc   : > { %v1878_v17 = vadd.f32 %v1874_v16, %v9552_v55 }
 0xffd   : > { %v1867_v18 = vpop.permute.xlu1 %1866  ;;  %v1865_v19 = vpop.permute.xlu0 %1864 }
 0xffe   : > { %v1882_v1 = vmax.f32 %v1878_v17, 0.0  ;;  %v1876_v30 = vadd.f32 %v8027_v34, %v1867_v18  ;;  %v1875_v52 = vadd.f32 %v1865_v19, %v1830_v40 }
0x1000   : > { %v1880_v61 = vadd.f32 %v1876_v30, %v9555_v60  ;;  %v1879_v63 = vadd.f32 %v1875_v52, %v9557_v62  ;;  %8049 = vmatprep.mubr.msk.f32.mxu1 %vm620_vm5, %v1882_v1 }
0x1001   : > { %v1869_v9 = vpop.permute.xlu0 %1868 }
0x1002   : > { %v1884_v54 = vmax.f32 %v1880_v61, 0.0  ;;  %v1883_v32 = vmax.f32 %v1879_v63, 0.0  ;;  %v1877_v49 = vadd.f32 %v8028_v38, %v1869_v9 }
0x1004   : > { %v1881_v46 = vadd.f32 %v1877_v49, %v9560_v6  ;;  %8050 = vmatmul.mubr.msk.f32.vlgmr.msra.gmra.mxu1 %vm620_vm5, %v1883_v32 }
0x1005   : > { %8052 = vmatprep.mubr.msk.f32.mxu1 %vm620_vm5, %v1884_v54 }
0x1006   : > { %v1885_v0 = vmax.f32 %v1881_v46, 0.0 }
0x1008   : > { %8053 = vmatmul.mubr.msk.f32.gmra.mxu1 %vm620_vm5, %v1885_v0 }
0x1009   : > { %8081 = vmatprep.mubr.msk.bf16.mxu1 %vm9274_vm6, %v10962_v39 }
0x10c4   : > { %v8051_v26 = vpop.f32.mrf.mxu1 }
0x10c5   : > { %v1970_v2 = vadd.f32 %v8051_v26, %v9584_v20 }
0x10c6   : > { %v1964_v25 = vpop.f32.mrf.mxu1 }
0x10c7   : > { %v1965_v3 = vadd.f32 %v9584_v20, %v1964_v25  ;;  %v1984_v7 = vmax.f32 %v1970_v2, 0.0 }
0x10c8   : > { %v8054_v22 = vpop.f32.mrf.mxu1 }
0x10c9   : > { %v1983_v35 = vmax.f32 %v1965_v3, 0.0  ;;  %v1980_v56 = vadd.f32 %v8054_v22, %v9584_v20 }
0x10ca   : > { %v1974_v57 = vpop.f32.mrf.mxu1 }
0x10cb   : > { %v1975_v4 = vadd.f32 %v9584_v20, %v1974_v57  ;;  %8071 = vmatprep.mubr.msk.f32.mxu0 %vm620_vm5, %v1983_v35  ;;  %v1986_v28 = vmax.f32 %v1980_v56, 0.0  ;;  %v9884_v20 = vld [vmem:[#allocation5 + $0x18] sm:$0xff] }
0x10cc   : > { %8072 = vmatmul.mubr.msk.f32.vlgmr.msra.gmra.mxu0 %vm620_vm5, %v1984_v7 }
0x10cd   : > { %v1985_v58 = vmax.f32 %v1975_v4, 0.0  ;;  %8086 = vmatpush3.msra.mxu0 %v9596_v44 }
0x10ce   : > { %8087 = vmatprep.subr.mxu0 %v9598_v45 }
0x10cf   : > { %8074 = vmatprep.mubr.msk.f32.mxu0 %vm620_vm5, %v1985_v58  ;;  %8088 = vmatpush3.msra.mxu0 %v9598_v45 }
0x10d0   : > { %8075 = vmatmul.mubr.msk.f32.gmra.mxu0 %vm620_vm5, %v1986_v28  ;;  %8089 = vmatprep.subr.mxu0 %v9638_v14 }
0x10d1   : > { %8090 = vmatpush3.msra.mxu0 %v9638_v14 }
0x10d2   : > { %8091 = vmatprep.subr.mxu0 %v9642_v21 }
0x10d3   : > { %8092 = vmatpush3.msra.mxu0 %v9642_v21 }
0x10d4   : > { %8107 = vmatprep.subr.mxu0 %v9884_v20 }
0x118c   : > { %v8073_v44 = vpop.f32.mrf.mxu0 }
0x118d   : > { %v2071_v14 = vadd.f32 %v8073_v44, %v9604_v53 }
0x118e   : > { %v2065_v29 = vpop.f32.mrf.mxu0 }
0x118f   : > { %v2066_v38 = vadd.f32 %v9604_v53, %v2065_v29 }
0x1190   : > { %v8076_v33 = vpop.f32.mrf.mxu0 }
0x1191   : > { %v2081_v45 = vadd.f32 %v8076_v33, %v9604_v53  ;;  %v2084_v21 = vpack.c.bf16 %v2071_v14, %v2066_v38  ;;  %v9967_v14 = vld [vmem:[#allocation5 + $0x40] sm:$0xff] }
0x1192   : > { %v2075_v34 = vpop.f32.mrf.mxu0 }
0x1193   : > { %v2076_v36 = vadd.f32 %v9604_v53, %v2075_v34 }
0x1195   : > { %v2085_v40 = vpack.c.bf16 %v2081_v45, %v2076_v36 }
0x1197   : > { %8078 = vmatpush3.bf16.msra.mxu1 %v2085_v40  ;;  %v9963_v40 = vld [vmem:[#allocation5 + $0x48] sm:$0xff] }
0x1198   : > { %8079 = vmatprep.subr.bf16.mxu1 %v10962_v39 }
0x119b   : > { %8080 = vmatpush3.bf16.msra.mxu1 %v2084_v21  ;;  %v9971_v21 = vld [vmem:[#allocation5 + $0x38] sm:$0xff] }
0x119c   : > { %8096 = vmatprep.subr.mxu1 %v9613_v5 }
0x119e   : > { %8082 = vmatmul.mubr.msk.bf16.vlgmr.msra.gmra.mxu1 %vm431_vm3, %v9615_v10 }
0x119f   : > { %8097 = vmatpush3.msra.mxu1 %v9613_v5  ;;  %8104 = vmatprep.mubr.msk.f32.mxu1 %vm431_vm3, %v9808_v43 }
0x11a0   : > { %8098 = vmatprep.subr.mxu1 %v9618_v11 }
0x11a1   : > { %8099 = vmatpush3.msra.mxu1 %v9618_v11 }
0x11a2   : > { %8100 = vmatprep.subr.mxu1 %v9623_v12 }
0x11a3   : > { %8101 = vmatpush3.msra.mxu1 %v9623_v12  ;;  %v9911_v12 = vld [vmem:[#allocation5 + $0x10] sm:$0xff] }
0x11a4   : > { %8102 = vmatprep.subr.mxu1 %v9628_v13 }
0x11a5   : > { %8103 = vmatpush3.msra.mxu1 %v9628_v13 }
0x11a6   : > { %8105 = vmatmul.mubr.msk.f32.vlgmr.msra.gmra.mxu1 %vm431_vm3, %v9810_v8 }
0x11a7   : > { %8120 = vmatprep.mubr.msk.bf16.mxu1 %vm514_vm4, %v9477_v15 }
0x125e   : > { %v2120_v53 = vpop.f32.mrf.mxu1 }
0x125f   : > { %8093 = vmatprep.mubr.msk.f32.mxu0 %vm431_vm3, %v2120_v53  ;;  %v9975_v53 = vld [vmem:[#allocation5 + $0x30] sm:$0xff] }
0x1260   : > { %v8083_v5 = vpop.f32.mrf.mxu1 }
0x1261   : > { %v9979_v5 = vld [vmem:[#allocation5 + $0x28] sm:$0xff] }
0x1262   : > { %v2123_v43 = vpop.f32.mrf.mxu1 }
0x1263   : > { %8094 = vmatmul.mubr.msk.f32.vlgmr.msra.gmra.mxu0 %vm431_vm3, %v2123_v43 }
0x1264   : > { %v8084_v11 = vpop.f32.mrf.mxu1  ;;  %8108 = vmatpush3.msra.mxu0 %v9884_v20 }
0x1265   : > { %8109 = vmatprep.subr.mxu0 %v9911_v12 }
0x1266   : > { %v8106_v13 = vpop.f32.mrf.mxu1  ;;  %8110 = vmatpush3.msra.mxu0 %v9911_v12 }
0x1267   : > { %v2280_v8 = vadd.f32 %v8106_v13, %v9649_v31  ;;  %8111 = vmatprep.subr.mxu0 %v9916_v42 }
0x1268   : > { %v2274_v47 = vpop.f32.mrf.mxu1  ;;  %8112 = vmatpush3.msra.mxu0 %v9916_v42 }
0x1269   : > { %v2275_v48 = vadd.f32 %v9649_v31, %v2274_v47  ;;  %2301 = vrot.lane.b32.xlu0 %v2280_v8, %s9273_s18  ;;  %8113 = vmatprep.subr.mxu0 %v9922_v50  ;;  %v9992_v47 = vld [vmem:[#allocation5 + $0x98] sm:$0xff] }
0x126a   : > { %8114 = vmatpush3.msra.mxu0 %v9922_v50 }
0x126b   : > { %2299 = vrot.lane.b32.xlu1 %v2275_v48, %s9273_s18  ;;  %8128 = vmatprep.subr.mxu0 %v9927_v51 }
0x12db   : > { %v2302_v49 = vpop.permute.xlu0 %2301 }
0x12dd   : > { %v2300_v26 = vpop.permute.xlu1 %2299 }
0x1323   : > { %v8095_v16 = vpop.f32.mrf.mxu0 }
0x1324   : > { %v2205_v17 = vadd.f32 %v8095_v16, %v9663_v41  ;;  %v10000_v16 = vld [vmem:[#allocation5 + $0x88] sm:$0xff] }
0x1325   : > { %v2199_v18 = vpop.f32.mrf.mxu0 }
0x1326   : > { %v2284_v19 = vadd.f32 %v2280_v8, %v2205_v17  ;;  %v2200_v31 = vadd.f32 %v9663_v41, %v2199_v18  ;;  %v9984_v8 = vld [vmem:[#allocation5 + $0xa0] sm:$0xff]  ;;  %v10010_v18 = vld [vmem:[#allocation5 + $0x78] sm:$0xff] }
0x1328   : > { %v7128_v1 = vmul.f32 -1.442695, %v2284_v19  ;;  %v2283_v30 = vadd.f32 %v2275_v48, %v2200_v31  ;;  %v9996_v48 = vld [vmem:[#allocation5 + $0x90] sm:$0xff] }
0x1329   : > { %v10014_v19 = vld [vmem:[#allocation5 + $0x70] sm:$0xff] }
0x132a   : > { %8927 = vpow2.f32 %v7128_v1  ;;  %v7127_v52 = vmul.f32 -1.442695, %v2283_v30  ;;  %v10022_v1 = vld [vmem:[#allocation5 + $0xc0] sm:$0xff] }
0x132c   : > { %8929 = vpow2.f32 %v7127_v52 }
0x1337   : > { %v8928_v61 = vpop.eup %8927 }
0x1338   : > { %v2292_v63 = vadd.f32 1.0, %v8928_v61 }
0x1339   : > { %v8930_v9 = vpop.eup %8929 }
0x133a   : > { %8931 = vrcp.f32 %v2292_v63  ;;  %v2291_v54 = vadd.f32 1.0, %v8930_v9 }
0x133c   : > { %8933 = vrcp.f32 %v2291_v54 }
0x1347   : > { %v8932_v32 = vpop.eup %8931 }
0x1348   : > { %v2306_v46 = vmul.f32 %v8932_v32, %v2302_v49  ;;  %v2320_v56 = vsub.f32 1.0, %v8932_v32  ;;  %v2332_v4 = vmul.f32 %v8932_v32, %v9799_v59  ;;  %v9955_v59 = vld [vmem:[#allocation5 + $0x58] sm:$0xff] }
0x1349   : > { %v8934_v0 = vpop.eup %8933 }
0x134a   : > { %2311 = vrot.lane.b32.xlu0 %v2306_v46, %s9273_s18  ;;  %v2305_v2 = vmul.f32 %v8934_v0, %v2300_v26  ;;  %v2319_v28 = vsub.f32 1.0, %v8934_v0  ;;  %v2331_v33 = vmul.f32 %v8934_v0, %v9802_v37  ;;  %v9959_v37 = vld [vmem:[#allocation5 + $0x50] sm:$0xff] }
0x134c   : > { %2309 = vrot.lane.b32.xlu1 %v2305_v2, %s9273_s18 }
0x13bc   : > { %v2312_v41 = vpop.permute.xlu0 %2311 }
0x13bd   : > { %v2316_v25 = vadd.f32 %v2312_v41, %v2205_v17  ;;  %v10006_v17 = vld [vmem:[#allocation5 + $0x80] sm:$0xff] }
0x13be   : > { %v2310_v3 = vpop.permute.xlu1 %2309 }
0x13bf   : > { %8935 = vtanh.f32 %v2316_v25  ;;  %v2315_v22 = vadd.f32 %v2310_v3, %v2200_v31  ;;  %v10018_v31 = vld [vmem:[#allocation5 + $0x68] sm:$0xff] }
0x13c0   : > { %10963 = vst [vmem:[#allocation12_spill] sm:$0xff] %v10018_v31 }
0x13c1   : > { %8937 = vtanh.f32 %v2315_v22 }
0x13cc   : > { %v8936_v35 = vpop.eup %8935 }
0x13cd   : > { %2325 = vrot.lane.b32.xlu0 %v8936_v35, %s9276_s27 }
0x13ce   : > { %v8938_v7 = vpop.eup %8937 }
0x13cf   : > { %2323 = vrot.lane.b32.xlu1 %v8938_v7, %s9276_s27 }
0x143f   : > { %v2326_v57 = vpop.permute.xlu0 %2325 }
0x1440   : > { %v2330_v58 = vmul.f32 %v2326_v57, %v2320_v56 }
0x1441   : > { %v2324_v44 = vpop.permute.xlu1 %2323 }
0x1442   : > { %v9937_v29 = vadd.f32 %v2332_v4, %v2330_v58  ;;  %v2329_v34 = vmul.f32 %v2324_v44, %v2319_v28 }
0x1444   : > { %v9940_v45 = vadd.f32 %v2331_v33, %v2329_v34  ;;  %2339 = vrot.lane.b32.xlu0 %v9937_v29, %s9276_s27  ;;  %v10039_v34 = vld [vmem:[#allocation7 + $0x1] ss:$0 sm:$0xff] }
0x1446   : > { %2337 = vrot.lane.b32.xlu1 %v9940_v45, %s9276_s27 }
0x14b6   : > { %v9948_v38 = vpop.permute.xlu0 %2339 }
0x14b8   : > { %v9946_v36 = vpop.permute.xlu1 %2337 }
0x14b9   : > { %8115 = vmatprep.mubr.msk.f32.mxu0 %vm431_vm3, %v9946_v36 }
0x14ba   : > { %8116 = vmatmul.mubr.msk.f32.vlgmr.msra.gmra.mxu0 %vm431_vm3, %v9948_v38 }
0x14bb   : > { %8129 = vmatpush3.msra.mxu0 %v9927_v51 }
0x14bc   : > { %8130 = vmatprep.subr.mxu0 %v9955_v59 }
0x14bd   : > { %8131 = vmatpush3.msra.mxu0 %v9955_v59 }
0x14be   : > { %8132 = vmatprep.subr.mxu0 %v9959_v37 }
0x14bf   : > { %8133 = vmatpush3.msra.mxu0 %v9959_v37 }
0x14c0   : > { %8134 = vmatprep.subr.mxu0 %v9963_v40 }
0x14c1   : > { %8135 = vmatpush3.msra.mxu0 %v9963_v40 }
0x14c2   : > { %8136 = vmatprep.subr.mxu0 %v9967_v14 }
0x14c3   : > { %8137 = vmatpush3.msra.mxu0 %v9967_v14 }
0x14c4   : > { %8138 = vmatprep.subr.mxu0 %v9971_v21 }
0x14c5   : > { %8139 = vmatpush3.msra.mxu0 %v9971_v21 }
0x14c6   : > { %8140 = vmatprep.subr.mxu0 %v9975_v53 }
0x14c7   : > { %8141 = vmatpush3.msra.mxu0 %v9975_v53 }
0x14c8   : > { %8142 = vmatprep.subr.mxu0 %v9979_v5 }
0x14c9   : > { %8143 = vmatpush3.msra.mxu0 %v9979_v5 }
0x14ca   : > { %8172 = vmatprep.subr.bf16.mxu0 %v10962_v39 }
0x157a   : > { %v8117_v43 = vpop.f32.mrf.mxu0 }
0x157c   : > { %v2411_v11 = vpop.f32.mrf.mxu0 }
0x157d   : > { %v2420_v13 = vpack.c.bf16 %v8117_v43, %v2411_v11 }
0x157f   : > { %8118 = vmatprep.subr.bf16.mxu1 %v2420_v13 }
0x1580   : > { %8119 = vmatpush3.bf16.msra.mxu1 %v2420_v13 }
0x1581   : > { %8150 = vmatprep.subr.mxu1 %v9984_v8 }
0x1583   : > { %8121 = vmatmul.mubr.msk.bf16.vlgmr.msra.gmra.mxu1 %vm514_vm4, %v9485_v23 }
0x1584   : > { %8124 = vmatprep.mubr.msk.bf16.mxu1 %vm514_vm4, %v9487_v24  ;;  %8151 = vmatpush3.msra.mxu1 %v9984_v8 }
0x1585   : > { %8152 = vmatprep.subr.mxu1 %v9992_v47 }
0x1586   : > { %8153 = vmatpush3.msra.mxu1 %v9992_v47 }
0x1587   : > { %8154 = vmatprep.subr.mxu1 %v9996_v48 }
0x1588   : > { %8155 = vmatpush3.msra.mxu1 %v9996_v48 }
0x1589   : > { %8156 = vmatprep.subr.mxu1 %v10000_v16 }
0x158a   : > { %8157 = vmatpush3.msra.mxu1 %v10000_v16 }
0x158b   : > { %8125 = vmatmul.mubr.msk.bf16.gmra.mxu1 %vm514_vm4, %v9495_v27  ;;  %8158 = vmatprep.subr.mxu1 %v10006_v17 }
0x158c   : > { %8159 = vmatpush3.msra.mxu1 %v10006_v17 }
0x158d   : > { %8160 = vmatprep.subr.mxu1 %v10010_v18 }
0x158e   : > { %8161 = vmatpush3.msra.mxu1 %v10010_v18 }
0x158f   : > { %8162 = vmatprep.subr.mxu1 %v10014_v19 }
0x1590   : > { %8163 = vmatpush3.msra.mxu1 %v10014_v19 }
0x1591   : > { %8164 = vmatprep.subr.mxu1 %v10018_v31 }
0x1592   : > { %8165 = vmatpush3.msra.mxu1 %v10018_v31 }
0x1593   : > { %8180 = vmatprep.subr.mxu1 %v10022_v1 }
0x1643   : > { %v8122_v30 = vpop.f32.mrf.mxu1 }
0x1645   : > { %v2455_v52 = vpop.f32.mrf.mxu1 }
0x1647   : > { %v8123_v61 = vpop.f32.mrf.mxu1 }
0x1649   : > { %v2458_v63 = vpop.f32.mrf.mxu1 }
0x164b   : > { %v8126_v9 = vpop.f32.mrf.mxu1 }
0x164d   : > { %v2471_v54 = vpop.f32.mrf.mxu1 }
0x164e   : > { %2490 = vrot.lane.b32.xlu1 %v2471_v54, %s9273_s18 }
0x164f   : > { %v8127_v32 = vpop.f32.mrf.mxu1 }
0x1651   : > { %v2474_v49 = vpop.f32.mrf.mxu1 }
0x1652   : > { %2494 = vrot.lane.b32.xlu1 %v8126_v9, %s9273_s18  ;;  %2492 = vrot.lane.b32.xlu0 %v2474_v49, %s9273_s18 }
0x1656   : > { %2496 = vrot.lane.b32.xlu0 %v8127_v32, %s9273_s18 }
0x16c0   : > { %v2491_v46 = vpop.permute.xlu1 %2490 }
0x16c1   : > { %v2502_v0 = vadd.f32 %v2491_v46, %v2455_v52  ;;  %v10048_v46 = vld [vmem:[#allocation5 + $0xb8] sm:$0xff] }
0x16c3   : > { %v2506_v26 = vadd.f32 %v2502_v0, %v9552_v55  ;;  %v10054_v0 = vld [vmem:[#allocation5 + $0xb0] sm:$0xff] }
0x16c4   : > { %v2495_v2 = vpop.permute.xlu1 %2494  ;;  %v2493_v41 = vpop.permute.xlu0 %2492 }
0x16c5   : > { %v2510_v25 = vmax.f32 %v2506_v26, 0.0  ;;  %v2504_v3 = vadd.f32 %v8122_v30, %v2495_v2  ;;  %v2503_v22 = vadd.f32 %v2493_v41, %v2458_v63  ;;  %v10058_v26 = vld [vmem:[#allocation5 + $0xa8] sm:$0xff] }
0x16c7   : > { %v2508_v35 = vadd.f32 %v2504_v3, %v9555_v60  ;;  %v2507_v7 = vadd.f32 %v2503_v22, %v9557_v62  ;;  %8144 = vmatprep.mubr.msk.f32.mxu0 %vm620_vm5, %v2510_v25  ;;  %v10063_v22 = vld [vmem:[#allocation7 + $0x2] ss:$0 sm:$0xff] }
0x16c8   : > { %v2497_v56 = vpop.permute.xlu0 %2496 }
0x16c9   : > { %v2512_v57 = vmax.f32 %v2508_v35, 0.0  ;;  %v2511_v4 = vmax.f32 %v2507_v7, 0.0  ;;  %v2505_v58 = vadd.f32 %v8123_v61, %v2497_v56 }
0x16cb   : > { %v2509_v28 = vadd.f32 %v2505_v58, %v9560_v6  ;;  %8145 = vmatmul.mubr.msk.f32.vlgmr.msra.gmra.mxu0 %vm620_vm5, %v2511_v4 }
0x16cc   : > { %8147 = vmatprep.mubr.msk.f32.mxu0 %vm620_vm5, %v2512_v57 }
0x16cd   : > { %v2513_v44 = vmax.f32 %v2509_v28, 0.0  ;;  %v10070_v28 = vld [vmem:[#allocation5 + $0xe0] sm:$0xff] }
0x16cf   : > { %8148 = vmatmul.mubr.msk.f32.gmra.mxu0 %vm620_vm5, %v2513_v44  ;;  %v10078_v44 = vld [vmem:[#allocation5 + $0xd8] sm:$0xff] }
0x16d0   : > { %8176 = vmatprep.mubr.msk.bf16.mxu0 %vm9274_vm6, %v10962_v39 }
0x178b   : > { %v8146_v33 = vpop.f32.mrf.mxu0 }
0x178c   : > { %v2598_v43 = vadd.f32 %v10039_v34, %v8146_v33  ;;  %v10082_v33 = vld [vmem:[#allocation5 + $0xd0] sm:$0xff] }
0x178d   : > { %v2592_v11 = vpop.f32.mrf.mxu0 }
0x178e   : > { %v2593_v13 = vadd.f32 %v10039_v34, %v2592_v11  ;;  %v2612_v61 = vmax.f32 %v2598_v43, 0.0  ;;  %v10086_v43 = vld [vmem:[#allocation5 + $0xc8] sm:$0xff] }
0x178f   : > { %v8149_v30 = vpop.f32.mrf.mxu0 }
0x1790   : > { %v2611_v52 = vmax.f32 %v2593_v13, 0.0  ;;  %v2608_v63 = vadd.f32 %v10039_v34, %v8149_v30 }
0x1791   : > { %v2602_v9 = vpop.f32.mrf.mxu0 }
0x1792   : > { %v2603_v54 = vadd.f32 %v10039_v34, %v2602_v9  ;;  %8166 = vmatprep.mubr.msk.f32.mxu1 %vm620_vm5, %v2611_v52  ;;  %v2614_v49 = vmax.f32 %v2608_v63, 0.0 }
0x1793   : > { %8167 = vmatmul.mubr.msk.f32.vlgmr.msra.gmra.mxu1 %vm620_vm5, %v2612_v61  ;;  %v10099_v61 = vld [vmem:[#allocation7 + $0x4] ss:$0 sm:$0xff] }
0x1794   : > { %v2613_v32 = vmax.f32 %v2603_v54, 0.0  ;;  %8181 = vmatpush3.msra.mxu1 %v10022_v1 }
0x1795   : > { %8182 = vmatprep.subr.mxu1 %v10048_v46 }
0x1796   : > { %8169 = vmatprep.mubr.msk.f32.mxu1 %vm620_vm5, %v2613_v32  ;;  %8183 = vmatpush3.msra.mxu1 %v10048_v46  ;;  %v10110_v32 = vld [vmem:[#allocation7 + $0x3] ss:$0 sm:$0xff] }
0x1797   : > { %8170 = vmatmul.mubr.msk.f32.gmra.mxu1 %vm620_vm5, %v2614_v49  ;;  %8184 = vmatprep.subr.mxu1 %v10054_v0 }
0x1798   : > { %8185 = vmatpush3.msra.mxu1 %v10054_v0 }
0x1799   : > { %8186 = vmatprep.subr.mxu1 %v10058_v26 }
0x179a   : > { %8187 = vmatpush3.msra.mxu1 %v10058_v26 }
0x179b   : > { %8202 = vmatprep.subr.mxu1 %v9884_v20 }
0x1853   : > { %v8168_v2 = vpop.f32.mrf.mxu1 }
0x1854   : > { %v2699_v4 = vadd.f32 %v10063_v22, %v8168_v2 }
0x1855   : > { %v2693_v41 = vpop.f32.mrf.mxu1 }
0x1856   : > { %v2694_v56 = vadd.f32 %v10063_v22, %v2693_v41 }
0x1857   : > { %v8171_v25 = vpop.f32.mrf.mxu1 }
0x1858   : > { %v2709_v35 = vadd.f32 %v10063_v22, %v8171_v25  ;;  %v2712_v58 = vpack.c.bf16 %v2699_v4, %v2694_v56 }
0x1859   : > { %v2703_v3 = vpop.f32.mrf.mxu1 }
0x185a   : > { %v2704_v7 = vadd.f32 %v10063_v22, %v2703_v3 }
0x185c   : > { %v2713_v57 = vpack.c.bf16 %v2709_v35, %v2704_v7 }
0x185e   : > { %8173 = vmatpush3.bf16.msra.mxu0 %v2713_v57 }
0x185f   : > { %8174 = vmatprep.subr.bf16.mxu0 %v10962_v39 }
0x1862   : > { %8175 = vmatpush3.bf16.msra.mxu0 %v2712_v58 }
0x1863   : > { %8191 = vmatprep.subr.mxu0 %v10070_v28 }
0x1865   : > { %8177 = vmatmul.mubr.msk.bf16.vlgmr.msra.gmra.mxu0 %vm431_vm3, %v9615_v10 }
0x1866   : > { %8192 = vmatpush3.msra.mxu0 %v10070_v28  ;;  %8199 = vmatprep.mubr.msk.f32.mxu0 %vm431_vm3, %v9946_v36 }
0x1867   : > { %8193 = vmatprep.subr.mxu0 %v10078_v44 }
0x1868   : > { %8194 = vmatpush3.msra.mxu0 %v10078_v44 }
0x1869   : > { %8195 = vmatprep.subr.mxu0 %v10082_v33 }
0x186a   : > { %8196 = vmatpush3.msra.mxu0 %v10082_v33 }
0x186b   : > { %8197 = vmatprep.subr.mxu0 %v10086_v43 }
0x186c   : > { %8198 = vmatpush3.msra.mxu0 %v10086_v43 }
0x186d   : > { %8200 = vmatmul.mubr.msk.f32.vlgmr.msra.gmra.mxu0 %vm431_vm3, %v9948_v38 }
0x186e   : > { %8215 = vmatprep.mubr.msk.bf16.mxu0 %vm514_vm4, %v9477_v15 }
0x1925   : > { %v2748_v36 = vpop.f32.mrf.mxu0 }
0x1926   : > { %8188 = vmatprep.mubr.msk.f32.mxu1 %vm431_vm3, %v2748_v36 }
0x1927   : > { %v8178_v11 = vpop.f32.mrf.mxu0 }
0x1929   : > { %v2751_v13 = vpop.f32.mrf.mxu0 }
0x192a   : > { %8189 = vmatmul.mubr.msk.f32.vlgmr.msra.gmra.mxu1 %vm431_vm3, %v2751_v13 }
0x192b   : > { %v8179_v30 = vpop.f32.mrf.mxu0  ;;  %8203 = vmatpush3.msra.mxu1 %v9884_v20 }
0x192c   : > { %8204 = vmatprep.subr.mxu1 %v9911_v12 }
0x192d   : > { %v8201_v52 = vpop.f32.mrf.mxu0  ;;  %8205 = vmatpush3.msra.mxu1 %v9911_v12 }
0x192e   : > { %v2908_v38 = vadd.f32 %v10099_v61, %v8201_v52  ;;  %8206 = vmatprep.subr.mxu1 %v9916_v42 }
0x192f   : > { %v2902_v63 = vpop.f32.mrf.mxu0  ;;  %8207 = vmatpush3.msra.mxu1 %v9916_v42 }
0x1930   : > { %v2903_v9 = vadd.f32 %v10099_v61, %v2902_v63  ;;  %2929 = vrot.lane.b32.xlu0 %v2908_v38, %s9273_s18  ;;  %8208 = vmatprep.subr.mxu1 %v9922_v50 }
0x1931   : > { %8209 = vmatpush3.msra.mxu1 %v9922_v50 }
0x1932   : > { %2927 = vrot.lane.b32.xlu1 %v2903_v9, %s9273_s18  ;;  %8223 = vmatprep.subr.mxu1 %v9927_v51 }
0x19a2   : > { %v2930_v11 = vpop.permute.xlu0 %2929 }
0x19a4   : > { %v2928_v52 = vpop.permute.xlu1 %2927 }
0x19ea   : > { %v8190_v54 = vpop.f32.mrf.mxu1 }
0x19eb   : > { %v2833_v49 = vadd.f32 %v10110_v32, %v8190_v54 }
0x19ec   : > { %v2827_v2 = vpop.f32.mrf.mxu1 }
0x19ed   : > { %v2912_v41 = vadd.f32 %v2908_v38, %v2833_v49  ;;  %v2828_v25 = vadd.f32 %v10110_v32, %v2827_v2 }
0x19ef   : > { %v7149_v3 = vmul.f32 -1.442695, %v2912_v41  ;;  %v2911_v35 = vadd.f32 %v2903_v9, %v2828_v25 }
0x19f1   : > { %8939 = vpow2.f32 %v7149_v3  ;;  %v7148_v7 = vmul.f32 -1.442695, %v2911_v35 }
0x19f3   : > { %8941 = vpow2.f32 %v7148_v7 }
0x19fe   : > { %v8940_v56 = vpop.eup %8939 }
0x19ff   : > { %v2920_v57 = vadd.f32 1.0, %v8940_v56 }
0x1a00   : > { %v8942_v4 = vpop.eup %8941 }
0x1a01   : > { %8943 = vrcp.f32 %v2920_v57  ;;  %v2919_v58 = vadd.f32 1.0, %v8942_v4 }
0x1a03   : > { %8945 = vrcp.f32 %v2919_v58 }
0x1a0e   : > { %v8944_v36 = vpop.eup %8943 }
0x1a0f   : > { %v2934_v13 = vmul.f32 %v8944_v36, %v2930_v11  ;;  %v2948_v35 = vsub.f32 1.0, %v8944_v36  ;;  %v2960_v56 = vmul.f32 %v8944_v36, %v9937_v29 }
0x1a10   : > { %v8946_v30 = vpop.eup %8945 }
0x1a11   : > { %2939 = vrot.lane.b32.xlu0 %v2934_v13, %s9273_s18  ;;  %v2933_v38 = vmul.f32 %v8946_v30, %v2928_v52  ;;  %v2947_v4 = vsub.f32 1.0, %v8946_v30 }
0x1a13   : > { %2937 = vrot.lane.b32.xlu1 %v2933_v38, %s9273_s18 }
0x1a83   : > { %v2940_v63 = vpop.permute.xlu0 %2939 }
0x1a84   : > { %v2944_v9 = vadd.f32 %v2940_v63, %v2833_v49  ;;  %v2959_v49 = vmul.f32 %v8946_v30, %v9940_v45 }
0x1a85   : > { %v2938_v54 = vpop.permute.xlu1 %2937 }
0x1a86   : > { %8947 = vtanh.f32 %v2944_v9  ;;  %v2943_v2 = vadd.f32 %v2938_v54, %v2828_v25 }
0x1a88   : > { %8949 = vtanh.f32 %v2943_v2 }
0x1a93   : > { %v8948_v41 = vpop.eup %8947 }
0x1a94   : > { %2953 = vrot.lane.b32.xlu0 %v8948_v41, %s9276_s27 }
0x1a95   : > { %v8950_v3 = vpop.eup %8949 }
0x1a96   : > { %2951 = vrot.lane.b32.xlu1 %v8950_v3, %s9276_s27 }
0x1b06   : > { %v2954_v7 = vpop.permute.xlu0 %2953 }
0x1b07   : > { %v2958_v57 = vmul.f32 %v2954_v7, %v2948_v35 }
0x1b08   : > { %v2952_v58 = vpop.permute.xlu1 %2951 }
0x1b09   : > { %v10119_v11 = vadd.f32 %v2960_v56, %v2958_v57  ;;  %v2957_v13 = vmul.f32 %v2952_v58, %v2947_v4 }
0x1b0b   : > { %v10122_v25 = vadd.f32 %v2959_v49, %v2957_v13  ;;  %2967 = vrot.lane.b32.xlu0 %v10119_v11, %s9276_s27 }
0x1b0d   : > { %2965 = vrot.lane.b32.xlu1 %v10122_v25, %s9276_s27 }
0x1b7d   : > { %v10130_v38 = vpop.permute.xlu0 %2967 }
0x1b7f   : > { %v10128_v52 = vpop.permute.xlu1 %2965 }
0x1b80   : > { %8210 = vmatprep.mubr.msk.f32.mxu1 %vm431_vm3, %v10128_v52 }
0x1b81   : > { %8211 = vmatmul.mubr.msk.f32.vlgmr.msra.gmra.mxu1 %vm431_vm3, %v10130_v38 }
0x1b82   : > { %8224 = vmatpush3.msra.mxu1 %v9927_v51 }
0x1b83   : > { %8225 = vmatprep.subr.mxu1 %v9955_v59 }
0x1b84   : > { %8226 = vmatpush3.msra.mxu1 %v9955_v59 }
0x1b85   : > { %8227 = vmatprep.subr.mxu1 %v9959_v37 }
0x1b86   : > { %8228 = vmatpush3.msra.mxu1 %v9959_v37 }
0x1b87   : > { %8229 = vmatprep.subr.mxu1 %v9963_v40 }
0x1b88   : > { %8230 = vmatpush3.msra.mxu1 %v9963_v40 }
0x1b89   : > { %8231 = vmatprep.subr.mxu1 %v9967_v14 }
0x1b8a   : > { %8232 = vmatpush3.msra.mxu1 %v9967_v14 }
0x1b8b   : > { %8233 = vmatprep.subr.mxu1 %v9971_v21 }
0x1b8c   : > { %8234 = vmatpush3.msra.mxu1 %v9971_v21 }
0x1b8d   : > { %8235 = vmatprep.subr.mxu1 %v9975_v53 }
0x1b8e   : > { %8236 = vmatpush3.msra.mxu1 %v9975_v53 }
0x1b8f   : > { %8237 = vmatprep.subr.mxu1 %v9979_v5 }
0x1b90   : > { %8238 = vmatpush3.msra.mxu1 %v9979_v5 }
0x1b91   : > { %8267 = vmatprep.subr.bf16.mxu1 %v10962_v39 }
0x1c41   : > { %v8212_v29 = vpop.f32.mrf.mxu1 }
0x1c43   : > { %v3039_v45 = vpop.f32.mrf.mxu1 }
0x1c44   : > { %v3048_v36 = vpack.c.bf16 %v8212_v29, %v3039_v45 }
0x1c46   : > { %8213 = vmatprep.subr.bf16.mxu0 %v3048_v36 }
0x1c47   : > { %8214 = vmatpush3.bf16.msra.mxu0 %v3048_v36 }
0x1c48   : > { %8245 = vmatprep.subr.mxu0 %v9984_v8 }
0x1c4a   : > { %8216 = vmatmul.mubr.msk.bf16.vlgmr.msra.gmra.mxu0 %vm514_vm4, %v9485_v23 }
0x1c4b   : > { %8219 = vmatprep.mubr.msk.bf16.mxu0 %vm514_vm4, %v9487_v24  ;;  %8246 = vmatpush3.msra.mxu0 %v9984_v8 }
0x1c4c   : > { %8247 = vmatprep.subr.mxu0 %v9992_v47 }
0x1c4d   : > { %8248 = vmatpush3.msra.mxu0 %v9992_v47 }
0x1c4e   : > { %8249 = vmatprep.subr.mxu0 %v9996_v48 }
0x1c4f   : > { %8250 = vmatpush3.msra.mxu0 %v9996_v48 }
0x1c50   : > { %8251 = vmatprep.subr.mxu0 %v10000_v16 }
0x1c51   : > { %8252 = vmatpush3.msra.mxu0 %v10000_v16 }
0x1c52   : > { %8220 = vmatmul.mubr.msk.bf16.gmra.mxu0 %vm514_vm4, %v9495_v27  ;;  %8253 = vmatprep.subr.mxu0 %v10006_v17 }
0x1c53   : > { %8254 = vmatpush3.msra.mxu0 %v10006_v17 }
0x1c54   : > { %8255 = vmatprep.subr.mxu0 %v10010_v18 }
0x1c55   : > { %8256 = vmatpush3.msra.mxu0 %v10010_v18 }
0x1c56   : > { %8257 = vmatprep.subr.mxu0 %v10014_v19 }
0x1c57   : > { %8258 = vmatpush3.msra.mxu0 %v10014_v19 }
0x1c58   : > { %8259 = vmatprep.subr.mxu0 %v10018_v31 }
0x1c59   : > { %8260 = vmatpush3.msra.mxu0 %v10018_v31 }
0x1c5a   : > { %8275 = vmatprep.subr.mxu0 %v10022_v1 }
0x1d0a   : > { %v8217_v30 = vpop.f32.mrf.mxu0 }
0x1d0c   : > { %v3083_v63 = vpop.f32.mrf.mxu0 }
0x1d0e   : > { %v8218_v9 = vpop.f32.mrf.mxu0 }
0x1d10   : > { %v3086_v54 = vpop.f32.mrf.mxu0 }
0x1d12   : > { %v8221_v2 = vpop.f32.mrf.mxu0 }
0x1d14   : > { %v3099_v41 = vpop.f32.mrf.mxu0 }
0x1d15   : > { %3118 = vrot.lane.b32.xlu1 %v3099_v41, %s9273_s18 }
0x1d16   : > { %v8222_v3 = vpop.f32.mrf.mxu0 }
0x1d18   : > { %v3102_v35 = vpop.f32.mrf.mxu0 }
0x1d19   : > { %3122 = vrot.lane.b32.xlu1 %v8221_v2, %s9273_s18  ;;  %3120 = vrot.lane.b32.xlu0 %v3102_v35, %s9273_s18 }
0x1d1d   : > { %3124 = vrot.lane.b32.xlu0 %v8222_v3, %s9273_s18 }
0x1d87   : > { %v3119_v7 = vpop.permute.xlu1 %3118 }
0x1d88   : > { %v3130_v56 = vadd.f32 %v3119_v7, %v3083_v63 }
0x1d8a   : > { %v3134_v57 = vadd.f32 %v3130_v56, %v9552_v55 }
0x1d8b   : > { %v3123_v4 = vpop.permute.xlu1 %3122  ;;  %v3121_v58 = vpop.permute.xlu0 %3120 }
0x1d8c   : > { %v3138_v49 = vmax.f32 %v3134_v57, 0.0  ;;  %v3132_v13 = vadd.f32 %v8217_v30, %v3123_v4  ;;  %v3131_v29 = vadd.f32 %v3121_v58, %v3086_v54 }
0x1d8e   : > { %v3136_v45 = vadd.f32 %v3132_v13, %v9555_v60  ;;  %v3135_v36 = vadd.f32 %v3131_v29, %v9557_v62  ;;  %8239 = vmatprep.mubr.msk.f32.mxu1 %vm620_vm5, %v3138_v49 }
0x1d8f   : > { %v3125_v2 = vpop.permute.xlu0 %3124 }
0x1d90   : > { %v3140_v41 = vmax.f32 %v3136_v45, 0.0  ;;  %v3139_v35 = vmax.f32 %v3135_v36, 0.0  ;;  %v3133_v31 = vadd.f32 %v8218_v9, %v3125_v2 }
0x1d92   : > { %v3137_v3 = vadd.f32 %v3133_v31, %v9560_v6  ;;  %8240 = vmatmul.mubr.msk.f32.vlgmr.msra.gmra.mxu1 %vm620_vm5, %v3139_v35 }
0x1d93   : > { %8242 = vmatprep.mubr.msk.f32.mxu1 %vm620_vm5, %v3140_v41 }
0x1d94   : > { %v3141_v63 = vmax.f32 %v3137_v3, 0.0 }
0x1d96   : > { %8243 = vmatmul.mubr.msk.f32.gmra.mxu1 %vm620_vm5, %v3141_v63 }
0x1d97   : > { %8271 = vmatprep.mubr.msk.bf16.mxu1 %vm9274_vm6, %v10962_v39 }
0x1e52   : > { %v8241_v30 = vpop.f32.mrf.mxu1 }
0x1e53   : > { %v3226_v54 = vadd.f32 %v10039_v34, %v8241_v30 }
0x1e54   : > { %v3220_v7 = vpop.f32.mrf.mxu1 }
0x1e55   : > { %v3221_v56 = vadd.f32 %v10039_v34, %v3220_v7  ;;  %v3240_v4 = vmax.f32 %v3226_v54, 0.0 }
0x1e56   : > { %v8244_v57 = vpop.f32.mrf.mxu1 }
0x1e57   : > { %v3239_v9 = vmax.f32 %v3221_v56, 0.0  ;;  %v3236_v31 = vadd.f32 %v10039_v34, %v8244_v57 }
0x1e58   : > { %v3230_v58 = vpop.f32.mrf.mxu1 }
0x1e59   : > { %v3231_v49 = vadd.f32 %v10039_v34, %v3230_v58  ;;  %8261 = vmatprep.mubr.msk.f32.mxu0 %vm620_vm5, %v3239_v9  ;;  %v3242_v29 = vmax.f32 %v3236_v31, 0.0 }
0x1e5a   : > { %8262 = vmatmul.mubr.msk.f32.vlgmr.msra.gmra.mxu0 %vm620_vm5, %v3240_v4 }
0x1e5b   : > { %v3241_v13 = vmax.f32 %v3231_v49, 0.0  ;;  %8276 = vmatpush3.msra.mxu0 %v10022_v1 }
0x1e5c   : > { %8277 = vmatprep.subr.mxu0 %v10048_v46 }
0x1e5d   : > { %8264 = vmatprep.mubr.msk.f32.mxu0 %vm620_vm5, %v3241_v13  ;;  %8278 = vmatpush3.msra.mxu0 %v10048_v46 }
0x1e5e   : > { %8265 = vmatmul.mubr.msk.f32.gmra.mxu0 %vm620_vm5, %v3242_v29  ;;  %8279 = vmatprep.subr.mxu0 %v10054_v0 }
0x1e5f   : > { %8280 = vmatpush3.msra.mxu0 %v10054_v0 }
0x1e60   : > { %8281 = vmatprep.subr.mxu0 %v10058_v26 }
0x1e61   : > { %8282 = vmatpush3.msra.mxu0 %v10058_v26 }
0x1e62   : > { %8297 = vmatprep.subr.mxu0 %v9884_v20 }
0x1f1a   : > { %v8263_v45 = vpop.f32.mrf.mxu0 }
0x1f1b   : > { %v3327_v54 = vadd.f32 %v10063_v22, %v8263_v45 }
0x1f1c   : > { %v3321_v36 = vpop.f32.mrf.mxu0 }
0x1f1d   : > { %v3322_v63 = vadd.f32 %v10063_v22, %v3321_v36 }
0x1f1e   : > { %v8266_v2 = vpop.f32.mrf.mxu0 }
0x1f1f   : > { %v3337_v35 = vadd.f32 %v10063_v22, %v8266_v2  ;;  %v3340_v7 = vpack.c.bf16 %v3327_v54, %v3322_v63 }
0x1f20   : > { %v3331_v41 = vpop.f32.mrf.mxu0 }
0x1f21   : > { %v3332_v3 = vadd.f32 %v10063_v22, %v3331_v41 }
0x1f23   : > { %v3341_v30 = vpack.c.bf16 %v3337_v35, %v3332_v3 }
0x1f25   : > { %8268 = vmatpush3.bf16.msra.mxu1 %v3341_v30 }
0x1f26   : > { %8269 = vmatprep.subr.bf16.mxu1 %v10962_v39 }
0x1f29   : > { %8270 = vmatpush3.bf16.msra.mxu1 %v3340_v7 }
0x1f2a   : > { %8286 = vmatprep.subr.mxu1 %v10070_v28 }
0x1f2c   : > { %8272 = vmatmul.mubr.msk.bf16.vlgmr.msra.gmra.mxu1 %vm431_vm3, %v9615_v10 }
0x1f2d   : > { %8287 = vmatpush3.msra.mxu1 %v10070_v28  ;;  %8294 = vmatprep.mubr.msk.f32.mxu1 %vm431_vm3, %v10128_v52 }
0x1f2e   : > { %8288 = vmatprep.subr.mxu1 %v10078_v44 }
0x1f2f   : > { %8289 = vmatpush3.msra.mxu1 %v10078_v44 }
0x1f30   : > { %8290 = vmatprep.subr.mxu1 %v10082_v33 }
0x1f31   : > { %8291 = vmatpush3.msra.mxu1 %v10082_v33 }
0x1f32   : > { %8292 = vmatprep.subr.mxu1 %v10086_v43 }
0x1f33   : > { %8293 = vmatpush3.msra.mxu1 %v10086_v43 }
0x1f34   : > { %8295 = vmatmul.mubr.msk.f32.vlgmr.msra.gmra.mxu1 %vm431_vm3, %v10130_v38 }
0x1f35   : > { %8310 = vmatprep.mubr.msk.bf16.mxu1 %vm514_vm4, %v9477_v15 }
0x1fec   : > { %v3376_v56 = vpop.f32.mrf.mxu1 }
0x1fed   : > { %8283 = vmatprep.mubr.msk.f32.mxu0 %vm431_vm3, %v3376_v56 }
0x1fee   : > { %v8273_v52 = vpop.f32.mrf.mxu1 }
0x1ff0   : > { %v3379_v57 = vpop.f32.mrf.mxu1 }
0x1ff1   : > { %8284 = vmatmul.mubr.msk.f32.vlgmr.msra.gmra.mxu0 %vm431_vm3, %v3379_v57 }
0x1ff2   : > { %v8274_v9 = vpop.f32.mrf.mxu1  ;;  %8298 = vmatpush3.msra.mxu0 %v9884_v20 }
0x1ff3   : > { %8299 = vmatprep.subr.mxu0 %v9911_v12 }
0x1ff4   : > { %v8296_v4 = vpop.f32.mrf.mxu1  ;;  %8300 = vmatpush3.msra.mxu0 %v9911_v12 }
0x1ff5   : > { %v3536_v38 = vadd.f32 %v10099_v61, %v8296_v4  ;;  %8301 = vmatprep.subr.mxu0 %v9916_v42 }
0x1ff6   : > { %v3530_v31 = vpop.f32.mrf.mxu1  ;;  %8302 = vmatpush3.msra.mxu0 %v9916_v42 }
0x1ff7   : > { %v3531_v58 = vadd.f32 %v10099_v61, %v3530_v31  ;;  %3557 = vrot.lane.b32.xlu0 %v3536_v38, %s9273_s18  ;;  %8303 = vmatprep.subr.mxu0 %v9922_v50 }
0x1ff8   : > { %8304 = vmatpush3.msra.mxu0 %v9922_v50 }
0x1ff9   : > { %3555 = vrot.lane.b32.xlu1 %v3531_v58, %s9273_s18  ;;  %8318 = vmatprep.subr.mxu0 %v9927_v51 }
0x2069   : > { %v3558_v63 = vpop.permute.xlu0 %3557 }
0x206b   : > { %v3556_v7 = vpop.permute.xlu1 %3555 }
0x20b1   : > { %v8285_v20 = vpop.f32.mrf.mxu0 }
0x20b2   : > { %v3461_v12 = vadd.f32 %v10110_v32, %v8285_v20 }
0x20b3   : > { %v3455_v49 = vpop.f32.mrf.mxu0 }
0x20b4   : > { %v3540_v13 = vadd.f32 %v3536_v38, %v3461_v12  ;;  %v3456_v29 = vadd.f32 %v10110_v32, %v3455_v49 }
0x20b6   : > { %v7170_v42 = vmul.f32 -1.442695, %v3540_v13  ;;  %v3539_v45 = vadd.f32 %v3531_v58, %v3456_v29 }
0x20b8   : > { %8951 = vpow2.f32 %v7170_v42  ;;  %v7169_v36 = vmul.f32 -1.442695, %v3539_v45 }
0x20ba   : > { %8953 = vpow2.f32 %v7169_v36 }
0x20c5   : > { %v8952_v2 = vpop.eup %8951 }
0x20c6   : > { %v3548_v41 = vadd.f32 1.0, %v8952_v2 }
0x20c7   : > { %v8954_v35 = vpop.eup %8953 }
0x20c8   : > { %8955 = vrcp.f32 %v3548_v41  ;;  %v3547_v50 = vadd.f32 1.0, %v8954_v35 }
0x20ca   : > { %8957 = vrcp.f32 %v3547_v50 }
0x20d5   : > { %v8956_v3 = vpop.eup %8955 }
0x20d6   : > { %v3562_v30 = vmul.f32 %v8956_v3, %v3558_v63  ;;  %v3576_v58 = vsub.f32 1.0, %v8956_v3  ;;  %v3588_v49 = vmul.f32 %v8956_v3, %v10119_v11 }
0x20d7   : > { %v8958_v54 = vpop.eup %8957 }
0x20d8   : > { %3567 = vrot.lane.b32.xlu0 %v3562_v30, %s9273_s18  ;;  %v3561_v56 = vmul.f32 %v8958_v54, %v3556_v7  ;;  %v3575_v42 = vsub.f32 1.0, %v8958_v54 }
0x20da   : > { %3565 = vrot.lane.b32.xlu1 %v3561_v56, %s9273_s18 }
0x214a   : > { %v3568_v52 = vpop.permute.xlu0 %3567 }
0x214b   : > { %v3572_v57 = vadd.f32 %v3568_v52, %v3461_v12  ;;  %v3587_v12 = vmul.f32 %v8958_v54, %v10122_v25 }
0x214c   : > { %v3566_v9 = vpop.permute.xlu1 %3565 }
0x214d   : > { %8959 = vtanh.f32 %v3572_v57  ;;  %v3571_v4 = vadd.f32 %v3566_v9, %v3456_v29 }
0x214f   : > { %8961 = vtanh.f32 %v3571_v4 }
0x215a   : > { %v8960_v38 = vpop.eup %8959 }
0x215b   : > { %3581 = vrot.lane.b32.xlu0 %v8960_v38, %s9276_s27 }
0x215c   : > { %v8962_v31 = vpop.eup %8961 }
0x215d   : > { %3579 = vrot.lane.b32.xlu1 %v8962_v31, %s9276_s27 }
0x21cd   : > { %v3582_v20 = vpop.permute.xlu0 %3581 }
0x21ce   : > { %v3586_v13 = vmul.f32 %v3582_v20, %v3576_v58 }
0x21cf   : > { %v3580_v45 = vpop.permute.xlu1 %3579 }
0x21d0   : > { %v10247_v36 = vadd.f32 %v3588_v49, %v3586_v13  ;;  %v3585_v2 = vmul.f32 %v3580_v45, %v3575_v42 }
0x21d2   : > { %v10250_v29 = vadd.f32 %v3587_v12, %v3585_v2  ;;  %3595 = vrot.lane.b32.xlu0 %v10247_v36, %s9276_s27 }
0x21d4   : > { %3593 = vrot.lane.b32.xlu1 %v10250_v29, %s9276_s27 }
0x2244   : > { %v10258_v35 = vpop.permute.xlu0 %3595 }
0x2246   : > { %v10256_v41 = vpop.permute.xlu1 %3593 }
0x2247   : > { %8305 = vmatprep.mubr.msk.f32.mxu0 %vm431_vm3, %v10256_v41 }
0x2248   : > { %8306 = vmatmul.mubr.msk.f32.vlgmr.msra.gmra.mxu0 %vm431_vm3, %v10258_v35 }
0x2249   : > { %8319 = vmatpush3.msra.mxu0 %v9927_v51 }
0x224a   : > { %8320 = vmatprep.subr.mxu0 %v9955_v59 }
0x224b   : > { %8321 = vmatpush3.msra.mxu0 %v9955_v59 }
0x224c   : > { %8322 = vmatprep.subr.mxu0 %v9959_v37 }
0x224d   : > { %8323 = vmatpush3.msra.mxu0 %v9959_v37 }
0x224e   : > { %8324 = vmatprep.subr.mxu0 %v9963_v40 }
0x224f   : > { %8325 = vmatpush3.msra.mxu0 %v9963_v40  ;;  %v10964_v40 = vld [vmem:[#allocation12_spill] sm:$0xff] }
0x2250   : > { %8326 = vmatprep.subr.mxu0 %v9967_v14 }
0x2251   : > { %8327 = vmatpush3.msra.mxu0 %v9967_v14 }
0x2252   : > { %8328 = vmatprep.subr.mxu0 %v9971_v21 }
0x2253   : > { %8329 = vmatpush3.msra.mxu0 %v9971_v21 }
0x2254   : > { %8330 = vmatprep.subr.mxu0 %v9975_v53 }
0x2255   : > { %8331 = vmatpush3.msra.mxu0 %v9975_v53 }
0x2256   : > { %8332 = vmatprep.subr.mxu0 %v9979_v5 }
0x2257   : > { %8333 = vmatpush3.msra.mxu0 %v9979_v5 }
0x2258   : > { %8362 = vmatprep.subr.bf16.mxu0 %v10962_v39 }
0x2308   : > { %v8307_v51 = vpop.f32.mrf.mxu0 }
0x230a   : > { %v3667_v59 = vpop.f32.mrf.mxu0 }
0x230b   : > { %v3676_v37 = vpack.c.bf16 %v8307_v51, %v3667_v59 }
0x230d   : > { %8308 = vmatprep.subr.bf16.mxu1 %v3676_v37 }
0x230e   : > { %8309 = vmatpush3.bf16.msra.mxu1 %v3676_v37 }
0x230f   : > { %8340 = vmatprep.subr.mxu1 %v9984_v8 }
0x2311   : > { %8311 = vmatmul.mubr.msk.bf16.vlgmr.msra.gmra.mxu1 %vm514_vm4, %v9485_v23 }
0x2312   : > { %8314 = vmatprep.mubr.msk.bf16.mxu1 %vm514_vm4, %v9487_v24  ;;  %8341 = vmatpush3.msra.mxu1 %v9984_v8 }
0x2313   : > { %8342 = vmatprep.subr.mxu1 %v9992_v47 }
0x2314   : > { %8343 = vmatpush3.msra.mxu1 %v9992_v47 }
0x2315   : > { %8344 = vmatprep.subr.mxu1 %v9996_v48 }
0x2316   : > { %8345 = vmatpush3.msra.mxu1 %v9996_v48 }
0x2317   : > { %8346 = vmatprep.subr.mxu1 %v10000_v16 }
0x2318   : > { %8347 = vmatpush3.msra.mxu1 %v10000_v16 }
0x2319   : > { %8315 = vmatmul.mubr.msk.bf16.gmra.mxu1 %vm514_vm4, %v9495_v27  ;;  %8348 = vmatprep.subr.mxu1 %v10006_v17 }
0x231a   : > { %8349 = vmatpush3.msra.mxu1 %v10006_v17 }
0x231b   : > { %8350 = vmatprep.subr.mxu1 %v10010_v18 }
0x231c   : > { %8351 = vmatpush3.msra.mxu1 %v10010_v18 }
0x231d   : > { %8352 = vmatprep.subr.mxu1 %v10014_v19 }
0x231e   : > { %8353 = vmatpush3.msra.mxu1 %v10014_v19 }
0x231f   : > { %8354 = vmatprep.subr.mxu1 %v10964_v40 }
0x2320   : > { %8355 = vmatpush3.msra.mxu1 %v10964_v40 }
0x2321   : > { %8370 = vmatprep.subr.mxu1 %v10022_v1 }
0x23d1   : > { %v8312_v14 = vpop.f32.mrf.mxu1 }
0x23d3   : > { %v3711_v21 = vpop.f32.mrf.mxu1 }
0x23d5   : > { %v8313_v53 = vpop.f32.mrf.mxu1 }
0x23d7   : > { %v3714_v5 = vpop.f32.mrf.mxu1 }
0x23d9   : > { %v8316_v8 = vpop.f32.mrf.mxu1 }
0x23db   : > { %v3727_v47 = vpop.f32.mrf.mxu1 }
0x23dc   : > { %3746 = vrot.lane.b32.xlu1 %v3727_v47, %s9273_s18 }
0x23dd   : > { %v8317_v48 = vpop.f32.mrf.mxu1 }
0x23df   : > { %v3730_v16 = vpop.f32.mrf.mxu1 }
0x23e0   : > { %3750 = vrot.lane.b32.xlu1 %v8316_v8, %s9273_s18  ;;  %3748 = vrot.lane.b32.xlu0 %v3730_v16, %s9273_s18  ;;  %v10364_v8 = vld [vmem:[#allocation5 + $0x8] sm:$0xff]  ;;  %v10370_v16 = vld [vmem:[#allocation5] sm:$0xff] }
0x23e4   : > { %3752 = vrot.lane.b32.xlu0 %v8317_v48, %s9273_s18 }
0x244e   : > { %v3747_v17 = vpop.permute.xlu1 %3746 }
0x244f   : > { %v3758_v18 = vadd.f32 %v3747_v17, %v3711_v21  ;;  %v10375_v17 = vld [vmem:[#allocation5 + $0x60] sm:$0xff] }
0x2451   : > { %v3762_v19 = vadd.f32 %v3758_v18, %v9552_v55 }
0x2452   : > { %v3751_v11 = vpop.permute.xlu1 %3750  ;;  %v3749_v25 = vpop.permute.xlu0 %3748 }
0x2453   : > { %v3766_v50 = vmax.f32 %v3762_v19, 0.0  ;;  %v3760_v3 = vadd.f32 %v8312_v14, %v3751_v11  ;;  %v3759_v63 = vadd.f32 %v3749_v25, %v3714_v5 }
0x2455   : > { %v3764_v30 = vadd.f32 %v3760_v3, %v9555_v60  ;;  %v3763_v54 = vadd.f32 %v3759_v63, %v9557_v62  ;;  %8334 = vmatprep.mubr.msk.f32.mxu0 %vm620_vm5, %v3766_v50 }
0x2456   : > { %v3753_v7 = vpop.permute.xlu0 %3752 }
0x2457   : > { %v3768_v56 = vmax.f32 %v3764_v30, 0.0  ;;  %v3767_v52 = vmax.f32 %v3763_v54, 0.0  ;;  %v3761_v57 = vadd.f32 %v8313_v53, %v3753_v7 }
0x2459   : > { %v3765_v9 = vadd.f32 %v3761_v57, %v9560_v6  ;;  %8335 = vmatmul.mubr.msk.f32.vlgmr.msra.gmra.mxu0 %vm620_vm5, %v3767_v52 }
0x245a   : > { %8337 = vmatprep.mubr.msk.f32.mxu0 %vm620_vm5, %v3768_v56 }
0x245b   : > { %v3769_v4 = vmax.f32 %v3765_v9, 0.0 }
0x245d   : > { %8338 = vmatmul.mubr.msk.f32.gmra.mxu0 %vm620_vm5, %v3769_v4 }
0x245e   : > { %8366 = vmatprep.mubr.msk.bf16.mxu0 %vm9274_vm6, %v10962_v39 }
0x2519   : > { %v8336_v38 = vpop.f32.mrf.mxu0 }
0x251a   : > { %v3854_v31 = vadd.f32 %v10039_v34, %v8336_v38 }
0x251b   : > { %v3848_v58 = vpop.f32.mrf.mxu0 }
0x251c   : > { %v3849_v20 = vadd.f32 %v10039_v34, %v3848_v58  ;;  %v3868_v42 = vmax.f32 %v3854_v31, 0.0 }
0x251d   : > { %v8339_v49 = vpop.f32.mrf.mxu0 }
0x251e   : > { %v3867_v13 = vmax.f32 %v3849_v20, 0.0  ;;  %v3864_v45 = vadd.f32 %v10039_v34, %v8339_v49 }
0x251f   : > { %v3858_v12 = vpop.f32.mrf.mxu0 }
0x2520   : > { %v3859_v2 = vadd.f32 %v10039_v34, %v3858_v12  ;;  %8356 = vmatprep.mubr.msk.f32.mxu1 %vm620_vm5, %v3867_v13  ;;  %v3870_v59 = vmax.f32 %v3864_v45, 0.0  ;;  %v10332_v34 = vld [vmem:[#allocation5 + $0x18] sm:$0xff] }
0x2521   : > { %8357 = vmatmul.mubr.msk.f32.vlgmr.msra.gmra.mxu1 %vm620_vm5, %v3868_v42 }
0x2522   : > { %v3869_v51 = vmax.f32 %v3859_v2, 0.0  ;;  %8371 = vmatpush3.msra.mxu1 %v10022_v1 }
0x2523   : > { %8372 = vmatprep.subr.mxu1 %v10048_v46 }
0x2524   : > { %8359 = vmatprep.mubr.msk.f32.mxu1 %vm620_vm5, %v3869_v51  ;;  %8373 = vmatpush3.msra.mxu1 %v10048_v46 }
0x2525   : > { %8360 = vmatmul.mubr.msk.f32.gmra.mxu1 %vm620_vm5, %v3870_v59  ;;  %8374 = vmatprep.subr.mxu1 %v10054_v0 }
0x2526   : > { %8375 = vmatpush3.msra.mxu1 %v10054_v0 }
0x2527   : > { %8376 = vmatprep.subr.mxu1 %v10058_v26 }
0x2528   : > { %8377 = vmatpush3.msra.mxu1 %v10058_v26 }
0x2529   : > { %8392 = vmatprep.subr.mxu1 %v10332_v34 }
0x25e1   : > { %v8358_v1 = vpop.f32.mrf.mxu1 }
0x25e2   : > { %v3955_v0 = vadd.f32 %v10063_v22, %v8358_v1 }
0x25e3   : > { %v3949_v37 = vpop.f32.mrf.mxu1 }
0x25e4   : > { %v3950_v53 = vadd.f32 %v10063_v22, %v3949_v37 }
0x25e5   : > { %v8361_v40 = vpop.f32.mrf.mxu1 }
0x25e6   : > { %v3965_v46 = vadd.f32 %v10063_v22, %v8361_v40  ;;  %v3968_v26 = vpack.c.bf16 %v3955_v0, %v3950_v53  ;;  %v10415_v0 = vld [vmem:[#allocation5 + $0x40] sm:$0xff] }
0x25e7   : > { %v3959_v14 = vpop.f32.mrf.mxu1 }
0x25e8   : > { %v3960_v21 = vadd.f32 %v10063_v22, %v3959_v14 }
0x25ea   : > { %v3969_v5 = vpack.c.bf16 %v3965_v46, %v3960_v21 }
0x25ec   : > { %8363 = vmatpush3.bf16.msra.mxu0 %v3969_v5  ;;  %v10411_v5 = vld [vmem:[#allocation5 + $0x48] sm:$0xff] }
0x25ed   : > { %8364 = vmatprep.subr.bf16.mxu0 %v10962_v39 }
0x25f0   : > { %8365 = vmatpush3.bf16.msra.mxu0 %v3968_v26  ;;  %v10419_v26 = vld [vmem:[#allocation5 + $0x38] sm:$0xff] }
0x25f1   : > { %8381 = vmatprep.subr.mxu0 %v10070_v28 }
0x25f3   : > { %8367 = vmatmul.mubr.msk.bf16.vlgmr.msra.gmra.mxu0 %vm431_vm3, %v9615_v10 }
0x25f4   : > { %8382 = vmatpush3.msra.mxu0 %v10070_v28  ;;  %8389 = vmatprep.mubr.msk.f32.mxu0 %vm431_vm3, %v10256_v41 }
0x25f5   : > { %8383 = vmatprep.subr.mxu0 %v10078_v44 }
0x25f6   : > { %8384 = vmatpush3.msra.mxu0 %v10078_v44 }
0x25f7   : > { %8385 = vmatprep.subr.mxu0 %v10082_v33 }
0x25f8   : > { %8386 = vmatpush3.msra.mxu0 %v10082_v33  ;;  %v10359_v33 = vld [vmem:[#allocation5 + $0x10] sm:$0xff] }
0x25f9   : > { %8387 = vmatprep.subr.mxu0 %v10086_v43 }
0x25fa   : > { %8388 = vmatpush3.msra.mxu0 %v10086_v43 }
0x25fb   : > { %8390 = vmatmul.mubr.msk.f32.vlgmr.msra.gmra.mxu0 %vm431_vm3, %v10258_v35 }
0x25fc   : > { %8405 = vmatprep.mubr.msk.bf16.mxu0 %vm514_vm4, %v9477_v15 }
0x26b3   : > { %v4004_v22 = vpop.f32.mrf.mxu0 }
0x26b4   : > { %8378 = vmatprep.mubr.msk.f32.mxu1 %vm431_vm3, %v4004_v22  ;;  %v10423_v22 = vld [vmem:[#allocation5 + $0x30] sm:$0xff] }
0x26b5   : > { %v8368_v28 = vpop.f32.mrf.mxu0 }
0x26b6   : > { %v10427_v28 = vld [vmem:[#allocation5 + $0x28] sm:$0xff] }
0x26b7   : > { %v4007_v41 = vpop.f32.mrf.mxu0 }
0x26b8   : > { %8379 = vmatmul.mubr.msk.f32.vlgmr.msra.gmra.mxu1 %vm431_vm3, %v4007_v41 }
0x26b9   : > { %v8369_v44 = vpop.f32.mrf.mxu0  ;;  %8393 = vmatpush3.msra.mxu1 %v10332_v34 }
0x26ba   : > { %8394 = vmatprep.subr.mxu1 %v10359_v33 }
0x26bb   : > { %v8391_v43 = vpop.f32.mrf.mxu0  ;;  %8395 = vmatpush3.msra.mxu1 %v10359_v33 }
0x26bc   : > { %v4164_v35 = vadd.f32 %v10099_v61, %v8391_v43  ;;  %8396 = vmatprep.subr.mxu1 %v10364_v8 }
0x26bd   : > { %v4158_v47 = vpop.f32.mrf.mxu0  ;;  %8397 = vmatpush3.msra.mxu1 %v10364_v8 }
0x26be   : > { %v4159_v48 = vadd.f32 %v10099_v61, %v4158_v47  ;;  %4185 = vrot.lane.b32.xlu0 %v4164_v35, %s9273_s18  ;;  %8398 = vmatprep.subr.mxu1 %v10370_v16  ;;  %v10440_v47 = vld [vmem:[#allocation5 + $0x98] sm:$0xff] }
0x26bf   : > { %8399 = vmatpush3.msra.mxu1 %v10370_v16 }
0x26c0   : > { %4183 = vrot.lane.b32.xlu1 %v4159_v48, %s9273_s18  ;;  %8413 = vmatprep.subr.mxu1 %v10375_v17 }
0x2730   : > { %v4186_v57 = vpop.permute.xlu0 %4185 }
0x2732   : > { %v4184_v38 = vpop.permute.xlu1 %4183 }
0x2778   : > { %v8380_v18 = vpop.f32.mrf.mxu1 }
0x2779   : > { %v4089_v19 = vadd.f32 %v10110_v32, %v8380_v18  ;;  %v10448_v18 = vld [vmem:[#allocation5 + $0x88] sm:$0xff] }
0x277a   : > { %v4083_v11 = vpop.f32.mrf.mxu1 }
0x277b   : > { %v4168_v25 = vadd.f32 %v4164_v35, %v4089_v19  ;;  %v4084_v61 = vadd.f32 %v10110_v32, %v4083_v11  ;;  %v10432_v35 = vld [vmem:[#allocation5 + $0xa0] sm:$0xff]  ;;  %v10458_v11 = vld [vmem:[#allocation5 + $0x78] sm:$0xff] }
0x277d   : > { %v7191_v50 = vmul.f32 -1.442695, %v4168_v25  ;;  %v4167_v3 = vadd.f32 %v4159_v48, %v4084_v61  ;;  %v10444_v48 = vld [vmem:[#allocation5 + $0x90] sm:$0xff] }
0x277e   : > { %v10462_v25 = vld [vmem:[#allocation5 + $0x70] sm:$0xff] }
0x277f   : > { %8963 = vpow2.f32 %v7191_v50  ;;  %v7190_v63 = vmul.f32 -1.442695, %v4167_v3  ;;  %v10470_v50 = vld [vmem:[#allocation5 + $0xc0] sm:$0xff] }
0x2781   : > { %8965 = vpow2.f32 %v7190_v63 }
0x278c   : > { %v8964_v30 = vpop.eup %8963 }
0x278d   : > { %v4176_v54 = vadd.f32 1.0, %v8964_v30 }
0x278e   : > { %v8966_v7 = vpop.eup %8965 }
0x278f   : > { %8967 = vrcp.f32 %v4176_v54  ;;  %v4175_v56 = vadd.f32 1.0, %v8966_v7 }
0x2791   : > { %8969 = vrcp.f32 %v4175_v56 }
0x279c   : > { %v8968_v52 = vpop.eup %8967 }
0x279d   : > { %v4190_v9 = vmul.f32 %v8968_v52, %v4186_v57  ;;  %v4204_v45 = vsub.f32 1.0, %v8968_v52  ;;  %v4216_v2 = vmul.f32 %v8968_v52, %v10247_v36  ;;  %v10403_v36 = vld [vmem:[#allocation5 + $0x58] sm:$0xff] }
0x279e   : > { %v8970_v4 = vpop.eup %8969 }
0x279f   : > { %4195 = vrot.lane.b32.xlu0 %v4190_v9, %s9273_s18  ;;  %v4189_v31 = vmul.f32 %v8970_v4, %v4184_v38  ;;  %v4203_v59 = vsub.f32 1.0, %v8970_v4  ;;  %v4215_v40 = vmul.f32 %v8970_v4, %v10250_v29  ;;  %v10407_v29 = vld [vmem:[#allocation5 + $0x50] sm:$0xff] }
0x27a1   : > { %4193 = vrot.lane.b32.xlu1 %v4189_v31, %s9273_s18 }
0x2811   : > { %v4196_v32 = vpop.permute.xlu0 %4195 }
0x2812   : > { %v4200_v58 = vadd.f32 %v4196_v32, %v4089_v19  ;;  %v10454_v19 = vld [vmem:[#allocation5 + $0x80] sm:$0xff] }
0x2813   : > { %v4194_v20 = vpop.permute.xlu1 %4193 }
0x2814   : > { %8971 = vtanh.f32 %v4200_v58  ;;  %v4199_v49 = vadd.f32 %v4194_v20, %v4084_v61  ;;  %v10466_v61 = vld [vmem:[#allocation5 + $0x68] sm:$0xff] }
0x2815   : > { %10965 = vst [vmem:[#allocation12_spill] sm:$0xff] %v10466_v61 }
0x2816   : > { %8973 = vtanh.f32 %v4199_v49 }
0x2821   : > { %v8972_v13 = vpop.eup %8971 }
0x2822   : > { %4209 = vrot.lane.b32.xlu0 %v8972_v13, %s9276_s27 }
0x2823   : > { %v8974_v42 = vpop.eup %8973 }
0x2824   : > { %4207 = vrot.lane.b32.xlu1 %v8974_v42, %s9276_s27 }
0x2894   : > { %v4210_v12 = vpop.permute.xlu0 %4209 }
0x2895   : > { %v4214_v51 = vmul.f32 %v4210_v12, %v4204_v45 }
0x2896   : > { %v4208_v1 = vpop.permute.xlu1 %4207 }
0x2897   : > { %v10385_v37 = vadd.f32 %v4216_v2, %v4214_v51  ;;  %v4213_v14 = vmul.f32 %v4208_v1, %v4203_v59 }
0x2899   : > { %v10388_v46 = vadd.f32 %v4215_v40, %v4213_v14  ;;  %4223 = vrot.lane.b32.xlu0 %v10385_v37, %s9276_s27  ;;  %v10487_v14 = vld [vmem:[#allocation7 + $0x1] ss:$0 sm:$0xff] }
0x289b   : > { %4221 = vrot.lane.b32.xlu1 %v10388_v46, %s9276_s27 }
0x290b   : > { %v10396_v53 = vpop.permute.xlu0 %4223 }
0x290d   : > { %v10394_v21 = vpop.permute.xlu1 %4221 }
0x290e   : > { %8400 = vmatprep.mubr.msk.f32.mxu1 %vm431_vm3, %v10394_v21 }
0x290f   : > { %8401 = vmatmul.mubr.msk.f32.vlgmr.msra.gmra.mxu1 %vm431_vm3, %v10396_v53 }
0x2910   : > { %8414 = vmatpush3.msra.mxu1 %v10375_v17 }
0x2911   : > { %8415 = vmatprep.subr.mxu1 %v10403_v36 }
0x2912   : > { %8416 = vmatpush3.msra.mxu1 %v10403_v36 }
0x2913   : > { %8417 = vmatprep.subr.mxu1 %v10407_v29 }
0x2914   : > { %8418 = vmatpush3.msra.mxu1 %v10407_v29 }
0x2915   : > { %8419 = vmatprep.subr.mxu1 %v10411_v5 }
0x2916   : > { %8420 = vmatpush3.msra.mxu1 %v10411_v5 }
0x2917   : > { %8421 = vmatprep.subr.mxu1 %v10415_v0 }
0x2918   : > { %8422 = vmatpush3.msra.mxu1 %v10415_v0 }
0x2919   : > { %8423 = vmatprep.subr.mxu1 %v10419_v26 }
0x291a   : > { %8424 = vmatpush3.msra.mxu1 %v10419_v26 }
0x291b   : > { %8425 = vmatprep.subr.mxu1 %v10423_v22 }
0x291c   : > { %8426 = vmatpush3.msra.mxu1 %v10423_v22 }
0x291d   : > { %8427 = vmatprep.subr.mxu1 %v10427_v28 }
0x291e   : > { %8428 = vmatpush3.msra.mxu1 %v10427_v28 }
0x291f   : > { %8457 = vmatprep.subr.bf16.mxu1 %v10962_v39 }
0x29cf   : > { %v8402_v41 = vpop.f32.mrf.mxu1 }
0x29d1   : > { %v4295_v44 = vpop.f32.mrf.mxu1 }
0x29d2   : > { %v4304_v43 = vpack.c.bf16 %v8402_v41, %v4295_v44 }
0x29d4   : > { %8403 = vmatprep.subr.bf16.mxu0 %v4304_v43 }
0x29d5   : > { %8404 = vmatpush3.bf16.msra.mxu0 %v4304_v43 }
0x29d6   : > { %8435 = vmatprep.subr.mxu0 %v10432_v35 }
0x29d8   : > { %8406 = vmatmul.mubr.msk.bf16.vlgmr.msra.gmra.mxu0 %vm514_vm4, %v9485_v23 }
0x29d9   : > { %8409 = vmatprep.mubr.msk.bf16.mxu0 %vm514_vm4, %v9487_v24  ;;  %8436 = vmatpush3.msra.mxu0 %v10432_v35 }
0x29da   : > { %8437 = vmatprep.subr.mxu0 %v10440_v47 }
0x29db   : > { %8438 = vmatpush3.msra.mxu0 %v10440_v47 }
0x29dc   : > { %8439 = vmatprep.subr.mxu0 %v10444_v48 }
0x29dd   : > { %8440 = vmatpush3.msra.mxu0 %v10444_v48 }
0x29de   : > { %8441 = vmatprep.subr.mxu0 %v10448_v18 }
0x29df   : > { %8442 = vmatpush3.msra.mxu0 %v10448_v18 }
0x29e0   : > { %8410 = vmatmul.mubr.msk.bf16.gmra.mxu0 %vm514_vm4, %v9495_v27  ;;  %8443 = vmatprep.subr.mxu0 %v10454_v19 }
0x29e1   : > { %8444 = vmatpush3.msra.mxu0 %v10454_v19 }
0x29e2   : > { %8445 = vmatprep.subr.mxu0 %v10458_v11 }
0x29e3   : > { %8446 = vmatpush3.msra.mxu0 %v10458_v11 }
0x29e4   : > { %8447 = vmatprep.subr.mxu0 %v10462_v25 }
0x29e5   : > { %8448 = vmatpush3.msra.mxu0 %v10462_v25 }
0x29e6   : > { %8449 = vmatprep.subr.mxu0 %v10466_v61 }
0x29e7   : > { %8450 = vmatpush3.msra.mxu0 %v10466_v61 }
0x29e8   : > { %8465 = vmatprep.subr.mxu0 %v10470_v50 }
0x2a98   : > { %v8407_v3 = vpop.f32.mrf.mxu0 }
0x2a9a   : > { %v4339_v63 = vpop.f32.mrf.mxu0 }
0x2a9c   : > { %v8408_v30 = vpop.f32.mrf.mxu0 }
0x2a9e   : > { %v4342_v54 = vpop.f32.mrf.mxu0 }
0x2aa0   : > { %v8411_v7 = vpop.f32.mrf.mxu0 }
0x2aa2   : > { %v4355_v56 = vpop.f32.mrf.mxu0 }
0x2aa3   : > { %4374 = vrot.lane.b32.xlu1 %v4355_v56, %s9273_s18 }
0x2aa4   : > { %v8412_v52 = vpop.f32.mrf.mxu0 }
0x2aa6   : > { %v4358_v57 = vpop.f32.mrf.mxu0 }
0x2aa7   : > { %4378 = vrot.lane.b32.xlu1 %v8411_v7, %s9273_s18  ;;  %4376 = vrot.lane.b32.xlu0 %v4358_v57, %s9273_s18 }
0x2aab   : > { %4380 = vrot.lane.b32.xlu0 %v8412_v52, %s9273_s18 }
0x2b15   : > { %v4375_v9 = vpop.permute.xlu1 %4374 }
0x2b16   : > { %v4386_v4 = vadd.f32 %v4375_v9, %v4339_v63  ;;  %v10496_v9 = vld [vmem:[#allocation5 + $0xb8] sm:$0xff] }
0x2b18   : > { %v4390_v38 = vadd.f32 %v4386_v4, %v9552_v55  ;;  %v10502_v4 = vld [vmem:[#allocation5 + $0xb0] sm:$0xff] }
0x2b19   : > { %v4379_v31 = vpop.permute.xlu1 %4378  ;;  %v4377_v32 = vpop.permute.xlu0 %4376 }
0x2b1a   : > { %v4394_v58 = vmax.f32 %v4390_v38, 0.0  ;;  %v4388_v20 = vadd.f32 %v8407_v3, %v4379_v31  ;;  %v4387_v49 = vadd.f32 %v4377_v32, %v4342_v54  ;;  %v10506_v38 = vld [vmem:[#allocation5 + $0xa8] sm:$0xff] }
0x2b1c   : > { %v4392_v13 = vadd.f32 %v4388_v20, %v9555_v60  ;;  %v4391_v42 = vadd.f32 %v4387_v49, %v9557_v62  ;;  %8429 = vmatprep.mubr.msk.f32.mxu1 %vm620_vm5, %v4394_v58  ;;  %v10511_v49 = vld [vmem:[#allocation7 + $0x2] ss:$0 sm:$0xff] }
0x2b1d   : > { %v4381_v45 = vpop.permute.xlu0 %4380 }
0x2b1e   : > { %v4396_v12 = vmax.f32 %v4392_v13, 0.0  ;;  %v4395_v2 = vmax.f32 %v4391_v42, 0.0  ;;  %v4389_v51 = vadd.f32 %v8408_v30, %v4381_v45 }
0x2b20   : > { %v4393_v59 = vadd.f32 %v4389_v51, %v9560_v6  ;;  %8430 = vmatmul.mubr.msk.f32.vlgmr.msra.gmra.mxu1 %vm620_vm5, %v4395_v2 }
0x2b21   : > { %8432 = vmatprep.mubr.msk.f32.mxu1 %vm620_vm5, %v4396_v12 }
0x2b22   : > { %v4397_v1 = vmax.f32 %v4393_v59, 0.0  ;;  %v10518_v59 = vld [vmem:[#allocation5 + $0xe0] sm:$0xff] }
0x2b24   : > { %8433 = vmatmul.mubr.msk.f32.gmra.mxu1 %vm620_vm5, %v4397_v1  ;;  %v10526_v1 = vld [vmem:[#allocation5 + $0xd8] sm:$0xff] }
0x2b25   : > { %8461 = vmatprep.mubr.msk.bf16.mxu1 %vm9274_vm6, %v10962_v39 }
0x2be0   : > { %v8431_v40 = vpop.f32.mrf.mxu1 }
0x2be1   : > { %v4482_v41 = vadd.f32 %v10487_v14, %v8431_v40  ;;  %v10530_v40 = vld [vmem:[#allocation5 + $0xd0] sm:$0xff] }
0x2be2   : > { %v4476_v44 = vpop.f32.mrf.mxu1 }
0x2be3   : > { %v4477_v43 = vadd.f32 %v10487_v14, %v4476_v44  ;;  %v4496_v30 = vmax.f32 %v4482_v41, 0.0  ;;  %v10534_v41 = vld [vmem:[#allocation5 + $0xc8] sm:$0xff] }
0x2be4   : > { %v8434_v3 = vpop.f32.mrf.mxu1 }
0x2be5   : > { %v4495_v63 = vmax.f32 %v4477_v43, 0.0  ;;  %v4492_v54 = vadd.f32 %v10487_v14, %v8434_v3 }
0x2be6   : > { %v4486_v7 = vpop.f32.mrf.mxu1 }
0x2be7   : > { %v4487_v56 = vadd.f32 %v10487_v14, %v4486_v7  ;;  %8451 = vmatprep.mubr.msk.f32.mxu0 %vm620_vm5, %v4495_v63  ;;  %v4498_v57 = vmax.f32 %v4492_v54, 0.0 }
0x2be8   : > { %8452 = vmatmul.mubr.msk.f32.vlgmr.msra.gmra.mxu0 %vm620_vm5, %v4496_v30  ;;  %v10547_v30 = vld [vmem:[#allocation7 + $0x4] ss:$0 sm:$0xff] }
0x2be9   : > { %v4497_v52 = vmax.f32 %v4487_v56, 0.0  ;;  %8466 = vmatpush3.msra.mxu0 %v10470_v50 }
0x2bea   : > { %8467 = vmatprep.subr.mxu0 %v10496_v9 }
0x2beb   : > { %8454 = vmatprep.mubr.msk.f32.mxu0 %vm620_vm5, %v4497_v52  ;;  %8468 = vmatpush3.msra.mxu0 %v10496_v9  ;;  %v10558_v52 = vld [vmem:[#allocation7 + $0x3] ss:$0 sm:$0xff] }
0x2bec   : > { %8455 = vmatmul.mubr.msk.f32.gmra.mxu0 %vm620_vm5, %v4498_v57  ;;  %8469 = vmatprep.subr.mxu0 %v10502_v4 }
0x2bed   : > { %8470 = vmatpush3.msra.mxu0 %v10502_v4 }
0x2bee   : > { %8471 = vmatprep.subr.mxu0 %v10506_v38 }
0x2bef   : > { %8472 = vmatpush3.msra.mxu0 %v10506_v38 }
0x2bf0   : > { %8487 = vmatprep.subr.mxu0 %v10332_v34 }
0x2ca8   : > { %v8453_v31 = vpop.f32.mrf.mxu0 }
0x2ca9   : > { %v4583_v2 = vadd.f32 %v10511_v49, %v8453_v31 }
0x2caa   : > { %v4577_v32 = vpop.f32.mrf.mxu0 }
0x2cab   : > { %v4578_v45 = vadd.f32 %v10511_v49, %v4577_v32 }
0x2cac   : > { %v8456_v58 = vpop.f32.mrf.mxu0 }
0x2cad   : > { %v4593_v13 = vadd.f32 %v10511_v49, %v8456_v58  ;;  %v4596_v51 = vpack.c.bf16 %v4583_v2, %v4578_v45 }
0x2cae   : > { %v4587_v20 = vpop.f32.mrf.mxu0 }
0x2caf   : > { %v4588_v42 = vadd.f32 %v10511_v49, %v4587_v20 }
0x2cb1   : > { %v4597_v12 = vpack.c.bf16 %v4593_v13, %v4588_v42 }
0x2cb3   : > { %8458 = vmatpush3.bf16.msra.mxu1 %v4597_v12 }
0x2cb4   : > { %8459 = vmatprep.subr.bf16.mxu1 %v10962_v39 }
0x2cb7   : > { %8460 = vmatpush3.bf16.msra.mxu1 %v4596_v51 }
0x2cb8   : > { %8476 = vmatprep.subr.mxu1 %v10518_v59 }
0x2cba   : > { %8462 = vmatmul.mubr.msk.bf16.vlgmr.msra.gmra.mxu1 %vm431_vm3, %v9615_v10 }
0x2cbb   : > { %8477 = vmatpush3.msra.mxu1 %v10518_v59  ;;  %8484 = vmatprep.mubr.msk.f32.mxu1 %vm431_vm3, %v10394_v21 }
0x2cbc   : > { %8478 = vmatprep.subr.mxu1 %v10526_v1 }
0x2cbd   : > { %8479 = vmatpush3.msra.mxu1 %v10526_v1 }
0x2cbe   : > { %8480 = vmatprep.subr.mxu1 %v10530_v40 }
0x2cbf   : > { %8481 = vmatpush3.msra.mxu1 %v10530_v40 }
0x2cc0   : > { %8482 = vmatprep.subr.mxu1 %v10534_v41 }
0x2cc1   : > { %8483 = vmatpush3.msra.mxu1 %v10534_v41 }
0x2cc2   : > { %8485 = vmatmul.mubr.msk.f32.vlgmr.msra.gmra.mxu1 %vm431_vm3, %v10396_v53 }
0x2cc3   : > { %8500 = vmatprep.mubr.msk.bf16.mxu1 %vm514_vm4, %v9477_v15 }
0x2d7a   : > { %v4632_v21 = vpop.f32.mrf.mxu1 }
0x2d7b   : > { %8473 = vmatprep.mubr.msk.f32.mxu0 %vm431_vm3, %v4632_v21 }
0x2d7c   : > { %v8463_v44 = vpop.f32.mrf.mxu1 }
0x2d7e   : > { %v4635_v43 = vpop.f32.mrf.mxu1 }
0x2d7f   : > { %8474 = vmatmul.mubr.msk.f32.vlgmr.msra.gmra.mxu0 %vm431_vm3, %v4635_v43 }
0x2d80   : > { %v8464_v3 = vpop.f32.mrf.mxu1  ;;  %8488 = vmatpush3.msra.mxu0 %v10332_v34 }
0x2d81   : > { %8489 = vmatprep.subr.mxu0 %v10359_v33 }
0x2d82   : > { %v8486_v63 = vpop.f32.mrf.mxu1  ;;  %8490 = vmatpush3.msra.mxu0 %v10359_v33 }
0x2d83   : > { %v4792_v53 = vadd.f32 %v10547_v30, %v8486_v63  ;;  %8491 = vmatprep.subr.mxu0 %v10364_v8 }
0x2d84   : > { %v4786_v54 = vpop.f32.mrf.mxu1  ;;  %8492 = vmatpush3.msra.mxu0 %v10364_v8 }
0x2d85   : > { %v4787_v7 = vadd.f32 %v10547_v30, %v4786_v54  ;;  %4813 = vrot.lane.b32.xlu0 %v4792_v53, %s9273_s18  ;;  %8493 = vmatprep.subr.mxu0 %v10370_v16 }
0x2d86   : > { %8494 = vmatpush3.msra.mxu0 %v10370_v16 }
0x2d87   : > { %4811 = vrot.lane.b32.xlu1 %v4787_v7, %s9273_s18  ;;  %8508 = vmatprep.subr.mxu0 %v10375_v17 }
0x2df7   : > { %v4814_v44 = vpop.permute.xlu0 %4813 }
0x2df9   : > { %v4812_v63 = vpop.permute.xlu1 %4811 }
0x2e3f   : > { %v8475_v56 = vpop.f32.mrf.mxu0 }
0x2e40   : > { %v4717_v57 = vadd.f32 %v10558_v52, %v8475_v56 }
0x2e41   : > { %v4711_v31 = vpop.f32.mrf.mxu0 }
0x2e42   : > { %v4796_v32 = vadd.f32 %v4792_v53, %v4717_v57  ;;  %v4712_v58 = vadd.f32 %v10558_v52, %v4711_v31 }
0x2e44   : > { %v7212_v20 = vmul.f32 -1.442695, %v4796_v32  ;;  %v4795_v13 = vadd.f32 %v4787_v7, %v4712_v58 }
0x2e46   : > { %8975 = vpow2.f32 %v7212_v20  ;;  %v7211_v42 = vmul.f32 -1.442695, %v4795_v13 }
0x2e48   : > { %8977 = vpow2.f32 %v7211_v42 }
0x2e53   : > { %v8976_v45 = vpop.eup %8975 }
0x2e54   : > { %v4804_v12 = vadd.f32 1.0, %v8976_v45 }
0x2e55   : > { %v8978_v2 = vpop.eup %8977 }
0x2e56   : > { %8979 = vrcp.f32 %v4804_v12  ;;  %v4803_v51 = vadd.f32 1.0, %v8978_v2 }
0x2e58   : > { %8981 = vrcp.f32 %v4803_v51 }
0x2e63   : > { %v8980_v21 = vpop.eup %8979 }
0x2e64   : > { %v4818_v43 = vmul.f32 %v8980_v21, %v4814_v44  ;;  %v4832_v13 = vsub.f32 1.0, %v8980_v21  ;;  %v4844_v45 = vmul.f32 %v8980_v21, %v10385_v37 }
0x2e65   : > { %v8982_v3 = vpop.eup %8981 }
0x2e66   : > { %4823 = vrot.lane.b32.xlu0 %v4818_v43, %s9273_s18  ;;  %v4817_v53 = vmul.f32 %v8982_v3, %v4812_v63  ;;  %v4831_v2 = vsub.f32 1.0, %v8982_v3 }
0x2e68   : > { %4821 = vrot.lane.b32.xlu1 %v4817_v53, %s9273_s18 }
0x2ed8   : > { %v4824_v54 = vpop.permute.xlu0 %4823 }
0x2ed9   : > { %v4828_v7 = vadd.f32 %v4824_v54, %v4717_v57  ;;  %v4843_v57 = vmul.f32 %v8982_v3, %v10388_v46 }
0x2eda   : > { %v4822_v56 = vpop.permute.xlu1 %4821 }
0x2edb   : > { %8983 = vtanh.f32 %v4828_v7  ;;  %v4827_v31 = vadd.f32 %v4822_v56, %v4712_v58 }
0x2edd   : > { %8985 = vtanh.f32 %v4827_v31 }
0x2ee8   : > { %v8984_v32 = vpop.eup %8983 }
0x2ee9   : > { %4837 = vrot.lane.b32.xlu0 %v8984_v32, %s9276_s27 }
0x2eea   : > { %v8986_v20 = vpop.eup %8985 }
0x2eeb   : > { %4835 = vrot.lane.b32.xlu1 %v8986_v20, %s9276_s27 }
0x2f5b   : > { %v4838_v42 = vpop.permute.xlu0 %4837 }
0x2f5c   : > { %v4842_v12 = vmul.f32 %v4838_v42, %v4832_v13 }
0x2f5d   : > { %v4836_v51 = vpop.permute.xlu1 %4835 }
0x2f5e   : > { %v10567_v44 = vadd.f32 %v4844_v45, %v4842_v12  ;;  %v4841_v43 = vmul.f32 %v4836_v51, %v4831_v2 }
0x2f60   : > { %v10570_v58 = vadd.f32 %v4843_v57, %v4841_v43  ;;  %4851 = vrot.lane.b32.xlu0 %v10567_v44, %s9276_s27 }
0x2f62   : > { %4849 = vrot.lane.b32.xlu1 %v10570_v58, %s9276_s27 }
0x2fd2   : > { %v10578_v53 = vpop.permute.xlu0 %4851 }
0x2fd4   : > { %v10576_v63 = vpop.permute.xlu1 %4849 }
0x2fd5   : > { %8495 = vmatprep.mubr.msk.f32.mxu0 %vm431_vm3, %v10576_v63 }
0x2fd6   : > { %8496 = vmatmul.mubr.msk.f32.vlgmr.msra.gmra.mxu0 %vm431_vm3, %v10578_v53 }
0x2fd7   : > { %8509 = vmatpush3.msra.mxu0 %v10375_v17 }
0x2fd8   : > { %8510 = vmatprep.subr.mxu0 %v10403_v36 }
0x2fd9   : > { %8511 = vmatpush3.msra.mxu0 %v10403_v36 }
0x2fda   : > { %8512 = vmatprep.subr.mxu0 %v10407_v29 }
0x2fdb   : > { %8513 = vmatpush3.msra.mxu0 %v10407_v29 }
0x2fdc   : > { %8514 = vmatprep.subr.mxu0 %v10411_v5 }
0x2fdd   : > { %8515 = vmatpush3.msra.mxu0 %v10411_v5 }
0x2fde   : > { %8516 = vmatprep.subr.mxu0 %v10415_v0 }
0x2fdf   : > { %8517 = vmatpush3.msra.mxu0 %v10415_v0 }
0x2fe0   : > { %8518 = vmatprep.subr.mxu0 %v10419_v26 }
0x2fe1   : > { %8519 = vmatpush3.msra.mxu0 %v10419_v26 }
0x2fe2   : > { %8520 = vmatprep.subr.mxu0 %v10423_v22 }
0x2fe3   : > { %8521 = vmatpush3.msra.mxu0 %v10423_v22 }
0x2fe4   : > { %8522 = vmatprep.subr.mxu0 %v10427_v28 }
0x2fe5   : > { %8523 = vmatpush3.msra.mxu0 %v10427_v28 }
0x2fe6   : > { %8552 = vmatprep.subr.bf16.mxu0 %v10962_v39 }
0x3096   : > { %v8497_v37 = vpop.f32.mrf.mxu0 }
0x3098   : > { %v4923_v46 = vpop.f32.mrf.mxu0 }
0x3099   : > { %v4932_v21 = vpack.c.bf16 %v8497_v37, %v4923_v46 }
0x309b   : > { %8498 = vmatprep.subr.bf16.mxu1 %v4932_v21 }
0x309c   : > { %8499 = vmatpush3.bf16.msra.mxu1 %v4932_v21 }
0x309d   : > { %8530 = vmatprep.subr.mxu1 %v10432_v35 }
0x309f   : > { %8501 = vmatmul.mubr.msk.bf16.vlgmr.msra.gmra.mxu1 %vm514_vm4, %v9485_v23 }
0x30a0   : > { %8504 = vmatprep.mubr.msk.bf16.mxu1 %vm514_vm4, %v9487_v24  ;;  %8531 = vmatpush3.msra.mxu1 %v10432_v35 }
0x30a1   : > { %8532 = vmatprep.subr.mxu1 %v10440_v47 }
0x30a2   : > { %8533 = vmatpush3.msra.mxu1 %v10440_v47 }
0x30a3   : > { %8534 = vmatprep.subr.mxu1 %v10444_v48 }
0x30a4   : > { %8535 = vmatpush3.msra.mxu1 %v10444_v48 }
0x30a5   : > { %8536 = vmatprep.subr.mxu1 %v10448_v18 }
0x30a6   : > { %8537 = vmatpush3.msra.mxu1 %v10448_v18 }
0x30a7   : > { %8505 = vmatmul.mubr.msk.bf16.gmra.mxu1 %vm514_vm4, %v9495_v27  ;;  %8538 = vmatprep.subr.mxu1 %v10454_v19 }
0x30a8   : > { %8539 = vmatpush3.msra.mxu1 %v10454_v19 }
0x30a9   : > { %8540 = vmatprep.subr.mxu1 %v10458_v11 }
0x30aa   : > { %8541 = vmatpush3.msra.mxu1 %v10458_v11 }
0x30ab   : > { %8542 = vmatprep.subr.mxu1 %v10462_v25 }
0x30ac   : > { %8543 = vmatpush3.msra.mxu1 %v10462_v25 }
0x30ad   : > { %8544 = vmatprep.subr.mxu1 %v10466_v61 }
0x30ae   : > { %8545 = vmatpush3.msra.mxu1 %v10466_v61 }
0x30af   : > { %8560 = vmatprep.subr.mxu1 %v10470_v50 }
0x315f   : > { %v8502_v3 = vpop.f32.mrf.mxu1 }
0x3161   : > { %v4967_v54 = vpop.f32.mrf.mxu1 }
0x3163   : > { %v8503_v7 = vpop.f32.mrf.mxu1 }
0x3165   : > { %v4970_v56 = vpop.f32.mrf.mxu1 }
0x3167   : > { %v8506_v31 = vpop.f32.mrf.mxu1 }
0x3169   : > { %v4983_v32 = vpop.f32.mrf.mxu1 }
0x316a   : > { %5002 = vrot.lane.b32.xlu1 %v4983_v32, %s9273_s18 }
0x316b   : > { %v8507_v20 = vpop.f32.mrf.mxu1 }
0x316d   : > { %v4986_v13 = vpop.f32.mrf.mxu1 }
0x316e   : > { %5006 = vrot.lane.b32.xlu1 %v8506_v31, %s9273_s18  ;;  %5004 = vrot.lane.b32.xlu0 %v4986_v13, %s9273_s18 }
0x3172   : > { %5008 = vrot.lane.b32.xlu0 %v8507_v20, %s9273_s18 }
0x31dc   : > { %v5003_v42 = vpop.permute.xlu1 %5002 }
0x31dd   : > { %v5014_v45 = vadd.f32 %v5003_v42, %v4967_v54 }
0x31df   : > { %v5018_v12 = vadd.f32 %v5014_v45, %v9552_v55 }
0x31e0   : > { %v5007_v2 = vpop.permute.xlu1 %5006  ;;  %v5005_v51 = vpop.permute.xlu0 %5004 }
0x31e1   : > { %v5022_v57 = vmax.f32 %v5018_v12, 0.0  ;;  %v5016_v43 = vadd.f32 %v8502_v3, %v5007_v2  ;;  %v5015_v37 = vadd.f32 %v5005_v51, %v4970_v56 }
0x31e3   : > { %v5020_v46 = vadd.f32 %v5016_v43, %v9555_v60  ;;  %v5019_v21 = vadd.f32 %v5015_v37, %v9557_v62  ;;  %8524 = vmatprep.mubr.msk.f32.mxu0 %vm620_vm5, %v5022_v57 }
0x31e4   : > { %v5009_v31 = vpop.permute.xlu0 %5008 }
0x31e5   : > { %v5024_v32 = vmax.f32 %v5020_v46, 0.0  ;;  %v5023_v13 = vmax.f32 %v5019_v21, 0.0  ;;  %v5017_v61 = vadd.f32 %v8503_v7, %v5009_v31 }
0x31e7   : > { %v5021_v20 = vadd.f32 %v5017_v61, %v9560_v6  ;;  %8525 = vmatmul.mubr.msk.f32.vlgmr.msra.gmra.mxu0 %vm620_vm5, %v5023_v13 }
0x31e8   : > { %8527 = vmatprep.mubr.msk.f32.mxu0 %vm620_vm5, %v5024_v32 }
0x31e9   : > { %v5025_v54 = vmax.f32 %v5021_v20, 0.0 }
0x31eb   : > { %8528 = vmatmul.mubr.msk.f32.gmra.mxu0 %vm620_vm5, %v5025_v54 }
0x31ec   : > { %8556 = vmatprep.mubr.msk.bf16.mxu0 %vm9274_vm6, %v10962_v39 }
0x32a7   : > { %v8526_v3 = vpop.f32.mrf.mxu0 }
0x32a8   : > { %v5110_v56 = vadd.f32 %v10487_v14, %v8526_v3 }
0x32a9   : > { %v5104_v42 = vpop.f32.mrf.mxu0 }
0x32aa   : > { %v5105_v45 = vadd.f32 %v10487_v14, %v5104_v42  ;;  %v5124_v2 = vmax.f32 %v5110_v56, 0.0 }
0x32ab   : > { %v8529_v12 = vpop.f32.mrf.mxu0 }
0x32ac   : > { %v5123_v7 = vmax.f32 %v5105_v45, 0.0  ;;  %v5120_v61 = vadd.f32 %v10487_v14, %v8529_v12 }
0x32ad   : > { %v5114_v51 = vpop.f32.mrf.mxu0 }
0x32ae   : > { %v5115_v57 = vadd.f32 %v10487_v14, %v5114_v51  ;;  %8546 = vmatprep.mubr.msk.f32.mxu1 %vm620_vm5, %v5123_v7  ;;  %v5126_v37 = vmax.f32 %v5120_v61, 0.0 }
0x32af   : > { %8547 = vmatmul.mubr.msk.f32.vlgmr.msra.gmra.mxu1 %vm620_vm5, %v5124_v2 }
0x32b0   : > { %v5125_v43 = vmax.f32 %v5115_v57, 0.0  ;;  %8561 = vmatpush3.msra.mxu1 %v10470_v50 }
0x32b1   : > { %8562 = vmatprep.subr.mxu1 %v10496_v9 }
0x32b2   : > { %8549 = vmatprep.mubr.msk.f32.mxu1 %vm620_vm5, %v5125_v43  ;;  %8563 = vmatpush3.msra.mxu1 %v10496_v9 }
0x32b3   : > { %8550 = vmatmul.mubr.msk.f32.gmra.mxu1 %vm620_vm5, %v5126_v37  ;;  %8564 = vmatprep.subr.mxu1 %v10502_v4 }
0x32b4   : > { %8565 = vmatpush3.msra.mxu1 %v10502_v4 }
0x32b5   : > { %8566 = vmatprep.subr.mxu1 %v10506_v38 }
0x32b6   : > { %8567 = vmatpush3.msra.mxu1 %v10506_v38 }
0x32b7   : > { %8582 = vmatprep.subr.mxu1 %v10332_v34 }
0x336f   : > { %v8548_v46 = vpop.f32.mrf.mxu1 }
0x3370   : > { %v5211_v56 = vadd.f32 %v10511_v49, %v8548_v46 }
0x3371   : > { %v5205_v21 = vpop.f32.mrf.mxu1 }
0x3372   : > { %v5206_v54 = vadd.f32 %v10511_v49, %v5205_v21 }
0x3373   : > { %v8551_v31 = vpop.f32.mrf.mxu1 }
0x3374   : > { %v5221_v13 = vadd.f32 %v10511_v49, %v8551_v31  ;;  %v5224_v42 = vpack.c.bf16 %v5211_v56, %v5206_v54 }
0x3375   : > { %v5215_v32 = vpop.f32.mrf.mxu1 }
0x3376   : > { %v5216_v20 = vadd.f32 %v10511_v49, %v5215_v32 }
0x3378   : > { %v5225_v3 = vpack.c.bf16 %v5221_v13, %v5216_v20 }
0x337a   : > { %8553 = vmatpush3.bf16.msra.mxu0 %v5225_v3 }
0x337b   : > { %8554 = vmatprep.subr.bf16.mxu0 %v10962_v39 }
0x337e   : > { %8555 = vmatpush3.bf16.msra.mxu0 %v5224_v42 }
0x337f   : > { %8571 = vmatprep.subr.mxu0 %v10518_v59 }
0x3381   : > { %8557 = vmatmul.mubr.msk.bf16.vlgmr.msra.gmra.mxu0 %vm431_vm3, %v9615_v10 }
0x3382   : > { %8572 = vmatpush3.msra.mxu0 %v10518_v59  ;;  %8579 = vmatprep.mubr.msk.f32.mxu0 %vm431_vm3, %v10576_v63 }
0x3383   : > { %8573 = vmatprep.subr.mxu0 %v10526_v1 }
0x3384   : > { %8574 = vmatpush3.msra.mxu0 %v10526_v1 }
0x3385   : > { %8575 = vmatprep.subr.mxu0 %v10530_v40 }
0x3386   : > { %8576 = vmatpush3.msra.mxu0 %v10530_v40 }
0x3387   : > { %8577 = vmatprep.subr.mxu0 %v10534_v41 }
0x3388   : > { %8578 = vmatpush3.msra.mxu0 %v10534_v41 }
0x3389   : > { %8580 = vmatmul.mubr.msk.f32.vlgmr.msra.gmra.mxu0 %vm431_vm3, %v10578_v53 }
0x338a   : > { %8595 = vmatprep.mubr.msk.bf16.mxu0 %vm514_vm4, %v9477_v15 }
0x3441   : > { %v5260_v45 = vpop.f32.mrf.mxu0 }
0x3442   : > { %8568 = vmatprep.mubr.msk.f32.mxu1 %vm431_vm3, %v5260_v45 }
0x3443   : > { %v8558_v63 = vpop.f32.mrf.mxu0 }
0x3445   : > { %v5263_v12 = vpop.f32.mrf.mxu0 }
0x3446   : > { %8569 = vmatmul.mubr.msk.f32.vlgmr.msra.gmra.mxu1 %vm431_vm3, %v5263_v12 }
0x3447   : > { %v8559_v7 = vpop.f32.mrf.mxu0  ;;  %8583 = vmatpush3.msra.mxu1 %v10332_v34 }
0x3448   : > { %8584 = vmatprep.subr.mxu1 %v10359_v33 }
0x3449   : > { %v8581_v2 = vpop.f32.mrf.mxu0  ;;  %8585 = vmatpush3.msra.mxu1 %v10359_v33 }
0x344a   : > { %v5420_v53 = vadd.f32 %v10547_v30, %v8581_v2  ;;  %8586 = vmatprep.subr.mxu1 %v10364_v8 }
0x344b   : > { %v5414_v61 = vpop.f32.mrf.mxu0  ;;  %8587 = vmatpush3.msra.mxu1 %v10364_v8 }
0x344c   : > { %v5415_v51 = vadd.f32 %v10547_v30, %v5414_v61  ;;  %5441 = vrot.lane.b32.xlu0 %v5420_v53, %s9273_s18  ;;  %8588 = vmatprep.subr.mxu1 %v10370_v16 }
0x344d   : > { %8589 = vmatpush3.msra.mxu1 %v10370_v16 }
0x344e   : > { %5439 = vrot.lane.b32.xlu1 %v5415_v51, %s9273_s18  ;;  %8603 = vmatprep.subr.mxu1 %v10375_v17 }
0x34be   : > { %v5442_v54 = vpop.permute.xlu0 %5441 }
0x34c0   : > { %v5440_v42 = vpop.permute.xlu1 %5439 }
0x3506   : > { %v8570_v34 = vpop.f32.mrf.mxu1 }
0x3507   : > { %v5345_v33 = vadd.f32 %v10558_v52, %v8570_v34 }
0x3508   : > { %v5339_v57 = vpop.f32.mrf.mxu1 }
0x3509   : > { %v5424_v43 = vadd.f32 %v5420_v53, %v5345_v33  ;;  %v5340_v37 = vadd.f32 %v10558_v52, %v5339_v57 }
0x350b   : > { %v7233_v8 = vmul.f32 -1.442695, %v5424_v43  ;;  %v5423_v46 = vadd.f32 %v5415_v51, %v5340_v37 }
0x350d   : > { %8987 = vpow2.f32 %v7233_v8  ;;  %v7232_v21 = vmul.f32 -1.442695, %v5423_v46 }
0x350f   : > { %8989 = vpow2.f32 %v7232_v21 }
0x351a   : > { %v8988_v31 = vpop.eup %8987 }
0x351b   : > { %v5432_v32 = vadd.f32 1.0, %v8988_v31 }
0x351c   : > { %v8990_v13 = vpop.eup %8989 }
0x351d   : > { %8991 = vrcp.f32 %v5432_v32  ;;  %v5431_v16 = vadd.f32 1.0, %v8990_v13 }
0x351f   : > { %8993 = vrcp.f32 %v5431_v16 }
0x352a   : > { %v8992_v20 = vpop.eup %8991 }
0x352b   : > { %v5446_v3 = vmul.f32 %v8992_v20, %v5442_v54  ;;  %v5460_v51 = vsub.f32 1.0, %v8992_v20  ;;  %v5472_v57 = vmul.f32 %v8992_v20, %v10567_v44 }
0x352c   : > { %v8994_v56 = vpop.eup %8993 }
0x352d   : > { %5451 = vrot.lane.b32.xlu0 %v5446_v3, %s9273_s18  ;;  %v5445_v45 = vmul.f32 %v8994_v56, %v5440_v42  ;;  %v5459_v8 = vsub.f32 1.0, %v8994_v56 }
0x352f   : > { %5449 = vrot.lane.b32.xlu1 %v5445_v45, %s9273_s18 }
0x359f   : > { %v5452_v63 = vpop.permute.xlu0 %5451 }
0x35a0   : > { %v5456_v12 = vadd.f32 %v5452_v63, %v5345_v33  ;;  %v5471_v33 = vmul.f32 %v8994_v56, %v10570_v58 }
0x35a1   : > { %v5450_v7 = vpop.permute.xlu1 %5449 }
0x35a2   : > { %8995 = vtanh.f32 %v5456_v12  ;;  %v5455_v2 = vadd.f32 %v5450_v7, %v5340_v37 }
0x35a4   : > { %8997 = vtanh.f32 %v5455_v2 }
0x35af   : > { %v8996_v53 = vpop.eup %8995 }
0x35b0   : > { %5465 = vrot.lane.b32.xlu0 %v8996_v53, %s9276_s27 }
0x35b1   : > { %v8998_v61 = vpop.eup %8997 }
0x35b2   : > { %5463 = vrot.lane.b32.xlu1 %v8998_v61, %s9276_s27 }
0x3622   : > { %v5466_v34 = vpop.permute.xlu0 %5465 }
0x3623   : > { %v5470_v43 = vmul.f32 %v5466_v34, %v5460_v51 }
0x3624   : > { %v5464_v46 = vpop.permute.xlu1 %5463 }
0x3625   : > { %v10695_v21 = vadd.f32 %v5472_v57, %v5470_v43  ;;  %v5469_v31 = vmul.f32 %v5464_v46, %v5459_v8 }
0x3627   : > { %v10698_v37 = vadd.f32 %v5471_v33, %v5469_v31  ;;  %5479 = vrot.lane.b32.xlu0 %v10695_v21, %s9276_s27 }
0x3629   : > { %5477 = vrot.lane.b32.xlu1 %v10698_v37, %s9276_s27 }
0x3699   : > { %v10706_v13 = vpop.permute.xlu0 %5479 }
0x369b   : > { %v10704_v32 = vpop.permute.xlu1 %5477 }
0x369c   : > { %8590 = vmatprep.mubr.msk.f32.mxu1 %vm431_vm3, %v10704_v32 }
0x369d   : > { %8591 = vmatmul.mubr.msk.f32.vlgmr.msra.gmra.mxu1 %vm431_vm3, %v10706_v13 }
0x369e   : > { %8604 = vmatpush3.msra.mxu1 %v10375_v17 }
0x369f   : > { %8605 = vmatprep.subr.mxu1 %v10403_v36 }
0x36a0   : > { %8606 = vmatpush3.msra.mxu1 %v10403_v36 }
0x36a1   : > { %8607 = vmatprep.subr.mxu1 %v10407_v29 }
0x36a2   : > { %8608 = vmatpush3.msra.mxu1 %v10407_v29 }
0x36a3   : > { %8609 = vmatprep.subr.mxu1 %v10411_v5 }
0x36a4   : > { %8610 = vmatpush3.msra.mxu1 %v10411_v5  ;;  %v10966_v5 = vld [vmem:[#allocation12_spill] sm:$0xff] }
0x36a5   : > { %8611 = vmatprep.subr.mxu1 %v10415_v0 }
0x36a6   : > { %8612 = vmatpush3.msra.mxu1 %v10415_v0 }
0x36a7   : > { %8613 = vmatprep.subr.mxu1 %v10419_v26 }
0x36a8   : > { %8614 = vmatpush3.msra.mxu1 %v10419_v26 }
0x36a9   : > { %8615 = vmatprep.subr.mxu1 %v10423_v22 }
0x36aa   : > { %8616 = vmatpush3.msra.mxu1 %v10423_v22 }
0x36ab   : > { %8617 = vmatprep.subr.mxu1 %v10427_v28 }
0x36ac   : > { %8618 = vmatpush3.msra.mxu1 %v10427_v28 }
0x36ad   : > { %8647 = vmatprep.subr.bf16.mxu1 %v10962_v39 }
0x375d   : > { %v8592_v17 = vpop.f32.mrf.mxu1 }
0x375f   : > { %v5551_v36 = vpop.f32.mrf.mxu1 }
0x3760   : > { %v5560_v29 = vpack.c.bf16 %v8592_v17, %v5551_v36 }
0x3762   : > { %8593 = vmatprep.subr.bf16.mxu0 %v5560_v29 }
0x3763   : > { %8594 = vmatpush3.bf16.msra.mxu0 %v5560_v29 }
0x3764   : > { %8625 = vmatprep.subr.mxu0 %v10432_v35 }
0x3766   : > { %8596 = vmatmul.mubr.msk.bf16.vlgmr.msra.gmra.mxu0 %vm514_vm4, %v9485_v23 }
0x3767   : > { %8599 = vmatprep.mubr.msk.bf16.mxu0 %vm514_vm4, %v9487_v24  ;;  %8626 = vmatpush3.msra.mxu0 %v10432_v35 }
0x3768   : > { %8627 = vmatprep.subr.mxu0 %v10440_v47 }
0x3769   : > { %8628 = vmatpush3.msra.mxu0 %v10440_v47 }
0x376a   : > { %8629 = vmatprep.subr.mxu0 %v10444_v48 }
0x376b   : > { %8630 = vmatpush3.msra.mxu0 %v10444_v48 }
0x376c   : > { %8631 = vmatprep.subr.mxu0 %v10448_v18 }
0x376d   : > { %8632 = vmatpush3.msra.mxu0 %v10448_v18 }
0x376e   : > { %8600 = vmatmul.mubr.msk.bf16.gmra.mxu0 %vm514_vm4, %v9495_v27  ;;  %8633 = vmatprep.subr.mxu0 %v10454_v19 }
0x376f   : > { %8634 = vmatpush3.msra.mxu0 %v10454_v19 }
0x3770   : > { %8635 = vmatprep.subr.mxu0 %v10458_v11 }
0x3771   : > { %8636 = vmatpush3.msra.mxu0 %v10458_v11 }
0x3772   : > { %8637 = vmatprep.subr.mxu0 %v10462_v25 }
0x3773   : > { %8638 = vmatpush3.msra.mxu0 %v10462_v25 }
0x3774   : > { %8639 = vmatprep.subr.mxu0 %v10966_v5 }
0x3775   : > { %8640 = vmatpush3.msra.mxu0 %v10966_v5 }
0x3776   : > { %8655 = vmatprep.subr.mxu0 %v10470_v50 }
0x3826   : > { %v8597_v0 = vpop.f32.mrf.mxu0 }
0x3828   : > { %v5595_v26 = vpop.f32.mrf.mxu0 }
0x382a   : > { %v8598_v22 = vpop.f32.mrf.mxu0 }
0x382c   : > { %v5598_v28 = vpop.f32.mrf.mxu0 }
0x382e   : > { %v8601_v35 = vpop.f32.mrf.mxu0 }
0x3830   : > { %v5611_v47 = vpop.f32.mrf.mxu0 }
0x3831   : > { %5630 = vrot.lane.b32.xlu1 %v5611_v47, %s9273_s18  ;;  %v9087_v47 = vld [vmem:[#allocation5 + $0x8] sm:$0xff] }
0x3832   : > { %v8602_v48 = vpop.f32.mrf.mxu0 }
0x3834   : > { %v5614_v18 = vpop.f32.mrf.mxu0 }
0x3835   : > { %5634 = vrot.lane.b32.xlu1 %v8601_v35, %s9273_s18  ;;  %5632 = vrot.lane.b32.xlu0 %v5614_v18, %s9273_s18  ;;  %v9089_v18 = vld [vmem:[#allocation5 + $0x60] sm:$0xff] }
0x3839   : > { %5636 = vrot.lane.b32.xlu0 %v8602_v48, %s9273_s18  ;;  %v9088_v48 = vld [vmem:[#allocation5] sm:$0xff] }
0x38a3   : > { %v5631_v19 = vpop.permute.xlu1 %5630 }
0x38a4   : > { %v5642_v11 = vadd.f32 %v5631_v19, %v5595_v26 }
0x38a6   : > { %v5646_v25 = vadd.f32 %v5642_v11, %v9552_v55 }
0x38a7   : > { %v5635_v44 = vpop.permute.xlu1 %5634  ;;  %v5633_v58 = vpop.permute.xlu0 %5632 }
0x38a8   : > { %v5650_v16 = vmax.f32 %v5646_v25, 0.0  ;;  %v5644_v20 = vadd.f32 %v8597_v0, %v5635_v44  ;;  %v5643_v54 = vadd.f32 %v5633_v58, %v5598_v28 }
0x38aa   : > { %v5648_v3 = vadd.f32 %v5644_v20, %v9555_v60  ;;  %v5647_v56 = vadd.f32 %v5643_v54, %v9557_v62  ;;  %8619 = vmatprep.mubr.msk.f32.mxu1 %vm620_vm5, %v5650_v16 }
0x38ab   : > { %v5637_v42 = vpop.permute.xlu0 %5636 }
0x38ac   : > { %v5652_v45 = vmax.f32 %v5648_v3, 0.0  ;;  %v5651_v63 = vmax.f32 %v5647_v56, 0.0  ;;  %v5645_v12 = vadd.f32 %v8598_v22, %v5637_v42 }
0x38ae   : > { %v5649_v7 = vadd.f32 %v5645_v12, %v9560_v6  ;;  %8620 = vmatmul.mubr.msk.f32.vlgmr.msra.gmra.mxu1 %vm620_vm5, %v5651_v63 }
0x38af   : > { %8622 = vmatprep.mubr.msk.f32.mxu1 %vm620_vm5, %v5652_v45 }
0x38b0   : > { %v5653_v2 = vmax.f32 %v5649_v7, 0.0 }
0x38b2   : > { %8623 = vmatmul.mubr.msk.f32.gmra.mxu1 %vm620_vm5, %v5653_v2 }
0x38b3   : > { %8651 = vmatprep.mubr.msk.bf16.mxu1 %vm9274_vm6, %v10962_v39 }
0x396e   : > { %v8621_v53 = vpop.f32.mrf.mxu1 }
0x396f   : > { %v5738_v61 = vadd.f32 %v10487_v14, %v8621_v53 }
0x3970   : > { %v5732_v51 = vpop.f32.mrf.mxu1 }
0x3971   : > { %v5733_v34 = vadd.f32 %v10487_v14, %v5732_v51  ;;  %v5752_v8 = vmax.f32 %v5738_v61, 0.0 }
0x3972   : > { %v8624_v57 = vpop.f32.mrf.mxu1 }
0x3973   : > { %v5751_v43 = vmax.f32 %v5733_v34, 0.0  ;;  %v5748_v46 = vadd.f32 %v10487_v14, %v8624_v57 }
0x3974   : > { %v5742_v33 = vpop.f32.mrf.mxu1 }
0x3975   : > { %v5743_v31 = vadd.f32 %v10487_v14, %v5742_v33  ;;  %8641 = vmatprep.mubr.msk.f32.mxu0 %vm620_vm5, %v5751_v43  ;;  %v5754_v36 = vmax.f32 %v5748_v46, 0.0  ;;  %v9085_v14 = vld [vmem:[#allocation5 + $0x18] sm:$0xff] }
0x3976   : > { %8642 = vmatmul.mubr.msk.f32.vlgmr.msra.gmra.mxu0 %vm620_vm5, %v5752_v8 }
0x3977   : > { %v5753_v17 = vmax.f32 %v5743_v31, 0.0  ;;  %8656 = vmatpush3.msra.mxu0 %v10470_v50 }
0x3978   : > { %8657 = vmatprep.subr.mxu0 %v10496_v9 }
0x3979   : > { %8644 = vmatprep.mubr.msk.f32.mxu0 %vm620_vm5, %v5753_v17  ;;  %8658 = vmatpush3.msra.mxu0 %v10496_v9 }
0x397a   : > { %8645 = vmatmul.mubr.msk.f32.gmra.mxu0 %vm620_vm5, %v5754_v36  ;;  %8659 = vmatprep.subr.mxu0 %v10502_v4 }
0x397b   : > { %8660 = vmatpush3.msra.mxu0 %v10502_v4 }
0x397c   : > { %8661 = vmatprep.subr.mxu0 %v10506_v38 }
0x397d   : > { %8662 = vmatpush3.msra.mxu0 %v10506_v38 }
0x397e   : > { %8677 = vmatprep.subr.mxu0 %v9085_v14 }
0x3a36   : > { %v8643_v50 = vpop.f32.mrf.mxu0 }
0x3a37   : > { %v5839_v35 = vadd.f32 %v10511_v49, %v8643_v50 }
0x3a38   : > { %v5833_v29 = vpop.f32.mrf.mxu0 }
0x3a39   : > { %v5834_v22 = vadd.f32 %v10511_v49, %v5833_v29 }
0x3a3a   : > { %v8646_v5 = vpop.f32.mrf.mxu0 }
0x3a3b   : > { %v5849_v26 = vadd.f32 %v10511_v49, %v8646_v5  ;;  %v5852_v4 = vpack.c.bf16 %v5839_v35, %v5834_v22  ;;  %v9093_v22 = vld [vmem:[#allocation5 + $0x40] sm:$0xff]  ;;  %v9095_v35 = vld [vmem:[#allocation5 + $0x30] sm:$0xff] }
0x3a3c   : > { %v5843_v0 = vpop.f32.mrf.mxu0 }
0x3a3d   : > { %v5844_v9 = vadd.f32 %v10511_v49, %v5843_v0 }
0x3a3f   : > { %v5853_v28 = vpack.c.bf16 %v5849_v26, %v5844_v9  ;;  %v9092_v9 = vld [vmem:[#allocation5 + $0x48] sm:$0xff] }
0x3a41   : > { %8648 = vmatpush3.bf16.msra.mxu1 %v5853_v28  ;;  %v9094_v28 = vld [vmem:[#allocation5 + $0x38] sm:$0xff] }
0x3a42   : > { %8649 = vmatprep.subr.bf16.mxu1 %v10962_v39 }
0x3a45   : > { %8650 = vmatpush3.bf16.msra.mxu1 %v5852_v4  ;;  %v9096_v4 = vld [vmem:[#allocation5 + $0x28] sm:$0xff] }
0x3a46   : > { %8666 = vmatprep.subr.mxu1 %v10518_v59 }
0x3a48   : > { %8652 = vmatmul.mubr.msk.bf16.vlgmr.msra.gmra.mxu1 %vm431_vm3, %v9615_v10 }
0x3a49   : > { %8667 = vmatpush3.msra.mxu1 %v10518_v59  ;;  %8674 = vmatprep.mubr.msk.f32.mxu1 %vm431_vm3, %v10704_v32 }
0x3a4a   : > { %8668 = vmatprep.subr.mxu1 %v10526_v1 }
0x3a4b   : > { %8669 = vmatpush3.msra.mxu1 %v10526_v1 }
0x3a4c   : > { %8670 = vmatprep.subr.mxu1 %v10530_v40 }
0x3a4d   : > { %8671 = vmatpush3.msra.mxu1 %v10530_v40  ;;  %v9086_v40 = vld [vmem:[#allocation5 + $0x10] sm:$0xff] }
0x3a4e   : > { %8672 = vmatprep.subr.mxu1 %v10534_v41 }
0x3a4f   : > { %8673 = vmatpush3.msra.mxu1 %v10534_v41 }
0x3a50   : > { %8675 = vmatmul.mubr.msk.f32.vlgmr.msra.gmra.mxu1 %vm431_vm3, %v10706_v13 }
0x3a51   : > { %8690 = vmatprep.mubr.msk.bf16.mxu1 %vm514_vm4, %v9477_v15 }
0x3b08   : > { %v5888_v38 = vpop.f32.mrf.mxu1 }
0x3b09   : > { %8663 = vmatprep.mubr.msk.f32.mxu0 %vm431_vm3, %v5888_v38 }
0x3b0a   : > { %v8653_v49 = vpop.f32.mrf.mxu1 }
0x3b0c   : > { %v5891_v59 = vpop.f32.mrf.mxu1 }
0x3b0d   : > { %8664 = vmatmul.mubr.msk.f32.vlgmr.msra.gmra.mxu0 %vm431_vm3, %v5891_v59 }
0x3b0e   : > { %v8654_v1 = vpop.f32.mrf.mxu1  ;;  %8678 = vmatpush3.msra.mxu0 %v9085_v14 }
0x3b0f   : > { %8679 = vmatprep.subr.mxu0 %v9086_v40  ;;  %v9097_v1 = vld [vmem:[#allocation5 + $0xa0] sm:$0xff] }
0x3b10   : > { %v8676_v32 = vpop.f32.mrf.mxu1  ;;  %8680 = vmatpush3.msra.mxu0 %v9086_v40  ;;  %v9098_v40 = vld [vmem:[#allocation5 + $0x98] sm:$0xff] }
0x3b11   : > { %v6048_v41 = vadd.f32 %v10547_v30, %v8676_v32  ;;  %8681 = vmatprep.subr.mxu0 %v9087_v47  ;;  %v9099_v32 = vld [vmem:[#allocation5 + $0x90] sm:$0xff] }
0x3b12   : > { %v6042_v13 = vpop.f32.mrf.mxu1  ;;  %8682 = vmatpush3.msra.mxu0 %v9087_v47  ;;  %v9101_v47 = vld [vmem:[#allocation5 + $0x80] sm:$0xff] }
0x3b13   : > { %v6043_v15 = vadd.f32 %v10547_v30, %v6042_v13  ;;  %6069 = vrot.lane.b32.xlu0 %v6048_v41, %s9273_s18  ;;  %8683 = vmatprep.subr.mxu0 %v9088_v48  ;;  %v9104_v13 = vld [vmem:[#allocation5 + $0x68] sm:$0xff] }
0x3b14   : > { %8684 = vmatpush3.msra.mxu0 %v9088_v48 }
0x3b15   : > { %6067 = vrot.lane.b32.xlu1 %v6043_v15, %s9273_s18  ;;  %8698 = vmatprep.subr.mxu0 %v9089_v18 }
0x3b85   : > { %v6070_v63 = vpop.permute.xlu0 %6069 }
0x3b87   : > { %v6068_v2 = vpop.permute.xlu1 %6067 }
0x3bcd   : > { %v8665_v19 = vpop.f32.mrf.mxu0 }
0x3bce   : > { %v5973_v11 = vadd.f32 %v10558_v52, %v8665_v19 }
0x3bcf   : > { %v5967_v25 = vpop.f32.mrf.mxu0 }
0x3bd0   : > { %v6052_v44 = vadd.f32 %v6048_v41, %v5973_v11  ;;  %v5968_v58 = vadd.f32 %v10558_v52, %v5967_v25  ;;  %v9100_v41 = vld [vmem:[#allocation5 + $0x88] sm:$0xff] }
0x3bd2   : > { %v7254_v16 = vmul.f32 -1.442695, %v6052_v44  ;;  %v6051_v20 = vadd.f32 %v6043_v15, %v5968_v58  ;;  %v9105_v15 = vld [vmem:[#allocation5 + $0xc0] sm:$0xff] }
0x3bd4   : > { %8999 = vpow2.f32 %v7254_v16  ;;  %v7253_v30 = vmul.f32 -1.442695, %v6051_v20 }
0x3bd6   : > { %9001 = vpow2.f32 %v7253_v30 }
0x3be1   : > { %v9000_v54 = vpop.eup %8999 }
0x3be2   : > { %v6060_v3 = vadd.f32 1.0, %v9000_v54 }
0x3be3   : > { %v9002_v56 = vpop.eup %9001 }
0x3be4   : > { %9003 = vrcp.f32 %v6060_v3  ;;  %v6059_v42 = vadd.f32 1.0, %v9002_v56 }
0x3be6   : > { %9005 = vrcp.f32 %v6059_v42 }
0x3bf1   : > { %v9004_v45 = vpop.eup %9003 }
0x3bf2   : > { %v6074_v12 = vmul.f32 %v9004_v45, %v6070_v63  ;;  %v6088_v8 = vsub.f32 1.0, %v9004_v45  ;;  %v6100_v33 = vmul.f32 %v9004_v45, %v10695_v21  ;;  %v9090_v21 = vld [vmem:[#allocation5 + $0x58] sm:$0xff] }
0x3bf3   : > { %v9006_v7 = vpop.eup %9005 }
0x3bf4   : > { %6079 = vrot.lane.b32.xlu0 %v6074_v12, %s9273_s18  ;;  %v6073_v53 = vmul.f32 %v9006_v7, %v6068_v2  ;;  %v6087_v17 = vsub.f32 1.0, %v9006_v7  ;;  %v6099_v50 = vmul.f32 %v9006_v7, %v10698_v37  ;;  %v9091_v37 = vld [vmem:[#allocation5 + $0x50] sm:$0xff] }
0x3bf6   : > { %6077 = vrot.lane.b32.xlu1 %v6073_v53, %s9273_s18 }
0x3c66   : > { %v6080_v52 = vpop.permute.xlu0 %6079 }
0x3c67   : > { %v6084_v61 = vadd.f32 %v6080_v52, %v5973_v11 }
0x3c68   : > { %v6078_v51 = vpop.permute.xlu1 %6077 }
0x3c69   : > { %9007 = vtanh.f32 %v6084_v61  ;;  %v6083_v34 = vadd.f32 %v6078_v51, %v5968_v58 }
0x3c6b   : > { %9009 = vtanh.f32 %v6083_v34 }
0x3c76   : > { %v9008_v57 = vpop.eup %9007 }
0x3c77   : > { %6093 = vrot.lane.b32.xlu0 %v9008_v57, %s9276_s27 }
0x3c78   : > { %v9010_v43 = vpop.eup %9009 }
0x3c79   : > { %6091 = vrot.lane.b32.xlu1 %v9010_v43, %s9276_s27 }
0x3ce9   : > { %v6094_v46 = vpop.permute.xlu0 %6093 }
0x3cea   : > { %v6098_v31 = vmul.f32 %v6094_v46, %v6088_v8 }
0x3ceb   : > { %v6092_v36 = vpop.permute.xlu1 %6091 }
0x3cec   : > { %v6102_v14 = vadd.f32 %v6100_v33, %v6098_v31  ;;  %v6097_v29 = vmul.f32 %v6092_v36, %v6087_v17 }
0x3cee   : > { %v10815_v5 = vadd.f32 %v6099_v50, %v6097_v29  ;;  %6107 = vrot.lane.b32.xlu0 %v6102_v14, %s9276_s27  ;;  %v9107_v14 = vld [vmem:[#allocation5 + $0xb8] sm:$0xff]  ;;  %v9108_v50 = vld [vmem:[#allocation5 + $0xb0] sm:$0xff]  ;;  %v9109_v29 = vld [vmem:[#allocation5 + $0xa8] sm:$0xff] }
0x3cf0   : > { %6105 = vrot.lane.b32.xlu1 %v10815_v5, %s9276_s27 }
0x3d60   : > { %v10822_v26 = vpop.permute.xlu0 %6107 }
0x3d62   : > { %v10820_v0 = vpop.permute.xlu1 %6105 }
0x3d63   : > { %8685 = vmatprep.mubr.msk.f32.mxu0 %vm431_vm3, %v10820_v0 }
0x3d64   : > { %8686 = vmatmul.mubr.msk.f32.vlgmr.msra.gmra.mxu0 %vm431_vm3, %v10822_v26 }
0x3d65   : > { %8699 = vmatpush3.msra.mxu0 %v9089_v18 }
0x3d66   : > { %8700 = vmatprep.subr.mxu0 %v9090_v21 }
0x3d67   : > { %8701 = vmatpush3.msra.mxu0 %v9090_v21 }
0x3d68   : > { %8702 = vmatprep.subr.mxu0 %v9091_v37 }
0x3d69   : > { %8703 = vmatpush3.msra.mxu0 %v9091_v37 }
0x3d6a   : > { %8704 = vmatprep.subr.mxu0 %v9092_v9 }
0x3d6b   : > { %8705 = vmatpush3.msra.mxu0 %v9092_v9 }
0x3d6c   : > { %8706 = vmatprep.subr.mxu0 %v9093_v22 }
0x3d6d   : > { %8707 = vmatpush3.msra.mxu0 %v9093_v22 }
0x3d6e   : > { %8708 = vmatprep.subr.mxu0 %v9094_v28 }
0x3d6f   : > { %8709 = vmatpush3.msra.mxu0 %v9094_v28  ;;  %v9110_v28 = vld [vmem:[#allocation7 + $0x2] ss:$0 sm:$0xff] }
0x3d70   : > { %8710 = vmatprep.subr.mxu0 %v9095_v35 }
0x3d71   : > { %8711 = vmatpush3.msra.mxu0 %v9095_v35 }
0x3d72   : > { %8712 = vmatprep.subr.mxu0 %v9096_v4 }
0x3d73   : > { %8713 = vmatpush3.msra.mxu0 %v9096_v4 }
0x3d74   : > { %8742 = vmatprep.subr.bf16.mxu0 %v10962_v39 }
0x3e24   : > { %v8687_v38 = vpop.f32.mrf.mxu0 }
0x3e26   : > { %v6179_v49 = vpop.f32.mrf.mxu0 }
0x3e27   : > { %v6188_v59 = vpack.c.bf16 %v8687_v38, %v6179_v49 }
0x3e29   : > { %8688 = vmatprep.subr.bf16.mxu1 %v6188_v59 }
0x3e2a   : > { %8689 = vmatpush3.bf16.msra.mxu1 %v6188_v59 }
0x3e2b   : > { %8720 = vmatprep.subr.mxu1 %v9097_v1 }
0x3e2d   : > { %8691 = vmatmul.mubr.msk.bf16.vlgmr.msra.gmra.mxu1 %vm514_vm4, %v9485_v23  ;;  %v9102_v23 = vld [vmem:[#allocation5 + $0x78] sm:$0xff] }
0x3e2e   : > { %8694 = vmatprep.mubr.msk.bf16.mxu1 %vm514_vm4, %v9487_v24  ;;  %8721 = vmatpush3.msra.mxu1 %v9097_v1  ;;  %v9103_v24 = vld [vmem:[#allocation5 + $0x70] sm:$0xff] }
0x3e2f   : > { %8722 = vmatprep.subr.mxu1 %v9098_v40 }
0x3e30   : > { %8723 = vmatpush3.msra.mxu1 %v9098_v40  ;;  %v9111_v40 = vld [vmem:[#allocation5 + $0xe0] sm:$0xff] }
0x3e31   : > { %8724 = vmatprep.subr.mxu1 %v9099_v32 }
0x3e32   : > { %8725 = vmatpush3.msra.mxu1 %v9099_v32  ;;  %v9112_v32 = vld [vmem:[#allocation5 + $0xd8] sm:$0xff] }
0x3e33   : > { %8726 = vmatprep.subr.mxu1 %v9100_v41 }
0x3e34   : > { %8727 = vmatpush3.msra.mxu1 %v9100_v41  ;;  %v9113_v41 = vld [vmem:[#allocation5 + $0xd0] sm:$0xff] }
0x3e35   : > { %8695 = vmatmul.mubr.msk.bf16.gmra.mxu1 %vm514_vm4, %v9495_v27  ;;  %8728 = vmatprep.subr.mxu1 %v9101_v47 }
0x3e36   : > { %8729 = vmatpush3.msra.mxu1 %v9101_v47  ;;  %v9114_v47 = vld [vmem:[#allocation5 + $0xc8] sm:$0xff] }
0x3e37   : > { %8730 = vmatprep.subr.mxu1 %v9102_v23 }
0x3e38   : > { %8731 = vmatpush3.msra.mxu1 %v9102_v23 }
0x3e39   : > { %8732 = vmatprep.subr.mxu1 %v9103_v24 }
0x3e3a   : > { %8733 = vmatpush3.msra.mxu1 %v9103_v24 }
0x3e3b   : > { %8734 = vmatprep.subr.mxu1 %v9104_v13 }
0x3e3c   : > { %8735 = vmatpush3.msra.mxu1 %v9104_v13 }
0x3e3d   : > { %8750 = vmatprep.subr.mxu1 %v9105_v15 }
0x3eed   : > { %v8692_v48 = vpop.f32.mrf.mxu1 }
0x3eef   : > { %v6223_v18 = vpop.f32.mrf.mxu1 }
0x3ef1   : > { %v8693_v19 = vpop.f32.mrf.mxu1 }
0x3ef3   : > { %v6226_v11 = vpop.f32.mrf.mxu1 }
0x3ef5   : > { %v8696_v25 = vpop.f32.mrf.mxu1 }
0x3ef7   : > { %v6239_v27 = vpop.f32.mrf.mxu1 }
0x3ef8   : > { %6258 = vrot.lane.b32.xlu1 %v6239_v27, %s9273_s18 }
0x3ef9   : > { %v8697_v44 = vpop.f32.mrf.mxu1 }
0x3efb   : > { %v6242_v58 = vpop.f32.mrf.mxu1 }
0x3efc   : > { %6262 = vrot.lane.b32.xlu1 %v8696_v25, %s9273_s18  ;;  %6260 = vrot.lane.b32.xlu0 %v6242_v58, %s9273_s18 }
0x3f00   : > { %6264 = vrot.lane.b32.xlu0 %v8697_v44, %s9273_s18 }
0x3f6a   : > { %v6259_v16 = vpop.permute.xlu1 %6258 }
0x3f6b   : > { %v6270_v20 = vadd.f32 %v6259_v16, %v6223_v18 }
0x3f6d   : > { %v6274_v30 = vadd.f32 %v6270_v20, %v9552_v55 }
0x3f6e   : > { %v6263_v54 = vpop.permute.xlu1 %6262  ;;  %v6261_v3 = vpop.permute.xlu0 %6260 }
0x3f6f   : > { %v6278_v56 = vmax.f32 %v6274_v30, 0.0  ;;  %v6272_v42 = vadd.f32 %v8692_v48, %v6263_v54  ;;  %v6271_v45 = vadd.f32 %v6261_v3, %v6226_v11  ;;  %v9115_v48 = vld [vmem:[#allocation7 + $0x4] ss:$0 sm:$0xff]  ;;  %v9116_v11 = vld [vmem:[#allocation7 + $0x3] ss:$0 sm:$0xff] }
0x3f71   : > { %v6276_v63 = vadd.f32 %v6272_v42, %v9555_v60  ;;  %v6275_v12 = vadd.f32 %v6271_v45, %v9557_v62  ;;  %8714 = vmatprep.mubr.msk.f32.mxu0 %vm620_vm5, %v6278_v56  ;;  %v9106_v62 = vld [vmem:[#allocation7 + $0x1] ss:$0 sm:$0xff]  ;;  %v268_v42 = vld [vmem:[#allocation5 + $0x100] sm:$0xff]  ;;  %v267_v45 = vld [vmem:[#allocation5 + $0xf8] sm:$0xff] }
0x3f72   : > { %v6265_v7 = vpop.permute.xlu0 %6264 }
0x3f73   : > { %v6280_v2 = vmax.f32 %v6276_v63, 0.0  ;;  %v6279_v53 = vmax.f32 %v6275_v12, 0.0  ;;  %v6273_v52 = vadd.f32 %v8693_v19, %v6265_v7  ;;  %v266_v63 = vld [vmem:[#allocation5 + $0xf0] sm:$0xff]  ;;  %v265_v12 = vld [vmem:[#allocation5 + $0xe8] sm:$0xff] }
0x3f75   : > { %v6277_v61 = vadd.f32 %v6273_v52, %v9560_v6  ;;  %8715 = vmatmul.mubr.msk.f32.vlgmr.msra.gmra.mxu0 %vm620_vm5, %v6279_v53  ;;  %v275_v53 = vld [vmem:[#allocation5 + $0x138] sm:$0xff]  ;;  %v274_v52 = vld [vmem:[#allocation5 + $0x130] sm:$0xff] }
0x3f76   : > { %8717 = vmatprep.mubr.msk.f32.mxu0 %vm620_vm5, %v6280_v2  ;;  %v276_v2 = vld [vmem:[#allocation5 + $0x140] sm:$0xff] }
0x3f77   : > { %v6281_v55 = vmax.f32 %v6277_v61, 0.0  ;;  %v273_v61 = vld [vmem:[#allocation5 + $0x128] sm:$0xff] }
0x3f79   : > { %8718 = vmatmul.mubr.msk.f32.gmra.mxu0 %vm620_vm5, %v6281_v55  ;;  %v272_v55 = vld [vmem:[#allocation5 + $0x120] sm:$0xff] }
0x3f7a   : > { %8746 = vmatprep.mubr.msk.bf16.mxu0 %vm9274_vm6, %v10962_v39 }
0x4035   : > { %v8716_v60 = vpop.f32.mrf.mxu0 }
0x4036   : > { %v6366_v51 = vadd.f32 %v9106_v62, %v8716_v60 }
0x4037   : > { %v6360_v34 = vpop.f32.mrf.mxu0 }
0x4038   : > { %v6361_v57 = vadd.f32 %v9106_v62, %v6360_v34  ;;  %v6380_v46 = vmax.f32 %v6366_v51, 0.0 }
0x4039   : > { %v8719_v43 = vpop.f32.mrf.mxu0 }
0x403a   : > { %v6379_v8 = vmax.f32 %v6361_v57, 0.0  ;;  %v6376_v33 = vadd.f32 %v9106_v62, %v8719_v43 }
0x403b   : > { %v6370_v6 = vpop.f32.mrf.mxu0 }
0x403c   : > { %v6371_v31 = vadd.f32 %v9106_v62, %v6370_v6  ;;  %8736 = vmatprep.mubr.msk.f32.mxu1 %vm620_vm5, %v6379_v8  ;;  %v6382_v36 = vmax.f32 %v6376_v33, 0.0  ;;  %v271_v8 = vld [vmem:[#allocation5 + $0x118] sm:$0xff]  ;;  %v284_v33 = vld [vmem:[#allocation5 + $0x180] sm:$0xff] }
0x403d   : > { %8737 = vmatmul.mubr.msk.f32.vlgmr.msra.gmra.mxu1 %vm620_vm5, %v6380_v46  ;;  %v270_v46 = vld [vmem:[#allocation5 + $0x110] sm:$0xff]  ;;  %v283_v6 = vld [vmem:[#allocation5 + $0x178] sm:$0xff] }
0x403e   : > { %v6381_v17 = vmax.f32 %v6371_v31, 0.0  ;;  %8751 = vmatpush3.msra.mxu1 %v9105_v15  ;;  %v282_v31 = vld [vmem:[#allocation5 + $0x170] sm:$0xff] }
0x403f   : > { %8752 = vmatprep.subr.mxu1 %v9107_v14 }
0x4040   : > { %8739 = vmatprep.mubr.msk.f32.mxu1 %vm620_vm5, %v6381_v17  ;;  %8753 = vmatpush3.msra.mxu1 %v9107_v14  ;;  %v281_v17 = vld [vmem:[#allocation5 + $0x168] sm:$0xff] }
0x4041   : > { %8740 = vmatmul.mubr.msk.f32.gmra.mxu1 %vm620_vm5, %v6382_v36  ;;  %8754 = vmatprep.subr.mxu1 %v9108_v50  ;;  %v280_v36 = vld [vmem:[#allocation5 + $0x160] sm:$0xff]  ;;  %v7275_v14 = vld [vmem:[#allocation7 + $0x5] ss:$0 sm:$0xff] }
0x4042   : > { %8755 = vmatpush3.msra.mxu1 %v9108_v50 }
0x4043   : > { %8756 = vmatprep.subr.mxu1 %v9109_v29 }
0x4044   : > { %8757 = vmatpush3.msra.mxu1 %v9109_v29 }
0x4045   : > { %8772 = vmatprep.subr.mxu1 %v10962_v39 }
0x40fd   : > { %v8738_v21 = vpop.f32.mrf.mxu1 }
0x40fe   : > { %v6467_v59 = vadd.f32 %v9110_v28, %v8738_v21 }
0x40ff   : > { %v6461_v37 = vpop.f32.mrf.mxu1 }
0x4100   : > { %v6462_v38 = vadd.f32 %v9110_v28, %v6461_v37 }
0x4101   : > { %v8741_v9 = vpop.f32.mrf.mxu1 }
0x4102   : > { %v6477_v35 = vadd.f32 %v9110_v28, %v8741_v9  ;;  %v6480_v1 = vpack.c.bf16 %v6467_v59, %v6462_v38  ;;  %v279_v9 = vld [vmem:[#allocation5 + $0x158] sm:$0xff] }
0x4103   : > { %v6471_v22 = vpop.f32.mrf.mxu1 }
0x4104   : > { %v6472_v4 = vadd.f32 %v9110_v28, %v6471_v22  ;;  %v278_v22 = vld [vmem:[#allocation5 + $0x150] sm:$0xff]  ;;  %v277_v28 = vld [vmem:[#allocation5 + $0x148] sm:$0xff] }
0x4106   : > { %v6481_v49 = vpack.c.bf16 %v6477_v35, %v6472_v4  ;;  %v7277_v35 = vld [vmem:[#allocation7 + $0x6] ss:$0 sm:$0xff] }
0x4108   : > { %8743 = vmatpush3.bf16.msra.mxu0 %v6481_v49 }
0x4109   : > { %8744 = vmatprep.subr.bf16.mxu0 %v10962_v39 }
0x410c   : > { %8745 = vmatpush3.bf16.msra.mxu0 %v6480_v1  ;;  %v7279_v1 = vld [vmem:[#allocation7 + $0x7] ss:$0 sm:$0xff] }
0x410d   : > { %8761 = vmatprep.subr.mxu0 %v9111_v40 }
0x410f   : > { %8747 = vmatmul.mubr.msk.bf16.vlgmr.msra.gmra.mxu0 %vm431_vm3, %v9615_v10 }
0x4110   : > { %8762 = vmatpush3.msra.mxu0 %v9111_v40  ;;  %8769 = vmatprep.mubr.msk.f32.mxu0 %vm431_vm3, %v10820_v0 }
0x4111   : > { %8763 = vmatprep.subr.mxu0 %v9112_v32 }
0x4112   : > { %8764 = vmatpush3.msra.mxu0 %v9112_v32 }
0x4113   : > { %8765 = vmatprep.subr.mxu0 %v9113_v41 }
0x4114   : > { %8766 = vmatpush3.msra.mxu0 %v9113_v41 }
0x4115   : > { %8767 = vmatprep.subr.mxu0 %v9114_v47 }
0x4116   : > { %8768 = vmatpush3.msra.mxu0 %v9114_v47 }
0x4117   : > { %8770 = vmatmul.mubr.msk.f32.vlgmr.msra.gmra.mxu0 %vm431_vm3, %v10822_v26  ;;  %8783 = vmatprep.subr.mxu0 %v10962_v39 }
0x4118   : > { %8799 = vmatprep.mubr.msk.f32.mxu0 %vm9274_vm6, %v10962_v39  ;;  %8784 = vmatpush3.msra.mxu0 %v276_v2 }
0x4119   : > { %8785 = vmatprep.subr.mxu0 %v10962_v39 }
0x411a   : > { %8786 = vmatpush3.msra.mxu0 %v275_v53 }
0x411b   : > { %8787 = vmatprep.subr.mxu0 %v10962_v39 }
0x411c   : > { %8788 = vmatpush3.msra.mxu0 %v274_v52 }
0x411d   : > { %8789 = vmatprep.subr.mxu0 %v10962_v39 }
0x411e   : > { %8790 = vmatpush3.msra.mxu0 %v273_v61 }
0x411f   : > { %8791 = vmatprep.subr.mxu0 %v10962_v39 }
0x4120   : > { %8792 = vmatpush3.msra.mxu0 %v272_v55 }
0x4121   : > { %8793 = vmatprep.subr.mxu0 %v10962_v39 }
0x4122   : > { %8794 = vmatpush3.msra.mxu0 %v271_v8 }
0x4123   : > { %8795 = vmatprep.subr.mxu0 %v10962_v39 }
0x4124   : > { %8796 = vmatpush3.msra.mxu0 %v270_v46 }
0x4125   : > { %8797 = vmatprep.subr.mxu0 %v10962_v39 }
0x41cf   : > { %v6516_v10 = vpop.f32.mrf.mxu0 }
0x41d0   : > { %8758 = vmatprep.mubr.msk.f32.mxu1 %vm431_vm3, %v6516_v10 }
0x41d1   : > { %v8748_v0 = vpop.f32.mrf.mxu0 }
0x41d3   : > { %v6519_v23 = vpop.f32.mrf.mxu0 }
0x41d4   : > { %8759 = vmatmul.mubr.msk.f32.vlgmr.msra.gmra.mxu1 %vm431_vm3, %v6519_v23 }
0x41d5   : > { %v8749_v24 = vpop.f32.mrf.mxu0  ;;  %8780 = vmatprep.mubr.msk.f32.mxu1 %vm9274_vm6, %v10962_v39  ;;  %8773 = vmatpush3.msra.mxu1 %v268_v42 }
0x41d6   : > { %8774 = vmatprep.subr.mxu1 %v10962_v39 }
0x41d7   : > { %v8771_v13 = vpop.f32.mrf.mxu0  ;;  %8775 = vmatpush3.msra.mxu1 %v267_v45 }
0x41d8   : > { %8776 = vmatprep.subr.mxu1 %v10962_v39 }
0x41d9   : > { %v6669_v15 = vpop.f32.mrf.mxu0  ;;  %8777 = vmatpush3.msra.mxu1 %v266_v63 }
0x41da   : > { %v6670_v26 = vadd.f32 %v9115_v48, %v6669_v15  ;;  %8778 = vmatprep.subr.mxu1 %v10962_v39 }
0x41db   : > { %8779 = vmatpush3.msra.mxu1 %v265_v12 }
0x41dc   : > { %6685 = vrot.lane.b32.xlu1 %v6670_v26, %s9273_s18  ;;  %8802 = vmatprep.subr.mxu1 %v10962_v39 }
0x424e   : > { %v6686_v30 = vpop.permute.xlu1 %6685 }
0x4294   : > { %v8760_v18 = vpop.f32.mrf.mxu1 }
0x4296   : > { %v6595_v19 = vpop.f32.mrf.mxu1 }
0x4297   : > { %v6596_v25 = vadd.f32 %v9116_v11, %v6595_v19 }
0x4299   : > { %v6677_v27 = vadd.f32 %v6670_v26, %v6596_v25 }
0x429b   : > { %v7274_v44 = vmul.f32 -1.442695, %v6677_v27 }
0x429d   : > { %9011 = vpow2.f32 %v7274_v44 }
0x42aa   : > { %v9012_v58 = vpop.eup %9011 }
0x42ab   : > { %v6681_v16 = vadd.f32 1.0, %v9012_v58 }
0x42ad   : > { %9013 = vrcp.f32 %v6681_v16 }
0x42ba   : > { %v9014_v20 = vpop.eup %9013 }
0x42bb   : > { %v6688_v54 = vmul.f32 %v9014_v20, %v6686_v30  ;;  %v6695_v60 = vsub.f32 1.0, %v9014_v20  ;;  %v6701_v51 = vmul.f32 %v9014_v20, %v10815_v5  ;;  %v269_v5 = vld [vmem:[#allocation5 + $0x108] sm:$0xff] }
0x42bc   : > { %8798 = vmatpush3.msra.mxu0 %v269_v5 }
0x42bd   : > { %6690 = vrot.lane.b32.xlu0 %v6688_v54, %s9273_s18 }
0x432f   : > { %v6691_v3 = vpop.permute.xlu0 %6690 }
0x4330   : > { %v6693_v56 = vadd.f32 %v6691_v3, %v6596_v25 }
0x4332   : > { %9015 = vtanh.f32 %v6693_v56 }
0x433f   : > { %v9016_v7 = vpop.eup %9015 }
0x4340   : > { %6697 = vrot.lane.b32.xlu1 %v9016_v7, %s9276_s27 }
0x43b2   : > { %v6698_v62 = vpop.permute.xlu1 %6697 }
0x43b3   : > { %v6700_v34 = vmul.f32 %v6698_v62, %v6695_v60 }
0x43b5   : > { %v6702_v57 = vadd.f32 %v6701_v51, %v6700_v34 }
0x43b7   : > { %6708 = vrot.lane.b32.xlu0 %v6702_v57, %s9276_s27 }
0x4429   : > { %v6709_v43 = vpop.permute.xlu0 %6708 }
0x442a   : > { %8781 = vmatmul.mubr.msk.f32.vlgmr.msra.gmra.mxu1 %vm431_vm3, %v6709_v43 }
0x442b   : > { %8818 = vmatprep.mubr.msk.f32.mxu1 %vm9274_vm6, %v10962_v39  ;;  %8803 = vmatpush3.msra.mxu1 %v284_v33 }
0x442c   : > { %8804 = vmatprep.subr.mxu1 %v10962_v39 }
0x442d   : > { %8805 = vmatpush3.msra.mxu1 %v283_v6 }
0x442e   : > { %8806 = vmatprep.subr.mxu1 %v10962_v39 }
0x442f   : > { %8807 = vmatpush3.msra.mxu1 %v282_v31 }
0x4430   : > { %8808 = vmatprep.subr.mxu1 %v10962_v39 }
0x4431   : > { %8809 = vmatpush3.msra.mxu1 %v281_v17 }
0x4432   : > { %8810 = vmatprep.subr.mxu1 %v10962_v39 }
0x4433   : > { %8811 = vmatpush3.msra.mxu1 %v280_v36 }
0x4434   : > { %8812 = vmatprep.subr.mxu1 %v10962_v39 }
0x4435   : > { %8813 = vmatpush3.msra.mxu1 %v279_v9 }
0x4436   : > { %8814 = vmatprep.subr.mxu1 %v10962_v39 }
0x4437   : > { %8815 = vmatpush3.msra.mxu1 %v278_v22 }
0x4438   : > { %8816 = vmatprep.subr.mxu1 %v10962_v39 }
0x4439   : > { %8817 = vmatpush3.msra.mxu1 %v277_v28 }
0x44ea   : > { %v6778_v50 = vpop.f32.mrf.mxu1 }
0x44eb   : > { %v6779_v29 = vadd.f32 %v7275_v14, %v6778_v50 }
0x44ec   : > { %v8782_v21 = vpop.f32.mrf.mxu1 }
0x44ed   : > { %v6782_v37 = vmax.f32 %v6779_v29, 0.0 }
0x44ef   : > { %8800 = vmatmul.mubr.msk.f32.vlgmr.msra.gmra.mxu0 %vm620_vm5, %v6782_v37 }
0x45af   : > { %v6856_v4 = vpop.f32.mrf.mxu0 }
0x45b0   : > { %v6857_v38 = vadd.f32 %v7277_v35, %v6856_v4 }
0x45b1   : > { %v8801_v49 = vpop.f32.mrf.mxu0 }
0x45b2   : > { %v6860_v59 = vmax.f32 %v6857_v38, 0.0 }
0x45b4   : > { %8819 = vmatmul.mubr.msk.f32.vlgmr.msra.gmra.mxu1 %vm620_vm5, %v6860_v59 }
0x4674   : > { %v6934_v40 = vpop.f32.mrf.mxu1 }
0x4675   : > { %v6935_v32 = vadd.f32 %v7279_v1, %v6934_v40 }
0x4676   : > { %v8820_v41 = vpop.f32.mrf.mxu1 }
0x4677   : > { %v7281_v47 = vmul.f32 -1.442695, %v6935_v32 }
0x4679   : > { %9017 = vpow2.f32 %v7281_v47 }
0x4686   : > { %v9018_v39 = vpop.eup %9017 }
0x4687   : > { %v6941_v10 = vadd.f32 1.0, %v9018_v39 }
0x4689   : > { %9019 = vrcp.f32 %v6941_v10 }
0x4696   : > { %v9020_v0 = vpop.eup %9019 }
0x4697   : > { %6944 = vst [vmem:[%s215_s26] sm:$0xff] %v9020_v0 }
0x4698   : > { %9210 = shalt.err (!%p9207_p3)
}
0x4699   : > { %s9211_s6 = scalar_lea.hbm %s10901_s24, 128  ;;  %s9215_s9 = scalar_lea.hbm %s10941_s3, 256 }
0x469a   : > { %p9212_p2 = scmp.ne.s32.totalorder %s10901_s24, %s9211_s6  ;;  %p9216_p4 = scmp.lt.s32.totalorder %s10901_s24, %s10941_s3 }
0x469b   : > { %p9217_p6 = scmp.lt.s32.totalorder %s9215_s9, %s9211_s6 }
0x469c   : > { %p9213_p9 = pnand %p9212_p2, %p10967_p11 }
0x469d   : > { %p9218_p8 = por %p9217_p6, %p9216_p4 }
0x469e   : > { %p9214_p1 = pneg %p9213_p9 }
0x46a0   : > { %p9219_p5 = pnand %p9218_p8, %p9214_p1 }
0x46a2   : > { %9222 = shalt.err (!%p9219_p5)
}
0x46a3   : > { %8834 = dma.vmem_to_hbm [thread:$0]  (%p10967_p11), %s6960_s30, 128, %s10901_s24, %s6946_s17  }
0x46a4 PF: > { %s6971_s27 = sand.u32 1, %s9253_s12   ;;  %p10968_p7 = scmp.ne.s32.totalorder %s10953_s19, 0 }
0x46a5   : > { %p10969_p12 = scmp.ge.s32.totalorder %s9265_s15, 2  ;;  %s6972_s28 = scalar_lea.sflag [#allocation4], %s6971_s27 }
0x46a7   : > { %p8848_p13 = pnand %p10969_p12, %p10968_p7 }
0x46a9   : > { %p8849_p0 = pneg %p8848_p13 }
0x46ab   : > { %9248 = dma.done.wait (%p8849_p0), %s6972_s28, 128  }
0x46ac   : > { %9250 = vsyncadd (%p8849_p0), %s6972_s28, 4294967168  ;;  %p17_p10 = scmp.ge.s32.totalorder %s9373_s7, 4   ;;  %s10970_s12 = smov %s9257_s13 }
0x46ad   : > { %s10971_s13 = smov %s9261_s14  ;;  %s10972_s14 = smov %s9389_s11 }
0x46ae   : > { %s10973_s15 = smov %s9373_s7  ;;  %19 = sbr.rel (!%p17_p10) target bundleno = 6 (0x6), region = 85 }
0x46b3   :  { %6977 = vsyncpa [#allocation3], 1 }
0x46b4   :  { %6979 = vsyncpa [#allocation3 + $0x1], 1 }
0x46b5   :  { %6980 = vsyncpa [#allocation6], 1 }
0x46b6   :  { %6981 = vsyncpa [#allocation4], 1 }
0x46b7   :  { %6983 = vsyncpa [#allocation4 + $0x1], 1 }

</bundles_post_ra>
